<compile_context>
chip_gen: v6e
topology: v6e:2x2x1
jax: 0.10.0
libtpu: 0.0.40
codegen_flags: <defaults>
</compile_context>

<pallas_src>
import functools

import jax
import jax.numpy as jnp
from jax.experimental import pallas as pl
from jax.experimental.pallas import tpu as pltpu

_LANE = 128


def _round_up(a, b):
    return pl.cdiv(a, b) * b


def _mlp_kernel(num_layers, *refs):
    """refs = (x_ref, w0, b0, w1, b1, ..., w_{L-1}, b_{L-1}, out_ref).

    Matmuls run on the MXU with bf16 operands and f32 accumulation; bias add
    and ReLU are f32 on the VPU (v5e has no bf16 VALU).  The final result is
    cast to bf16 for a half-width HBM writeback.
    """
    x_ref = refs[0]
    out_ref = refs[-1]
    param_refs = refs[1:-1]

    # Single in-kernel cast of the activations (input stream stays f32 in HBM;
    # no separate wrapper-side astype pass).
    h = x_ref[...].astype(jnp.bfloat16)
    for i in range(num_layers):
        w_ref = param_refs[2 * i]              # bf16 [in, out]
        b_ref = param_refs[2 * i + 1]          # f32  [1, out]
        acc = jnp.dot(h, w_ref[...], preferred_element_type=jnp.float32)
        h32 = acc + b_ref[...]                 # f32 bias add (row broadcast)
        if i < num_layers - 1:
            h32 = jnp.maximum(h32, 0.0)        # ReLU in f32
            h = h32.astype(jnp.bfloat16)       # bf16 operands for next matmul
        else:
            h = h32
    out_ref[...] = h.astype(out_ref.dtype)     # bf16, lane-dense (128-wide)


def progressive_block_forward(x, weights, biases, *, tile_n=2048):
    """Run the ProgressiveBlock MLP on x [N, input_dim] -> [N, output_dim]."""
    num_layers = len(weights)
    N, in_dim = x.shape
    out_dim = weights[-1].shape[1]

    # Lane-dense output path: pad the last layer's columns to a multiple of
    # 128 with zeros; the extra MXU columns are free and the output store
    # becomes an unmasked, full-lane vst.
    out_pad = max(_LANE, _round_up(out_dim, _LANE))
    w_last = jnp.pad(weights[-1], ((0, 0), (0, out_pad - out_dim)))
    b_last = jnp.pad(biases[-1], ((0, 0), (0, out_pad - out_dim)))
    weights = list(weights[:-1]) + [w_last]
    biases = list(biases[:-1]) + [b_last]

    # bf16 MXU weight operands (tiny arrays; negligible wrapper cost); biases
    # stay f32 for the f32 VPU bias add.
    weights = [w.astype(jnp.bfloat16) for w in weights]
    biases = [b.astype(jnp.float32) for b in biases]

    # Row tiling.  Big tile to amortize per-grid-step overhead (~0.35 us); do
    # not exceed the (256-row-rounded) problem size; keep >= 2 grid steps only
    # when the tile stays >= 1024 rows (feeds both v7x TensorCores without
    # dropping into the overhead-bound small-tile regime; no-op on v5e/v6e
    # small-N cases).
    tile_n = max(16, (int(tile_n) // 16) * 16)          # bf16 min sublane tile
    tile_n = min(tile_n, max(256, _round_up(N, 256)))
    while pl.cdiv(N, tile_n) < 2 and tile_n >= 2048:
        tile_n //= 2

    grid = (pl.cdiv(N, tile_n),)   # ragged last block handled by Pallas;
                                   # tail rows are garbage-in/garbage-out.

    # BlockSpecs: x / out tiled over rows; weights & biases are full blocks
    # re-used at every grid step (constant index_map -> no re-DMA).
    in_specs = [pl.BlockSpec((tile_n, in_dim), lambda i: (i, 0))]
    params = []
    for w, b in zip(weights, biases):
        in_specs.append(pl.BlockSpec(w.shape, lambda i: (0, 0)))
        in_specs.append(pl.BlockSpec(b.shape, lambda i: (0, 0)))
        params.extend([w, b])
    out_spec = pl.BlockSpec((tile_n, out_pad), lambda i: (i, 0))

    # VMEM budget: double-buffered f32 x tile + bf16 out tile, params (x2 for
    # double-buffering), plus a few live f32 intermediates across the unrolled
    # layer loop.  Limit = budget * 1.5 headroom, capped at 48 MiB (v7x has
    # 64 MiB physical VMEM per TensorCore).
    max_width = max(int(w.shape[1]) for w in weights)
    bytes_x = 2 * tile_n * in_dim * x.dtype.itemsize
    bytes_out = 2 * tile_n * out_pad * 2
    bytes_params = 2 * sum(int(p.size) * p.dtype.itemsize for p in params)
    bytes_interm = 3 * tile_n * max(in_dim, max_width) * 4
    budget = bytes_x + bytes_out + bytes_params + bytes_interm
    vmem_limit = min(max(int(budget * 1.5), 16 * 1024 * 1024), 48 * 1024 * 1024)
    assert budget < vmem_limit, "row tile too large for the VMEM budget"

    kernel = functools.partial(_mlp_kernel, num_layers)

    out = pl.pallas_call(
        kernel,
        out_shape=jax.ShapeDtypeStruct((N, out_pad), jnp.bfloat16),
        grid_spec=pltpu.PrefetchScalarGridSpec(
            num_scalar_prefetch=0,
            grid=grid,
            in_specs=in_specs,
            out_specs=out_spec,
        ),
        compiler_params=pltpu.CompilerParams(
            dimension_semantics=("parallel",),
            vmem_limit_bytes=vmem_limit),
    )(x, *params)

    # Slice off the padded columns and convert back to the input dtype (the
    # convert fuses into the slice copy).
    return out[:, :out_dim].astype(x.dtype)


def init_progressive_block_params(key, input_dim, hidden_dim, num_layers,
                                  output_dim):
    """Xavier-uniform weights (stored [in, out]) and zero biases."""
    dims = []
    for i in range(num_layers):
        if i == 0:
            dims.append((input_dim, hidden_dim))
        elif i == num_layers - 1:
            dims.append((hidden_dim, output_dim))
        else:
            dims.append((hidden_dim, hidden_dim))

    weights, biases = [], []
    for (fan_in, fan_out) in dims:
        key, sub = jax.random.split(key)
        bound = (6.0 / (fan_in + fan_out)) ** 0.5
        w = jax.random.uniform(sub, (fan_in, fan_out), jnp.float32,
                               minval=-bound, maxval=bound)
        b = jnp.zeros((1, fan_out), jnp.float32)
        weights.append(w)
        biases.append(b)
    return weights, biases


def _reference_forward_bf16(x, weights, biases):
    """Reference with the same numerics as the kernel (bf16 ops, f32 acc)."""
    h = x
    n = len(weights)
    for i, (w, b) in enumerate(zip(weights, biases)):
        h = jnp.dot(h.astype(jnp.bfloat16), w.astype(jnp.bfloat16),
                    preferred_element_type=jnp.float32) + b.astype(jnp.float32)
        if i < n - 1:
            h = jnp.maximum(h, 0.0)
    return h


def _reference_forward_f32(x, weights, biases):
    h = x
    n = len(weights)
    for i, (w, b) in enumerate(zip(weights, biases)):
        h = h @ w + b
        if i < n - 1:
            h = jnp.maximum(h, 0.0)
    return h


if __name__ == "__main__":
    # Shapes consistent with BungeeNeRF's ProgressiveBlock:
    #   input_dim = config.hidden_dim = 256 (base MLP features),
    #   hidden = block_hidden_dim = 128, block_num_layers = 4, output_dim = 3.
    # N is intentionally NOT a multiple of the row tile to exercise the
    # ragged last block.
    N = 1000
    input_dim = 256
    hidden_dim = 128
    num_layers = 4
    output_dim = 3

    key = jax.random.PRNGKey(0)
    key, xkey = jax.random.split(key)
    x = jax.random.normal(xkey, (N, input_dim), jnp.float32)

    weights, biases = init_progressive_block_params(
        key, input_dim, hidden_dim, num_layers, output_dim)

    out = progressive_block_forward(x, weights, biases, tile_n=2048)
    out = jax.block_until_ready(out)
    assert out.shape == (N, output_dim)
    assert out.dtype == x.dtype

    # Strict check vs a reference with matching numerics (bf16 operands, f32
    # accumulation, final bf16 rounding of the stored output).
    ref = _reference_forward_bf16(x, weights, biases)
    ref_q = ref.astype(jnp.bfloat16).astype(jnp.float32)
    assert jnp.allclose(out, ref_q, atol=1e-2, rtol=1e-2), \
        "mismatch vs bf16 reference"

    # Loose sanity check vs the pure-f32 reference (bf16 quantization error).
    ref_f32 = _reference_forward_f32(x, weights, biases)
    assert jnp.allclose(out, ref_f32, atol=1e-1, rtol=1e-1), \
        "mismatch vs f32 reference"

    print("KERNEL_OK")
</pallas_src>

<mosaic_0001>
module attributes {stable_mosaic.version = 11 : i64} {
  func.func @_mlp_kernel(%arg0: i32, %arg1: memref<1024x256xf32, #tpu.memory_space<vmem>>, %arg2: memref<256x128xbf16, #tpu.memory_space<vmem>>, %arg3: memref<1x128xf32, #tpu.memory_space<vmem>>, %arg4: memref<128x128xbf16, #tpu.memory_space<vmem>>, %arg5: memref<1x128xf32, #tpu.memory_space<vmem>>, %arg6: memref<128x128xbf16, #tpu.memory_space<vmem>>, %arg7: memref<1x128xf32, #tpu.memory_space<vmem>>, %arg8: memref<128x128xbf16, #tpu.memory_space<vmem>>, %arg9: memref<1x128xf32, #tpu.memory_space<vmem>>, %arg10: memref<1024x128xbf16, #tpu.memory_space<vmem>>) attributes {dimension_semantics = [#tpu.dimension_semantics<parallel>], iteration_bounds = array<i64: 1>, scalar_prefetch = 0 : i64, scratch_operands = 0 : i64, tpu.core_type = #tpu.core_type<tc>, window_params = [{transform_indices = @transform_0, window_bounds = array<i64: 1024, 256>}, {pipeline_mode = #tpu.pipeline_mode<synchronous>, transform_indices = @transform_1, window_bounds = array<i64: 256, 128>}, {pipeline_mode = #tpu.pipeline_mode<synchronous>, transform_indices = @transform_2, window_bounds = array<i64: 1, 128>}, {pipeline_mode = #tpu.pipeline_mode<synchronous>, transform_indices = @transform_3, window_bounds = array<i64: 128, 128>}, {pipeline_mode = #tpu.pipeline_mode<synchronous>, transform_indices = @transform_4, window_bounds = array<i64: 1, 128>}, {pipeline_mode = #tpu.pipeline_mode<synchronous>, transform_indices = @transform_5, window_bounds = array<i64: 128, 128>}, {pipeline_mode = #tpu.pipeline_mode<synchronous>, transform_indices = @transform_6, window_bounds = array<i64: 1, 128>}, {pipeline_mode = #tpu.pipeline_mode<synchronous>, transform_indices = @transform_7, window_bounds = array<i64: 128, 128>}, {pipeline_mode = #tpu.pipeline_mode<synchronous>, transform_indices = @transform_8, window_bounds = array<i64: 1, 128>}, {transform_indices = @transform_9, window_bounds = array<i64: 1024, 128>}]} {
    %c0 = arith.constant 0 : index
    %c0_0 = arith.constant 0 : index
    %0 = vector.load %arg1[%c0, %c0_0] : memref<1024x256xf32, #tpu.memory_space<vmem>>, vector<1024x256xf32>
    %1 = arith.truncf %0 : vector<1024x256xf32> to vector<1024x256xbf16>
    %c0_1 = arith.constant 0 : index
    %c0_2 = arith.constant 0 : index
    %2 = vector.load %arg2[%c0_1, %c0_2] : memref<256x128xbf16, #tpu.memory_space<vmem>>, vector<256x128xbf16>
    %cst = arith.constant dense<0.000000e+00> : vector<1024x128xf32>
    %3 = tpu.matmul %1, %2, %cst {dimension_numbers = #tpu.dot_dimension_numbers<[1], [0], [0], [1], [0, 0, 1, 1], [], []>} : vector<1024x256xbf16>, vector<256x128xbf16>, vector<1024x128xf32> -> vector<1024x128xf32>
    %c0_3 = arith.constant 0 : index
    %c0_4 = arith.constant 0 : index
    %4 = vector.load %arg3[%c0_3, %c0_4] : memref<1x128xf32, #tpu.memory_space<vmem>>, vector<1x128xf32>
    %5 = vector.broadcast %4 : vector<1x128xf32> to vector<1024x128xf32>
    %6 = arith.addf %3, %5 : vector<1024x128xf32>
    %cst_5 = arith.constant 0.000000e+00 : f32
    %7 = vector.broadcast %cst_5 : f32 to vector<1024x128xf32>
    %8 = arith.maximumf %6, %7 : vector<1024x128xf32>
    %9 = arith.truncf %8 : vector<1024x128xf32> to vector<1024x128xbf16>
    %c0_6 = arith.constant 0 : index
    %c0_7 = arith.constant 0 : index
    %10 = vector.load %arg4[%c0_6, %c0_7] : memref<128x128xbf16, #tpu.memory_space<vmem>>, vector<128x128xbf16>
    %cst_8 = arith.constant dense<0.000000e+00> : vector<1024x128xf32>
    %11 = tpu.matmul %9, %10, %cst_8 {dimension_numbers = #tpu.dot_dimension_numbers<[1], [0], [0], [1], [0, 0, 1, 1], [], []>} : vector<1024x128xbf16>, vector<128x128xbf16>, vector<1024x128xf32> -> vector<1024x128xf32>
    %c0_9 = arith.constant 0 : index
    %c0_10 = arith.constant 0 : index
    %12 = vector.load %arg5[%c0_9, %c0_10] : memref<1x128xf32, #tpu.memory_space<vmem>>, vector<1x128xf32>
    %13 = vector.broadcast %12 : vector<1x128xf32> to vector<1024x128xf32>
    %14 = arith.addf %11, %13 : vector<1024x128xf32>
    %cst_11 = arith.constant 0.000000e+00 : f32
    %15 = vector.broadcast %cst_11 : f32 to vector<1024x128xf32>
    %16 = arith.maximumf %14, %15 : vector<1024x128xf32>
    %17 = arith.truncf %16 : vector<1024x128xf32> to vector<1024x128xbf16>
    %c0_12 = arith.constant 0 : index
    %c0_13 = arith.constant 0 : index
    %18 = vector.load %arg6[%c0_12, %c0_13] : memref<128x128xbf16, #tpu.memory_space<vmem>>, vector<128x128xbf16>
    %cst_14 = arith.constant dense<0.000000e+00> : vector<1024x128xf32>
    %19 = tpu.matmul %17, %18, %cst_14 {dimension_numbers = #tpu.dot_dimension_numbers<[1], [0], [0], [1], [0, 0, 1, 1], [], []>} : vector<1024x128xbf16>, vector<128x128xbf16>, vector<1024x128xf32> -> vector<1024x128xf32>
    %c0_15 = arith.constant 0 : index
    %c0_16 = arith.constant 0 : index
    %20 = vector.load %arg7[%c0_15, %c0_16] : memref<1x128xf32, #tpu.memory_space<vmem>>, vector<1x128xf32>
    %21 = vector.broadcast %20 : vector<1x128xf32> to vector<1024x128xf32>
    %22 = arith.addf %19, %21 : vector<1024x128xf32>
    %cst_17 = arith.constant 0.000000e+00 : f32
    %23 = vector.broadcast %cst_17 : f32 to vector<1024x128xf32>
    %24 = arith.maximumf %22, %23 : vector<1024x128xf32>
    %25 = arith.truncf %24 : vector<1024x128xf32> to vector<1024x128xbf16>
    %c0_18 = arith.constant 0 : index
    %c0_19 = arith.constant 0 : index
    %26 = vector.load %arg8[%c0_18, %c0_19] : memref<128x128xbf16, #tpu.memory_space<vmem>>, vector<128x128xbf16>
    %cst_20 = arith.constant dense<0.000000e+00> : vector<1024x128xf32>
    %27 = tpu.matmul %25, %26, %cst_20 {dimension_numbers = #tpu.dot_dimension_numbers<[1], [0], [0], [1], [0, 0, 1, 1], [], []>} : vector<1024x128xbf16>, vector<128x128xbf16>, vector<1024x128xf32> -> vector<1024x128xf32>
    %c0_21 = arith.constant 0 : index
    %c0_22 = arith.constant 0 : index
    %28 = vector.load %arg9[%c0_21, %c0_22] : memref<1x128xf32, #tpu.memory_space<vmem>>, vector<1x128xf32>
    %29 = vector.broadcast %28 : vector<1x128xf32> to vector<1024x128xf32>
    %30 = arith.addf %27, %29 : vector<1024x128xf32>
    %31 = arith.truncf %30 : vector<1024x128xf32> to vector<1024x128xbf16>
    %c0_23 = arith.constant 0 : index
    %c0_24 = arith.constant 0 : index
    %32 = vector.load %arg10[%c0_23, %c0_24] : memref<1024x128xbf16, #tpu.memory_space<vmem>>, vector<1024x128xbf16>
    tpu.vector_store %arg10[%c0_23, %c0_24], %31 {strides = array<i32>} : memref<1024x128xbf16, #tpu.memory_space<vmem>>, vector<1024x128xbf16>,
    return
  }
  func.func @transform_0(%arg0: i32) -> (i32, i32) {
    %c0_i32 = arith.constant 0 : i32
    %c0_i32_0 = arith.constant 0 : i32
    return %arg0, %c0_i32 : i32, i32
  }
  func.func @transform_1(%arg0: i32) -> (i32, i32) {
    %c0_i32 = arith.constant 0 : i32
    %c0_i32_0 = arith.constant 0 : i32
    %c0_i32_1 = arith.constant 0 : i32
    return %c0_i32, %c0_i32_0 : i32, i32
  }
  func.func @transform_2(%arg0: i32) -> (i32, i32) {
    %c0_i32 = arith.constant 0 : i32
    %c0_i32_0 = arith.constant 0 : i32
    %c0_i32_1 = arith.constant 0 : i32
    return %c0_i32, %c0_i32_0 : i32, i32
  }
  func.func @transform_3(%arg0: i32) -> (i32, i32) {
    %c0_i32 = arith.constant 0 : i32
    %c0_i32_0 = arith.constant 0 : i32
    %c0_i32_1 = arith.constant 0 : i32
    return %c0_i32, %c0_i32_0 : i32, i32
  }
  func.func @transform_4(%arg0: i32) -> (i32, i32) {
    %c0_i32 = arith.constant 0 : i32
    %c0_i32_0 = arith.constant 0 : i32
    %c0_i32_1 = arith.constant 0 : i32
    return %c0_i32, %c0_i32_0 : i32, i32
  }
  func.func @transform_5(%arg0: i32) -> (i32, i32) {
    %c0_i32 = arith.constant 0 : i32
    %c0_i32_0 = arith.constant 0 : i32
    %c0_i32_1 = arith.constant 0 : i32
    return %c0_i32, %c0_i32_0 : i32, i32
  }
  func.func @transform_6(%arg0: i32) -> (i32, i32) {
    %c0_i32 = arith.constant 0 : i32
    %c0_i32_0 = arith.constant 0 : i32
    %c0_i32_1 = arith.constant 0 : i32
    return %c0_i32, %c0_i32_0 : i32, i32
  }
  func.func @transform_7(%arg0: i32) -> (i32, i32) {
    %c0_i32 = arith.constant 0 : i32
    %c0_i32_0 = arith.constant 0 : i32
    %c0_i32_1 = arith.constant 0 : i32
    return %c0_i32, %c0_i32_0 : i32, i32
  }
  func.func @transform_8(%arg0: i32) -> (i32, i32) {
    %c0_i32 = arith.constant 0 : i32
    %c0_i32_0 = arith.constant 0 : i32
    %c0_i32_1 = arith.constant 0 : i32
    return %c0_i32, %c0_i32_0 : i32, i32
  }
  func.func @transform_9(%arg0: i32) -> (i32, i32) {
    %c0_i32 = arith.constant 0 : i32
    %c0_i32_0 = arith.constant 0 : i32
    return %arg0, %c0_i32 : i32, i32
  }
}

</mosaic_0001>

<bundles_post_ra>
// kernel: tpu_custom_call.1
= control target key start
LH: loop header
LB: loop body
LE: loop exit
PB: predicated region body
PF: predicated region fallthrough
CT: control target
= control target key end

     0   :  { %14 = vsyncpa [#allocation3], 0  ;;  %s7089_s0 = inlined_call_operand.hbm [shape: f32[1000,256], index: 0, kind: input, shape index: {}]   ;;  %s7090_s1 = inlined_call_operand.hbm [shape: bf16[256,128], index: 1, kind: input, shape index: {}]   ;;  %s7091_s2 = inlined_call_operand.vmem [shape: f32[1,128], index: 2, kind: input, shape index: {}]   ;;  %s7092_s3 = inlined_call_operand.hbm [shape: bf16[128,128], index: 3, kind: input, shape index: {}]   ;;  %s7093_s4 = inlined_call_operand.vmem [shape: f32[1,128], index: 4, kind: input, shape index: {}]   ;;  %s7094_s5 = inlined_call_operand.hbm [shape: bf16[128,128], index: 5, kind: input, shape index: {}]   ;;  %s7095_s6 = inlined_call_operand.vmem [shape: f32[1,128], index: 6, kind: input, shape index: {}]   ;;  %s7096_s7 = inlined_call_operand.hbm [shape: bf16[128,128], index: 7, kind: input, shape index: {}]   ;;  %s7097_s8 = inlined_call_operand.vmem [shape: f32[1,128], index: 8, kind: input, shape index: {}]   ;;  %s7098_s9 = inlined_call_operand.hbm [shape: bf16[1000,128], index: 9, kind: output, shape index: {}]  }
   0x1   :  { %15 = vsyncpa [#allocation6], 0 }
   0x2   :  { %16 = vsyncpa [#allocation9], 0 }
   0x3   :  { %17 = vsyncpa [#allocation4], 0 }
   0x4   :  { %22 = vsyncadd [#allocation3], 768  ;;  %s5778_s30 = smov [#allocation5]  }
   0x5   :  { %s35_s10 = sshll.u32 %s5778_s30, 4  ;;  %s36_s10 = int_to_ptr.vmem [resolvable:$true] %s35_s10 }
   0x6   :  { %s5658_s11 = scalar_lea.vmem %s36_s10, 2048  ;;  %p5663_p1 = scmp.lt.s32.totalorder %s36_s10, %s36_s10 }
   0x7   :  { %p5659_p0 = scmp.ne.s32.totalorder %s36_s10, %s5658_s11  ;;  %p5664_p2 = scmp.lt.s32.totalorder %s5658_s11, %s5658_s11 }
   0x9   :  { %p5665_p3 = por %p5664_p2, %p5663_p1 }
   0xb   :  { %p5666_p4 = pnand %p5665_p3, %p5659_p0 }
   0xd   :  { %5669 = shalt.err (!%p5666_p4)
}
   0xe   :  { %s5779_s12 = smov 64   ;;  %s5780_s13 = smov 4  }
   0xf   :  { %41 = dma.hbm_to_vmem [thread:$0]  %s7090_s1, 2048, %s36_s10, [#allocation6], %s5779_s12, %s5779_s12, %s5780_s13  }
  0x10   :  { %s5781_s16 = smov [#allocation8]   ;;  %s5782_s18 = smov [#allocation2]  }
  0x11   :  { %s63_s17 = sshll.u32 %s5781_s16, 4  ;;  %s23_s19 = sshll.u32 %s5782_s18, 4  ;;  %s64_s17 = int_to_ptr.vmem [resolvable:$true] %s63_s17  ;;  %s24_s19 = int_to_ptr.vmem [resolvable:$true] %s23_s19 }
  0x12   :  { %s5678_s20 = scalar_lea.vmem %s64_s17, 1024  ;;  %p5683_p6 = scmp.lt.s32.totalorder %s64_s17, %s64_s17 }
  0x13   :  { %p5679_p5 = scmp.ne.s32.totalorder %s64_s17, %s5678_s20  ;;  %p5684_p7 = scmp.lt.s32.totalorder %s5678_s20, %s5678_s20 }
  0x15   :  { %p5685_p8 = por %p5684_p7, %p5683_p6 }
  0x17   :  { %p5686_p9 = pnand %p5685_p8, %p5679_p5 }
  0x19   :  { %5689 = shalt.err (!%p5686_p9)
}
  0x1a   :  { %69 = dma.hbm_to_vmem [thread:$0]  %s7094_s5, 1024, %s64_s17, [#allocation9], %s5779_s12, %s5779_s12, %s5780_s13  }
  0x1b   :  { %s5698_s1 = scalar_lea.vmem %s24_s19, 32000  ;;  %s5702_s23 = scalar_lea.vmem %s24_s19, 32768 }
  0x1c   :  { %p5699_p10 = scmp.ne.s32.totalorder %s24_s19, %s5698_s1  ;;  %p5703_p11 = scmp.lt.s32.totalorder %s24_s19, %s24_s19 }
  0x1d   :  { %p5704_p12 = scmp.lt.s32.totalorder %s5702_s23, %s5698_s1 }
  0x1f   :  { %p5705_p13 = por %p5704_p12, %p5703_p11 }
  0x21   :  { %p5706_p0 = pnand %p5705_p13, %p5699_p10 }
  0x23   :  { %5709 = shalt.err (!%p5706_p0)
}
  0x24   :  { %s5783_s24 = smov 256   ;;  %s5784_s25 = smov 16  }
  0x25   :  { %29 = dma.hbm_to_vmem [thread:$0]  %s7089_s0, 32000, %s24_s19, [#allocation3], %s5783_s24, %s5783_s24, %s5784_s25  }
  0x26   :  { %s5785_s28 = smov [#allocation7]   ;;  %s5786_s30 = smov [#allocation10]  }
  0x27   :  { %s49_s29 = sshll.u32 %s5785_s28, 4  ;;  %s77_s5 = sshll.u32 %s5786_s30, 4  ;;  %s50_s29 = int_to_ptr.vmem [resolvable:$true] %s49_s29  ;;  %s78_s5 = int_to_ptr.vmem [resolvable:$true] %s77_s5 }
  0x28   :  { %s5718_s10 = scalar_lea.vmem %s50_s29, 1024  ;;  %p5723_p2 = scmp.lt.s32.totalorder %s50_s29, %s50_s29 }
  0x29   :  { %p5719_p1 = scmp.ne.s32.totalorder %s50_s29, %s5718_s10  ;;  %p5724_p3 = scmp.lt.s32.totalorder %s5718_s10, %s5718_s10 }
  0x2b   :  { %p5725_p4 = por %p5724_p3, %p5723_p2 }
  0x2d   :  { %p5726_p5 = pnand %p5725_p4, %p5719_p1 }
  0x2f   :  { %5729 = shalt.err (!%p5726_p5)
}
  0x30   :  { %55 = dma.hbm_to_vmem [thread:$0]  %s7092_s3, 1024, %s50_s29, [#allocation6], %s5779_s12, %s5779_s12, %s5780_s13  }
  0x31   :  { %s5738_s0 = scalar_lea.vmem %s78_s5, 1024  ;;  %p5743_p7 = scmp.lt.s32.totalorder %s78_s5, %s78_s5 }
  0x32   :  { %p5739_p6 = scmp.ne.s32.totalorder %s78_s5, %s5738_s0  ;;  %p5744_p8 = scmp.lt.s32.totalorder %s5738_s0, %s5738_s0 }
  0x34   :  { %p5745_p9 = por %p5744_p8, %p5743_p7 }
  0x36   :  { %p5746_p10 = pnand %p5745_p9, %p5739_p6 }
  0x38   :  { %5749 = shalt.err (!%p5746_p10)
}
  0x39   :  { %83 = dma.hbm_to_vmem [thread:$0]  %s7096_s7, 1024, %s78_s5, [#allocation9], %s5779_s12, %s5779_s12, %s5780_s13  }
  0x3a   :  { %5770 = dma.done.wait [#allocation3], 32768  }
  0x3b   :  { %5771 = vsyncadd [#allocation3], 4294934528 }
  0x3c   :  { %5772 = dma.done.wait [#allocation6], 3072  }
  0x3d   :  { %5773 = vsyncadd [#allocation6], 4294964224 }
  0x3e   :  { %5774 = dma.done.wait [#allocation9], 2048  }
  0x3f   :  { %5775 = vsyncadd [#allocation9], 4294965248  ;;  %v5787_v0 = vmov 0   ;;  %v5607_v1 = vld [vmem:[#allocation5 + $0x38] sm:$0xff]   ;;  %v5608_v2 = vld [vmem:[#allocation5 + $0x30] sm:$0xff]  }
  0x40   :  { %621 = vmatprep.subr.bf16.mxu0 %v5787_v0  ;;  %v5609_v3 = vld [vmem:[#allocation5 + $0x28] sm:$0xff]   ;;  %v5610_v4 = vld [vmem:[#allocation5 + $0x20] sm:$0xff]   ;;  %v5611_v5 = vld [vmem:[#allocation5 + $0x18] sm:$0xff]  }
  0x41   :  { %622 = vmatpush1.bf16.msra.mxu0 %v5607_v1  ;;  %v103_v6 = vld [vmem:[#allocation2 + $0x8] sm:$0xff]  ;;  %v105_v7 = vld [vmem:[#allocation2 + $0x18] sm:$0xff]  ;;  %v5612_v9 = vld [vmem:[#allocation5 + $0x10] sm:$0xff]  }
  0x42   :  { %623 = vmatprep.subr.bf16.mxu0 %v5787_v0  ;;  %v359_v8 = vpack.c.bf16 %v105_v7, %v103_v6  ;;  %v5623_v10 = vld [vmem:[#allocation7 + $0x38] sm:$0xff]   ;;  %v5613_v11 = vld [vmem:[#allocation5 + $0x8] sm:$0xff]   ;;  %v5614_v12 = vld [vmem:[#allocation5] sm:$0xff]  }
  0x43   :  { %5580 = vmatprep.subr.bf16.mxu1 %v5623_v10  ;;  %v5624_v13 = vld [vmem:[#allocation7 + $0x30] sm:$0xff]   ;;  %v5615_v14 = vld [vmem:[#allocation5 + $0x78] sm:$0xff]   ;;  %v5617_v16 = vld [vmem:[#allocation5 + $0x68] sm:$0xff]  }
  0x44   :  { %653 = vmatprep.mubr.bf16.mxu0 %v359_v8  ;;  %5588 = vmatpush3.bf16.msra.mxu1 %v5623_v10  ;;  %v5616_v15 = vld [vmem:[#allocation5 + $0x70] sm:$0xff]   ;;  %v5618_v17 = vld [vmem:[#allocation5 + $0x60] sm:$0xff]   ;;  %v5619_v18 = vld [vmem:[#allocation5 + $0x58] sm:$0xff]  }
  0x45   :  { %624 = vmatpush1.bf16.msra.mxu0 %v5608_v2  ;;  %5581 = vmatprep.subr.bf16.mxu1 %v5624_v13  ;;  %v5620_v19 = vld [vmem:[#allocation5 + $0x50] sm:$0xff]   ;;  %v5621_v20 = vld [vmem:[#allocation5 + $0x48] sm:$0xff]   ;;  %v5622_v21 = vld [vmem:[#allocation5 + $0x40] sm:$0xff]  }
  0x46   :  { %625 = vmatprep.subr.bf16.mxu0 %v5787_v0  ;;  %v102_v22 = vld [vmem:[#allocation2] sm:$0xff]  ;;  %v104_v23 = vld [vmem:[#allocation2 + $0x10] sm:$0xff]  ;;  %v107_v24 = vld [vmem:[#allocation2 + $0x28] sm:$0xff] }
  0x47   :  { %v109_v25 = vld [vmem:[#allocation2 + $0x38] sm:$0xff]  ;;  %v358_v26 = vpack.c.bf16 %v104_v23, %v102_v22  ;;  %v5625_v28 = vld [vmem:[#allocation7 + $0x28] sm:$0xff]   ;;  %v106_v29 = vld [vmem:[#allocation2 + $0x20] sm:$0xff] }
  0x48   :  { %5589 = vmatpush3.bf16.msra.mxu1 %v5624_v13  ;;  %v361_v27 = vpack.c.bf16 %v109_v25, %v107_v24  ;;  %v108_v30 = vld [vmem:[#allocation2 + $0x30] sm:$0xff]  ;;  %v111_v31 = vld [vmem:[#allocation2 + $0x48] sm:$0xff]  ;;  %v113_v32 = vld [vmem:[#allocation2 + $0x58] sm:$0xff] }
  0x49   :  { %626 = vmatpush1.bf16.msra.mxu0 %v5609_v3  ;;  %5582 = vmatprep.subr.bf16.mxu1 %v5625_v28  ;;  %v360_v33 = vpack.c.bf16 %v108_v30, %v106_v29  ;;  %v363_v34 = vpack.c.bf16 %v113_v32, %v111_v31  ;;  %v110_v35 = vld [vmem:[#allocation2 + $0x40] sm:$0xff]  ;;  %v112_v36 = vld [vmem:[#allocation2 + $0x50] sm:$0xff]  ;;  %v115_v37 = vld [vmem:[#allocation2 + $0x68] sm:$0xff] }
  0x4a   :  { %627 = vmatprep.subr.bf16.mxu0 %v5787_v0  ;;  %v117_v38 = vld [vmem:[#allocation2 + $0x78] sm:$0xff]  ;;  %v362_v39 = vpack.c.bf16 %v112_v36, %v110_v35  ;;  %v114_v41 = vld [vmem:[#allocation2 + $0x60] sm:$0xff]  ;;  %v116_v42 = vld [vmem:[#allocation2 + $0x70] sm:$0xff] }
  0x4b   :  { %v365_v40 = vpack.c.bf16 %v117_v38, %v115_v37  ;;  %v119_v43 = vld [vmem:[#allocation2 + $0x88] sm:$0xff]  ;;  %v121_v44 = vld [vmem:[#allocation2 + $0x98] sm:$0xff]  ;;  %v364_v45 = vpack.c.bf16 %v116_v42, %v114_v41  ;;  %v118_v47 = vld [vmem:[#allocation2 + $0x80] sm:$0xff] }
  0x4c   :  { %5590 = vmatpush3.bf16.msra.mxu1 %v5625_v28  ;;  %v367_v46 = vpack.c.bf16 %v121_v44, %v119_v43  ;;  %v120_v48 = vld [vmem:[#allocation2 + $0x90] sm:$0xff]  ;;  %v123_v49 = vld [vmem:[#allocation2 + $0xa8] sm:$0xff]  ;;  %v125_v50 = vld [vmem:[#allocation2 + $0xb8] sm:$0xff] }
  0x4d   :  { %628 = vmatpush1.bf16.msra.mxu0 %v5610_v4  ;;  %v366_v51 = vpack.c.bf16 %v120_v48, %v118_v47  ;;  %v369_v52 = vpack.c.bf16 %v125_v50, %v123_v49  ;;  %v122_v53 = vld [vmem:[#allocation2 + $0xa0] sm:$0xff]  ;;  %v124_v54 = vld [vmem:[#allocation2 + $0xb0] sm:$0xff]  ;;  %v127_v55 = vld [vmem:[#allocation2 + $0xc8] sm:$0xff] }
  0x4e   :  { %629 = vmatprep.subr.bf16.mxu0 %v5787_v0  ;;  %v129_v56 = vld [vmem:[#allocation2 + $0xd8] sm:$0xff]  ;;  %v368_v57 = vpack.c.bf16 %v124_v54, %v122_v53  ;;  %v126_v59 = vld [vmem:[#allocation2 + $0xc0] sm:$0xff]  ;;  %v128_v60 = vld [vmem:[#allocation2 + $0xd0] sm:$0xff] }
  0x4f   :  { %v371_v58 = vpack.c.bf16 %v129_v56, %v127_v55  ;;  %v131_v61 = vld [vmem:[#allocation2 + $0xe8] sm:$0xff]  ;;  %v133_v62 = vld [vmem:[#allocation2 + $0xf8] sm:$0xff]  ;;  %v370_v63 = vpack.c.bf16 %v128_v60, %v126_v59  ;;  %v130_v1 = vld [vmem:[#allocation2 + $0xe0] sm:$0xff] }
  0x50   :  { %v132_v2 = vld [vmem:[#allocation2 + $0xf0] sm:$0xff]  ;;  %v135_v3 = vld [vmem:[#allocation2 + $0x108] sm:$0xff]  ;;  %v137_v4 = vld [vmem:[#allocation2 + $0x118] sm:$0xff] }
  0x51   :  { %630 = vmatpush1.bf16.msra.mxu0 %v5611_v5  ;;  %v372_v5 = vpack.c.bf16 %v132_v2, %v130_v1  ;;  %v375_v6 = vpack.c.bf16 %v137_v4, %v135_v3  ;;  %v134_v7 = vld [vmem:[#allocation2 + $0x100] sm:$0xff]  ;;  %v136_v8 = vld [vmem:[#allocation2 + $0x110] sm:$0xff]  ;;  %v147_v22 = vld [vmem:[#allocation2 + $0x168] sm:$0xff] }
  0x52   :  { %631 = vmatprep.subr.bf16.mxu0 %v5787_v0  ;;  %v149_v23 = vld [vmem:[#allocation2 + $0x178] sm:$0xff]  ;;  %v150_v32 = vld [vmem:[#allocation2 + $0x180] sm:$0xff] }
  0x53   :  { %v381_v25 = vpack.c.bf16 %v149_v23, %v147_v22  ;;  %v153_v29 = vld [vmem:[#allocation2 + $0x198] sm:$0xff]  ;;  %v154_v38 = vld [vmem:[#allocation2 + $0x1a0] sm:$0xff] }
  0x54   :  { %v157_v35 = vld [vmem:[#allocation2 + $0x1b8] sm:$0xff]  ;;  %v158_v44 = vld [vmem:[#allocation2 + $0x1c0] sm:$0xff] }
  0x55   :  { %632 = vmatpush1.bf16.msra.mxu0 %v5612_v9  ;;  %v139_v9 = vld [vmem:[#allocation2 + $0x128] sm:$0xff]  ;;  %v161_v41 = vld [vmem:[#allocation2 + $0x1d8] sm:$0xff]  ;;  %v162_v50 = vld [vmem:[#allocation2 + $0x1e0] sm:$0xff] }
  0x56   :  { %633 = vmatprep.subr.bf16.mxu0 %v5787_v0  ;;  %v165_v47 = vld [vmem:[#allocation2 + $0x1f8] sm:$0xff]  ;;  %v166_v56 = vld [vmem:[#allocation2 + $0x200] sm:$0xff] }
  0x57   :  { %v169_v53 = vld [vmem:[#allocation2 + $0x218] sm:$0xff]  ;;  %v186_v23 = vld [vmem:[#allocation2 + $0x2a0] sm:$0xff] }
  0x58   :  { %v173_v59 = vld [vmem:[#allocation2 + $0x238] sm:$0xff] }
  0x59   :  { %634 = vmatpush1.bf16.msra.mxu0 %v5613_v11  ;;  %v374_v11 = vpack.c.bf16 %v136_v8, %v134_v7  ;;  %v177_v1 = vld [vmem:[#allocation2 + $0x258] sm:$0xff]  ;;  %v179_v7 = vld [vmem:[#allocation2 + $0x268] sm:$0xff] }
  0x5a   :  { %635 = vmatprep.subr.bf16.mxu0 %v5787_v0  ;;  %v5627_v2 = vld [vmem:[#allocation7 + $0x18] sm:$0xff]  }
  0x5b   :  { %v181_v8 = vld [vmem:[#allocation2 + $0x278] sm:$0xff] }
  0x5d   :  { %636 = vmatpush1.bf16.msra.mxu0 %v5614_v12 }
  0x5e   :  { %637 = vmatprep.subr.bf16.mxu0 %v5787_v0 }
  0x61   :  { %638 = vmatpush2.bf16.msra.mxu0 %v5615_v14  ;;  %v140_v14 = vld [vmem:[#allocation2 + $0x130] sm:$0xff] }
  0x62   :  { %639 = vmatprep.subr.bf16.mxu0 %v5787_v0 }
  0x65   :  { %640 = vmatpush2.bf16.msra.mxu0 %v5616_v15  ;;  %v143_v15 = vld [vmem:[#allocation2 + $0x148] sm:$0xff] }
  0x66   :  { %641 = vmatprep.subr.bf16.mxu0 %v5787_v0 }
  0x69   :  { %642 = vmatpush2.bf16.msra.mxu0 %v5617_v16  ;;  %v145_v16 = vld [vmem:[#allocation2 + $0x158] sm:$0xff] }
  0x6a   :  { %643 = vmatprep.subr.bf16.mxu0 %v5787_v0 }
  0x6d   :  { %644 = vmatpush2.bf16.msra.mxu0 %v5618_v17  ;;  %v5626_v17 = vld [vmem:[#allocation7 + $0x20] sm:$0xff]  }
  0x6e   :  { %645 = vmatprep.subr.bf16.mxu0 %v5787_v0  ;;  %5583 = vmatprep.subr.bf16.mxu1 %v5626_v17 }
  0x6f   :  { %5591 = vmatpush3.bf16.msra.mxu1 %v5626_v17 }
  0x70   :  { %5584 = vmatprep.subr.bf16.mxu1 %v5627_v2 }
  0x71   :  { %646 = vmatpush2.bf16.msra.mxu0 %v5619_v18 }
  0x72   :  { %647 = vmatprep.subr.bf16.mxu0 %v5787_v0 }
  0x73   :  { %5592 = vmatpush3.bf16.msra.mxu1 %v5627_v2 }
  0x75   :  { %648 = vmatpush2.bf16.msra.mxu0 %v5620_v19  ;;  %v379_v19 = vpack.c.bf16 %v145_v16, %v143_v15 }
  0x76   :  { %649 = vmatprep.subr.bf16.mxu0 %v5787_v0 }
  0x79   :  { %650 = vmatpush2.bf16.msra.mxu0 %v5621_v20  ;;  %v142_v20 = vld [vmem:[#allocation2 + $0x140] sm:$0xff] }
  0x7a   :  { %651 = vmatprep.subr.bf16.mxu0 %v5787_v0  ;;  %v373_v0 = vpack.c.bf16 %v133_v62, %v131_v61  ;;  %v170_v62 = vld [vmem:[#allocation2 + $0x220] sm:$0xff] }
  0x7d   :  { %652 = vmatpush2.bf16.msra.mxu0 %v5622_v21  ;;  %v144_v21 = vld [vmem:[#allocation2 + $0x150] sm:$0xff] }
  0x7e   :  { %5148 = vmatprep.subr.bf16.mxu0 %v5623_v10  ;;  %v378_v24 = vpack.c.bf16 %v144_v21, %v142_v20  ;;  %v189_v20 = vld [vmem:[#allocation2 + $0x2b8] sm:$0xff] }
  0x80   :  { %654 = vmatmul.mubr.bf16.vlgmr.msra.gmra.mxu0 %v358_v26  ;;  %v146_v26 = vld [vmem:[#allocation2 + $0x160] sm:$0xff] }
  0x81   :  { %5149 = vmatpush3.bf16.msra.mxu0 %v5623_v10  ;;  %661 = vmatprep.mubr.bf16.mxu0 %v361_v27  ;;  %v141_v10 = vld [vmem:[#allocation2 + $0x138] sm:$0xff]  ;;  %v148_v27 = vld [vmem:[#allocation2 + $0x170] sm:$0xff] }
  0x82   :  { %5150 = vmatprep.subr.bf16.mxu0 %v5624_v13  ;;  %v377_v12 = vpack.c.bf16 %v141_v10, %v139_v9  ;;  %v380_v30 = vpack.c.bf16 %v148_v27, %v146_v26  ;;  %v397_v10 = vpack.c.bf16 %v181_v8, %v179_v7  ;;  %v193_v26 = vld [vmem:[#allocation2 + $0x2d8] sm:$0xff] }
  0x85   :  { %5151 = vmatpush3.bf16.msra.mxu0 %v5624_v13  ;;  %v138_v13 = vld [vmem:[#allocation2 + $0x120] sm:$0xff] }
  0x86   :  { %5152 = vmatprep.subr.bf16.mxu0 %v5625_v28  ;;  %v376_v18 = vpack.c.bf16 %v140_v14, %v138_v13  ;;  %v183_v13 = vld [vmem:[#allocation2 + $0x288] sm:$0xff]  ;;  %v185_v14 = vld [vmem:[#allocation2 + $0x298] sm:$0xff] }
  0x87   :  { %v399_v16 = vpack.c.bf16 %v185_v14, %v183_v13 }
  0x88   :  { %662 = vmatmul.mubr.bf16.gmra.mxu0 %v360_v33  ;;  %v152_v33 = vld [vmem:[#allocation2 + $0x190] sm:$0xff] }
  0x89   :  { %669 = vmatprep.mubr.bf16.mxu0 %v363_v34  ;;  %5153 = vmatpush3.bf16.msra.mxu0 %v5625_v28  ;;  %v151_v28 = vld [vmem:[#allocation2 + $0x188] sm:$0xff]  ;;  %v382_v36 = vpack.c.bf16 %v152_v33, %v150_v32  ;;  %v197_v32 = vld [vmem:[#allocation2 + $0x2f8] sm:$0xff] }
  0x8a   :  { %5154 = vmatprep.subr.bf16.mxu0 %v5626_v17  ;;  %v383_v31 = vpack.c.bf16 %v153_v29, %v151_v28  ;;  %v155_v34 = vld [vmem:[#allocation2 + $0x1a8] sm:$0xff]  ;;  %v190_v29 = vld [vmem:[#allocation2 + $0x2c0] sm:$0xff] }
  0x8b   :  { %v385_v37 = vpack.c.bf16 %v157_v35, %v155_v34  ;;  %v194_v35 = vld [vmem:[#allocation2 + $0x2e0] sm:$0xff] }
  0x8d   :  { %5155 = vmatpush3.bf16.msra.mxu0 %v5626_v17  ;;  %v182_v17 = vld [vmem:[#allocation2 + $0x280] sm:$0xff] }
  0x8e   :  { %5156 = vmatprep.subr.bf16.mxu0 %v5627_v2 }
  0x90   :  { %670 = vmatmul.mubr.bf16.gmra.mxu0 %v362_v39  ;;  %v156_v39 = vld [vmem:[#allocation2 + $0x1b0] sm:$0xff] }
  0x91   :  { %677 = vmatprep.mubr.bf16.mxu0 %v365_v40  ;;  %v159_v40 = vld [vmem:[#allocation2 + $0x1c8] sm:$0xff]  ;;  %v384_v42 = vpack.c.bf16 %v156_v39, %v154_v38  ;;  %5157 = vmatpush3.bf16.msra.mxu0 %v5627_v2  ;;  %v201_v38 = vld [vmem:[#allocation2 + $0x318] sm:$0xff]  ;;  %v208_v2 = vld [vmem:[#allocation2 + $0x350] sm:$0xff] }
  0x92   :  { %v387_v43 = vpack.c.bf16 %v161_v41, %v159_v40  ;;  %v198_v41 = vld [vmem:[#allocation2 + $0x300] sm:$0xff] }
  0x98   :  { %678 = vmatmul.mubr.bf16.gmra.mxu0 %v364_v45  ;;  %v160_v45 = vld [vmem:[#allocation2 + $0x1d0] sm:$0xff] }
  0x99   :  { %685 = vmatprep.mubr.bf16.mxu0 %v367_v46  ;;  %v163_v46 = vld [vmem:[#allocation2 + $0x1e8] sm:$0xff]  ;;  %v386_v48 = vpack.c.bf16 %v160_v45, %v158_v44  ;;  %v205_v44 = vld [vmem:[#allocation2 + $0x338] sm:$0xff] }
  0x9a   :  { %v389_v49 = vpack.c.bf16 %v165_v47, %v163_v46  ;;  %v5869_v47 = vld [vmem:[%s7091_s2] ss:$0 sm:$0xff] }
  0xa0   :  { %686 = vmatmul.mubr.bf16.gmra.mxu0 %v366_v51  ;;  %v164_v51 = vld [vmem:[#allocation2 + $0x1f0] sm:$0xff] }
  0xa1   :  { %693 = vmatprep.mubr.bf16.mxu0 %v369_v52  ;;  %v167_v52 = vld [vmem:[#allocation2 + $0x208] sm:$0xff]  ;;  %v388_v54 = vpack.c.bf16 %v164_v51, %v162_v50  ;;  %v204_v50 = vld [vmem:[#allocation2 + $0x330] sm:$0xff] }
  0xa2   :  { %v391_v55 = vpack.c.bf16 %v169_v53, %v167_v52  ;;  %v207_v52 = vld [vmem:[#allocation2 + $0x348] sm:$0xff]  ;;  %v209_v53 = vld [vmem:[#allocation2 + $0x358] sm:$0xff] }
  0xa8   :  { %694 = vmatmul.mubr.bf16.gmra.mxu0 %v368_v57  ;;  %v168_v57 = vld [vmem:[#allocation2 + $0x210] sm:$0xff] }
  0xa9   :  { %701 = vmatprep.mubr.bf16.mxu0 %v371_v58  ;;  %v171_v58 = vld [vmem:[#allocation2 + $0x228] sm:$0xff]  ;;  %v390_v60 = vpack.c.bf16 %v168_v57, %v166_v56 }
  0xaa   :  { %v393_v61 = vpack.c.bf16 %v173_v59, %v171_v58  ;;  %v411_v59 = vpack.c.bf16 %v209_v53, %v207_v52 }
  0xb0   :  { %702 = vmatmul.mubr.bf16.gmra.mxu0 %v370_v63  ;;  %v172_v63 = vld [vmem:[#allocation2 + $0x230] sm:$0xff] }
  0xb1   :  { %709 = vmatprep.mubr.bf16.mxu0 %v373_v0  ;;  %v175_v0 = vld [vmem:[#allocation2 + $0x248] sm:$0xff]  ;;  %v392_v3 = vpack.c.bf16 %v172_v63, %v170_v62 }
  0xb2   :  { %v395_v4 = vpack.c.bf16 %v177_v1, %v175_v0  ;;  %v206_v1 = vld [vmem:[#allocation2 + $0x340] sm:$0xff] }
  0xb3   :  { %v410_v8 = vpack.c.bf16 %v208_v2, %v206_v1  ;;  %v227_v2 = vld [vmem:[#allocation2 + $0x3e8] sm:$0xff] }
  0xb8   :  { %710 = vmatmul.mubr.bf16.gmra.mxu0 %v372_v5  ;;  %v174_v5 = vld [vmem:[#allocation2 + $0x240] sm:$0xff] }
  0xb9   :  { %717 = vmatprep.mubr.bf16.mxu0 %v375_v6  ;;  %v176_v6 = vld [vmem:[#allocation2 + $0x250] sm:$0xff] }
  0xba   :  { %v394_v9 = vpack.c.bf16 %v176_v6, %v174_v5  ;;  %v213_v5 = vld [vmem:[#allocation2 + $0x378] sm:$0xff] }
  0xc0   :  { %718 = vmatmul.mubr.bf16.gmra.mxu0 %v374_v11  ;;  %v178_v11 = vld [vmem:[#allocation2 + $0x260] sm:$0xff] }
  0xc1   :  { %725 = vmatprep.mubr.bf16.mxu0 %v377_v12  ;;  %v180_v12 = vld [vmem:[#allocation2 + $0x270] sm:$0xff] }
  0xc2   :  { %v396_v15 = vpack.c.bf16 %v180_v12, %v178_v11 }
  0xc8   :  { %726 = vmatmul.mubr.bf16.gmra.mxu0 %v376_v18  ;;  %v184_v18 = vld [vmem:[#allocation2 + $0x290] sm:$0xff] }
  0xc9   :  { %733 = vmatprep.mubr.bf16.mxu0 %v379_v19  ;;  %v187_v19 = vld [vmem:[#allocation2 + $0x2a8] sm:$0xff]  ;;  %v398_v21 = vpack.c.bf16 %v184_v18, %v182_v17  ;;  %v212_v17 = vld [vmem:[#allocation2 + $0x370] sm:$0xff] }
  0xca   :  { %v401_v22 = vpack.c.bf16 %v189_v20, %v187_v19  ;;  %v215_v19 = vld [vmem:[#allocation2 + $0x388] sm:$0xff]  ;;  %v217_v20 = vld [vmem:[#allocation2 + $0x398] sm:$0xff] }
  0xd0   :  { %734 = vmatmul.mubr.bf16.gmra.mxu0 %v378_v24  ;;  %v188_v24 = vld [vmem:[#allocation2 + $0x2b0] sm:$0xff] }
  0xd1   :  { %741 = vmatprep.mubr.bf16.mxu0 %v381_v25  ;;  %v191_v25 = vld [vmem:[#allocation2 + $0x2c8] sm:$0xff]  ;;  %v400_v27 = vpack.c.bf16 %v188_v24, %v186_v23 }
  0xd2   :  { %v403_v28 = vpack.c.bf16 %v193_v26, %v191_v25  ;;  %v415_v25 = vpack.c.bf16 %v217_v20, %v215_v19  ;;  %v233_v19 = vld [vmem:[#allocation2 + $0x418] sm:$0xff] }
  0xd8   :  { %742 = vmatmul.mubr.bf16.gmra.mxu0 %v380_v30  ;;  %v192_v30 = vld [vmem:[#allocation2 + $0x2d0] sm:$0xff] }
  0xd9   :  { %749 = vmatprep.mubr.bf16.mxu0 %v383_v31  ;;  %v195_v31 = vld [vmem:[#allocation2 + $0x2e8] sm:$0xff]  ;;  %v402_v33 = vpack.c.bf16 %v192_v30, %v190_v29 }
  0xda   :  { %v405_v34 = vpack.c.bf16 %v197_v32, %v195_v31  ;;  %v214_v31 = vld [vmem:[#allocation2 + $0x380] sm:$0xff]  ;;  %v216_v32 = vld [vmem:[#allocation2 + $0x390] sm:$0xff] }
  0xe0   :  { %750 = vmatmul.mubr.bf16.gmra.mxu0 %v382_v36  ;;  %v196_v36 = vld [vmem:[#allocation2 + $0x2f0] sm:$0xff] }
  0xe1   :  { %757 = vmatprep.mubr.bf16.mxu0 %v385_v37  ;;  %v199_v37 = vld [vmem:[#allocation2 + $0x308] sm:$0xff]  ;;  %v404_v39 = vpack.c.bf16 %v196_v36, %v194_v35  ;;  %v221_v35 = vld [vmem:[#allocation2 + $0x3b8] sm:$0xff] }
  0xe2   :  { %v407_v40 = vpack.c.bf16 %v201_v38, %v199_v37  ;;  %v414_v38 = vpack.c.bf16 %v216_v32, %v214_v31  ;;  %v230_v31 = vld [vmem:[#allocation2 + $0x400] sm:$0xff]  ;;  %v232_v32 = vld [vmem:[#allocation2 + $0x410] sm:$0xff] }
  0xe8   :  { %758 = vmatmul.mubr.bf16.gmra.mxu0 %v384_v42  ;;  %v200_v42 = vld [vmem:[#allocation2 + $0x310] sm:$0xff] }
  0xe9   :  { %765 = vmatprep.mubr.bf16.mxu0 %v387_v43  ;;  %v203_v43 = vld [vmem:[#allocation2 + $0x328] sm:$0xff]  ;;  %v406_v45 = vpack.c.bf16 %v200_v42, %v198_v41 }
  0xea   :  { %v409_v46 = vpack.c.bf16 %v205_v44, %v203_v43 }
  0xf0   :  { %766 = vmatmul.mubr.bf16.gmra.mxu0 %v386_v48 }
  0xf1   :  { %773 = vmatprep.mubr.bf16.mxu0 %v389_v49  ;;  %v202_v49 = vld [vmem:[#allocation2 + $0x320] sm:$0xff] }
  0xf2   :  { %v408_v57 = vpack.c.bf16 %v204_v50, %v202_v49  ;;  %v223_v50 = vld [vmem:[#allocation2 + $0x3c8] sm:$0xff] }
  0xf8   :  { %774 = vmatmul.mubr.bf16.gmra.mxu0 %v388_v54 }
  0xf9   :  { %781 = vmatprep.mubr.bf16.mxu0 %v391_v55  ;;  %v5628_v55 = vld [vmem:[#allocation7 + $0x10] sm:$0xff]  }
  0xfa   :  { %5158 = vmatprep.subr.bf16.mxu0 %v5628_v55  ;;  %5585 = vmatprep.subr.bf16.mxu1 %v5628_v55 }
  0xfb   :  { %5159 = vmatpush3.bf16.msra.mxu0 %v5628_v55  ;;  %5593 = vmatpush3.bf16.msra.mxu1 %v5628_v55 }
 0x100   :  { %782 = vmatmul.mubr.bf16.gmra.mxu0 %v390_v60 }
 0x101   :  { %789 = vmatprep.mubr.bf16.mxu0 %v393_v61 }
 0x108   :  { %790 = vmatmul.mubr.bf16.gmra.mxu0 %v392_v3 }
 0x109   :  { %797 = vmatprep.mubr.bf16.mxu0 %v395_v4  ;;  %v211_v4 = vld [vmem:[#allocation2 + $0x368] sm:$0xff] }
 0x110   :  { %798 = vmatmul.mubr.bf16.gmra.mxu0 %v394_v9 }
 0x111   :  { %805 = vmatprep.mubr.bf16.mxu0 %v397_v10  ;;  %v413_v10 = vpack.c.bf16 %v213_v5, %v211_v4 }
 0x118   :  { %806 = vmatmul.mubr.bf16.gmra.mxu0 %v396_v15 }
 0x119   :  { %813 = vmatprep.mubr.bf16.mxu0 %v399_v16  ;;  %v210_v16 = vld [vmem:[#allocation2 + $0x360] sm:$0xff] }
 0x11a   :  { %v412_v23 = vpack.c.bf16 %v212_v17, %v210_v16  ;;  %v228_v16 = vld [vmem:[#allocation2 + $0x3f0] sm:$0xff] }
 0x120   :  { %814 = vmatmul.mubr.bf16.gmra.mxu0 %v398_v21 }
 0x121   :  { %821 = vmatprep.mubr.bf16.mxu0 %v401_v22 }
 0x128   :  { %822 = vmatmul.mubr.bf16.gmra.mxu0 %v400_v27 }
 0x129   :  { %829 = vmatprep.mubr.bf16.mxu0 %v403_v28 }
 0x130   :  { %830 = vmatmul.mubr.bf16.gmra.mxu0 %v402_v33 }
 0x131   :  { %837 = vmatprep.mubr.bf16.mxu0 %v405_v34  ;;  %v219_v34 = vld [vmem:[#allocation2 + $0x3a8] sm:$0xff] }
 0x138   :  { %838 = vmatmul.mubr.bf16.gmra.mxu0 %v404_v39 }
 0x139   :  { %845 = vmatprep.mubr.bf16.mxu0 %v407_v40  ;;  %v417_v40 = vpack.c.bf16 %v221_v35, %v219_v34  ;;  %v235_v34 = vld [vmem:[#allocation2 + $0x428] sm:$0xff]  ;;  %v237_v35 = vld [vmem:[#allocation2 + $0x438] sm:$0xff] }
 0x140   :  { %v655_v48 = vpop.f32.mrf.mxu0  ;;  %846 = vmatmul.mubr.bf16.gmra.mxu0 %v406_v45 }
 0x141   :  { %853 = vmatprep.mubr.bf16.mxu0 %v409_v46  ;;  %v656_v54 = vadd.f32 %v5869_v47, %v655_v48  ;;  %v218_v46 = vld [vmem:[#allocation2 + $0x3a0] sm:$0xff]  ;;  %v220_v48 = vld [vmem:[#allocation2 + $0x3b0] sm:$0xff] }
 0x142   :  { %v657_v51 = vpop.f32.mrf.mxu0 }
 0x143   :  { %v1166_v61 = vmax.f32 %v656_v54, 0.0  ;;  %v225_v51 = vld [vmem:[#allocation2 + $0x3d8] sm:$0xff]  ;;  %v416_v54 = vpack.c.bf16 %v220_v48, %v218_v46  ;;  %v234_v48 = vld [vmem:[#allocation2 + $0x420] sm:$0xff] }
 0x144   :  { %v658_v56 = vpop.f32.mrf.mxu0 }
 0x145   :  { %v659_v58 = vadd.f32 %v5869_v47, %v658_v56  ;;  %v419_v56 = vpack.c.bf16 %v225_v51, %v223_v50  ;;  %v239_v51 = vld [vmem:[#allocation2 + $0x448] sm:$0xff] }
 0x146   :  { %v660_v60 = vpop.f32.mrf.mxu0 }
 0x147   :  { %v1167_v62 = vmax.f32 %v659_v58, 0.0 }
 0x148   :  { %v663_v63 = vpop.f32.mrf.mxu0  ;;  %854 = vmatmul.mubr.bf16.gmra.mxu0 %v408_v57 }
 0x149   :  { %v5873_v0 = vpack.c.bf16 %v1167_v62, %v1166_v61  ;;  %861 = vmatprep.mubr.bf16.mxu0 %v411_v59  ;;  %v664_v6 = vadd.f32 %v5869_v47, %v663_v63  ;;  %v222_v62 = vld [vmem:[#allocation2 + $0x3c0] sm:$0xff]  ;;  %v224_v63 = vld [vmem:[#allocation2 + $0x3d0] sm:$0xff] }
 0x14a   :  { %v665_v3 = vpop.f32.mrf.mxu0 }
 0x14b   :  { %v1168_v12 = vmax.f32 %v664_v6, 0.0  ;;  %v229_v3 = vld [vmem:[#allocation2 + $0x3f8] sm:$0xff]  ;;  %v418_v6 = vpack.c.bf16 %v224_v63, %v222_v62 }
 0x14c   :  { %v666_v7 = vpop.f32.mrf.mxu0 }
 0x14d   :  { %v667_v9 = vadd.f32 %v5869_v47, %v666_v7 }
 0x14e   :  { %v668_v11 = vpop.f32.mrf.mxu0 }
 0x14f   :  { %v1169_v13 = vmax.f32 %v667_v9, 0.0 }
 0x150   :  { %v671_v14 = vpop.f32.mrf.mxu0  ;;  %862 = vmatmul.mubr.bf16.gmra.mxu0 %v410_v8  ;;  %v421_v8 = vpack.c.bf16 %v229_v3, %v227_v2  ;;  %v238_v2 = vld [vmem:[#allocation2 + $0x440] sm:$0xff]  ;;  %v240_v3 = vld [vmem:[#allocation2 + $0x450] sm:$0xff] }
 0x151   :  { %v5877_v15 = vpack.c.bf16 %v1169_v13, %v1168_v12  ;;  %869 = vmatprep.mubr.bf16.mxu0 %v413_v10  ;;  %v672_v21 = vadd.f32 %v5869_v47, %v671_v14  ;;  %v226_v14 = vld [vmem:[#allocation2 + $0x3e0] sm:$0xff] }
 0x152   :  { %v673_v18 = vpop.f32.mrf.mxu0 }
 0x153   :  { %v1170_v27 = vmax.f32 %v672_v21, 0.0  ;;  %v231_v18 = vld [vmem:[#allocation2 + $0x408] sm:$0xff] }
 0x154   :  { %v674_v22 = vpop.f32.mrf.mxu0 }
 0x155   :  { %v675_v24 = vadd.f32 %v5869_v47, %v674_v22  ;;  %v420_v22 = vpack.c.bf16 %v228_v16, %v226_v14 }
 0x156   :  { %v676_v26 = vpop.f32.mrf.mxu0 }
 0x157   :  { %v1171_v28 = vmax.f32 %v675_v24, 0.0  ;;  %v423_v24 = vpack.c.bf16 %v233_v19, %v231_v18  ;;  %v242_v19 = vld [vmem:[#allocation2 + $0x460] sm:$0xff] }
 0x158   :  { %v679_v29 = vpop.f32.mrf.mxu0  ;;  %870 = vmatmul.mubr.bf16.gmra.mxu0 %v412_v23 }
 0x159   :  { %v5881_v30 = vpack.c.bf16 %v1171_v28, %v1170_v27  ;;  %877 = vmatprep.mubr.bf16.mxu0 %v415_v25  ;;  %v680_v36 = vadd.f32 %v5869_v47, %v679_v29 }
 0x15a   :  { %v681_v33 = vpop.f32.mrf.mxu0 }
 0x15b   :  { %v1172_v42 = vmax.f32 %v680_v36, 0.0 }
 0x15c   :  { %v682_v37 = vpop.f32.mrf.mxu0 }
 0x15d   :  { %v683_v39 = vadd.f32 %v5869_v47, %v682_v37 }
 0x15e   :  { %v684_v41 = vpop.f32.mrf.mxu0 }
 0x15f   :  { %v1173_v43 = vmax.f32 %v683_v39, 0.0 }
 0x160   :  { %v687_v44 = vpop.f32.mrf.mxu0  ;;  %878 = vmatmul.mubr.bf16.gmra.mxu0 %v414_v38  ;;  %v422_v38 = vpack.c.bf16 %v232_v32, %v230_v31 }
 0x161   :  { %v5885_v45 = vpack.c.bf16 %v1173_v43, %v1172_v42  ;;  %885 = vmatprep.mubr.bf16.mxu0 %v417_v40  ;;  %v688_v52 = vadd.f32 %v5869_v47, %v687_v44  ;;  %v425_v40 = vpack.c.bf16 %v237_v35, %v235_v34 }
 0x162   :  { %v689_v49 = vpop.f32.mrf.mxu0 }
 0x163   :  { %v1174_v58 = vmax.f32 %v688_v52, 0.0  ;;  %v236_v49 = vld [vmem:[#allocation2 + $0x430] sm:$0xff]  ;;  %v241_v52 = vld [vmem:[#allocation2 + $0x458] sm:$0xff] }
 0x164   :  { %v690_v53 = vpop.f32.mrf.mxu0 }
 0x165   :  { %v691_v55 = vadd.f32 %v5869_v47, %v690_v53 }
 0x166   :  { %v692_v57 = vpop.f32.mrf.mxu0 }
 0x167   :  { %v1175_v59 = vmax.f32 %v691_v55, 0.0 }
 0x168   :  { %v695_v60 = vpop.f32.mrf.mxu0  ;;  %886 = vmatmul.mubr.bf16.gmra.mxu0 %v416_v54  ;;  %v5629_v54 = vld [vmem:[#allocation7 + $0x8] sm:$0xff]  }
 0x169   :  { %v5889_v61 = vpack.c.bf16 %v1175_v59, %v1174_v58  ;;  %893 = vmatprep.mubr.bf16.mxu0 %v419_v56  ;;  %v696_v4 = vadd.f32 %v5869_v47, %v695_v60  ;;  %v424_v56 = vpack.c.bf16 %v236_v49, %v234_v48  ;;  %v427_v58 = vpack.c.bf16 %v241_v52, %v239_v51 }
 0x16a   :  { %v697_v1 = vpop.f32.mrf.mxu0  ;;  %5160 = vmatprep.subr.bf16.mxu0 %v5629_v54  ;;  %5586 = vmatprep.subr.bf16.mxu1 %v5629_v54 }
 0x16b   :  { %v1176_v10 = vmax.f32 %v696_v4, 0.0  ;;  %5161 = vmatpush3.bf16.msra.mxu0 %v5629_v54  ;;  %5594 = vmatpush3.bf16.msra.mxu1 %v5629_v54  ;;  %v250_v54 = vld [vmem:[#allocation2 + $0x4a0] sm:$0xff] }
 0x16c   :  { %v698_v5 = vpop.f32.mrf.mxu0 }
 0x16d   :  { %v699_v7 = vadd.f32 %v5869_v47, %v698_v5  ;;  %v243_v5 = vld [vmem:[#allocation2 + $0x468] sm:$0xff] }
 0x16e   :  { %v700_v9 = vpop.f32.mrf.mxu0 }
 0x16f   :  { %v1177_v11 = vmax.f32 %v699_v7, 0.0  ;;  %v426_v9 = vpack.c.bf16 %v240_v3, %v238_v2 }
 0x170   :  { %v703_v12 = vpop.f32.mrf.mxu0  ;;  %894 = vmatmul.mubr.bf16.gmra.mxu0 %v418_v6  ;;  %v245_v6 = vld [vmem:[#allocation2 + $0x478] sm:$0xff] }
 0x171   :  { %v5893_v13 = vpack.c.bf16 %v1177_v11, %v1176_v10  ;;  %901 = vmatprep.mubr.bf16.mxu0 %v421_v8  ;;  %v704_v20 = vadd.f32 %v5869_v47, %v703_v12  ;;  %v429_v11 = vpack.c.bf16 %v245_v6, %v243_v5 }
 0x172   :  { %v705_v17 = vpop.f32.mrf.mxu0 }
 0x173   :  { %v1178_v26 = vmax.f32 %v704_v20, 0.0  ;;  %v244_v20 = vld [vmem:[#allocation2 + $0x470] sm:$0xff] }
 0x174   :  { %v706_v21 = vpop.f32.mrf.mxu0 }
 0x175   :  { %v707_v23 = vadd.f32 %v5869_v47, %v706_v21 }
 0x176   :  { %v708_v25 = vpop.f32.mrf.mxu0 }
 0x177   :  { %v1179_v27 = vmax.f32 %v707_v23, 0.0  ;;  %v249_v23 = vld [vmem:[#allocation2 + $0x498] sm:$0xff] }
 0x178   :  { %v711_v28 = vpop.f32.mrf.mxu0  ;;  %902 = vmatmul.mubr.bf16.gmra.mxu0 %v420_v22  ;;  %v247_v22 = vld [vmem:[#allocation2 + $0x488] sm:$0xff] }
 0x179   :  { %v5897_v29 = vpack.c.bf16 %v1179_v27, %v1178_v26  ;;  %909 = vmatprep.mubr.bf16.mxu0 %v423_v24  ;;  %v712_v36 = vadd.f32 %v5869_v47, %v711_v28  ;;  %v428_v26 = vpack.c.bf16 %v244_v20, %v242_v19  ;;  %v431_v28 = vpack.c.bf16 %v249_v23, %v247_v22 }
 0x17a   :  { %v713_v33 = vpop.f32.mrf.mxu0 }
 0x17b   :  { %v1180_v42 = vmax.f32 %v712_v36, 0.0  ;;  %v246_v36 = vld [vmem:[#allocation2 + $0x480] sm:$0xff] }
 0x17c   :  { %v714_v37 = vpop.f32.mrf.mxu0 }
 0x17d   :  { %v715_v39 = vadd.f32 %v5869_v47, %v714_v37  ;;  %v248_v37 = vld [vmem:[#allocation2 + $0x490] sm:$0xff] }
 0x17e   :  { %v716_v41 = vpop.f32.mrf.mxu0 }
 0x17f   :  { %v1181_v43 = vmax.f32 %v715_v39, 0.0  ;;  %v251_v39 = vld [vmem:[#allocation2 + $0x4a8] sm:$0xff] }
 0x180   :  { %v719_v44 = vpop.f32.mrf.mxu0  ;;  %910 = vmatmul.mubr.bf16.gmra.mxu0 %v422_v38 }
 0x181   :  { %v5901_v46 = vpack.c.bf16 %v1181_v43, %v1180_v42  ;;  %917 = vmatprep.mubr.bf16.mxu0 %v425_v40  ;;  %v720_v53 = vadd.f32 %v5869_v47, %v719_v44  ;;  %v253_v40 = vld [vmem:[#allocation2 + $0x4b8] sm:$0xff]  ;;  %v430_v43 = vpack.c.bf16 %v248_v37, %v246_v36 }
 0x182   :  { %v721_v50 = vpop.f32.mrf.mxu0  ;;  %v433_v48 = vpack.c.bf16 %v253_v40, %v251_v39 }
 0x183   :  { %v1182_v60 = vmax.f32 %v720_v53, 0.0 }
 0x184   :  { %v722_v55 = vpop.f32.mrf.mxu0 }
 0x185   :  { %v723_v57 = vadd.f32 %v5869_v47, %v722_v55  ;;  %v252_v55 = vld [vmem:[#allocation2 + $0x4b0] sm:$0xff] }
 0x186   :  { %v724_v59 = vpop.f32.mrf.mxu0 }
 0x187   :  { %v1183_v62 = vmax.f32 %v723_v57, 0.0  ;;  %v255_v57 = vld [vmem:[#allocation2 + $0x4c8] sm:$0xff] }
 0x188   :  { %v727_v63 = vpop.f32.mrf.mxu0  ;;  %918 = vmatmul.mubr.bf16.gmra.mxu0 %v424_v56 }
 0x189   :  { %v5905_v1 = vpack.c.bf16 %v1183_v62, %v1182_v60  ;;  %925 = vmatprep.mubr.bf16.mxu0 %v427_v58  ;;  %v728_v7 = vadd.f32 %v5869_v47, %v727_v63  ;;  %v257_v58 = vld [vmem:[#allocation2 + $0x4d8] sm:$0xff]  ;;  %v432_v62 = vpack.c.bf16 %v252_v55, %v250_v54 }
 0x18a   :  { %v729_v4 = vpop.f32.mrf.mxu0  ;;  %v435_v2 = vpack.c.bf16 %v257_v58, %v255_v57 }
 0x18b   :  { %v1184_v14 = vmax.f32 %v728_v7, 0.0 }
 0x18c   :  { %v730_v8 = vpop.f32.mrf.mxu0 }
 0x18d   :  { %v731_v10 = vadd.f32 %v5869_v47, %v730_v8  ;;  %v254_v8 = vld [vmem:[#allocation2 + $0x4c0] sm:$0xff] }
 0x18e   :  { %v732_v12 = vpop.f32.mrf.mxu0 }
 0x18f   :  { %v1185_v16 = vmax.f32 %v731_v10, 0.0  ;;  %v261_v12 = vld [vmem:[#allocation2 + $0x4f8] sm:$0xff] }
 0x190   :  { %v735_v17 = vpop.f32.mrf.mxu0  ;;  %926 = vmatmul.mubr.bf16.gmra.mxu0 %v426_v9  ;;  %v256_v9 = vld [vmem:[#allocation2 + $0x4d0] sm:$0xff] }
 0x191   :  { %v5909_v18 = vpack.c.bf16 %v1185_v16, %v1184_v14  ;;  %933 = vmatprep.mubr.bf16.mxu0 %v429_v11  ;;  %v736_v24 = vadd.f32 %v5869_v47, %v735_v17  ;;  %v259_v11 = vld [vmem:[#allocation2 + $0x4e8] sm:$0xff]  ;;  %v434_v17 = vpack.c.bf16 %v256_v9, %v254_v8  ;;  %v273_v8 = vld [vmem:[#allocation2 + $0x558] sm:$0xff] }
 0x192   :  { %v737_v21 = vpop.f32.mrf.mxu0  ;;  %v437_v20 = vpack.c.bf16 %v261_v12, %v259_v11 }
 0x193   :  { %v1186_v32 = vmax.f32 %v736_v24, 0.0  ;;  %v5630_v21 = vld [vmem:[#allocation7] sm:$0xff]  }
 0x194   :  { %v738_v25 = vpop.f32.mrf.mxu0  ;;  %5587 = vmatprep.subr.bf16.mxu1 %v5630_v21  ;;  %5162 = vmatprep.subr.bf16.mxu0 %v5630_v21 }
 0x195   :  { %v739_v27 = vadd.f32 %v5869_v47, %v738_v25  ;;  %5595 = vmatpush3.bf16.msra.mxu1 %v5630_v21  ;;  %5163 = vmatpush3.bf16.msra.mxu0 %v5630_v21 }
 0x196   :  { %v740_v31 = vpop.f32.mrf.mxu0 }
 0x197   :  { %v1187_v33 = vmax.f32 %v739_v27, 0.0  ;;  %v258_v27 = vld [vmem:[#allocation2 + $0x4e0] sm:$0xff] }
 0x198   :  { %v743_v34 = vpop.f32.mrf.mxu0  ;;  %934 = vmatmul.mubr.bf16.gmra.mxu0 %v428_v26 }
 0x199   :  { %v5913_v35 = vpack.c.bf16 %v1187_v33, %v1186_v32  ;;  %941 = vmatprep.mubr.bf16.mxu0 %v431_v28  ;;  %v744_v41 = vadd.f32 %v5869_v47, %v743_v34  ;;  %v260_v28 = vld [vmem:[#allocation2 + $0x4f0] sm:$0xff]  ;;  %v263_v32 = vld [vmem:[#allocation2 + $0x508] sm:$0xff]  ;;  %v265_v33 = vld [vmem:[#allocation2 + $0x518] sm:$0xff] }
 0x19a   :  { %v745_v38 = vpop.f32.mrf.mxu0  ;;  %v436_v37 = vpack.c.bf16 %v260_v28, %v258_v27  ;;  %v439_v39 = vpack.c.bf16 %v265_v33, %v263_v32  ;;  %v277_v27 = vld [vmem:[#allocation2 + $0x578] sm:$0xff] }
 0x19b   :  { %v1188_v50 = vmax.f32 %v744_v41, 0.0 }
 0x19c   :  { %v746_v42 = vpop.f32.mrf.mxu0 }
 0x19d   :  { %v747_v44 = vadd.f32 %v5869_v47, %v746_v42 }
 0x19e   :  { %v748_v49 = vpop.f32.mrf.mxu0 }
 0x19f   :  { %v1189_v51 = vmax.f32 %v747_v44, 0.0  ;;  %v264_v49 = vld [vmem:[#allocation2 + $0x510] sm:$0xff] }
 0x1a0   :  { %v751_v52 = vpop.f32.mrf.mxu0  ;;  %942 = vmatmul.mubr.bf16.gmra.mxu0 %v430_v43 }
 0x1a1   :  { %v5917_v53 = vpack.c.bf16 %v1189_v51, %v1188_v50  ;;  %949 = vmatprep.mubr.bf16.mxu0 %v433_v48  ;;  %v752_v59 = vadd.f32 %v5869_v47, %v751_v52  ;;  %v262_v48 = vld [vmem:[#allocation2 + $0x500] sm:$0xff]  ;;  %v267_v51 = vld [vmem:[#allocation2 + $0x528] sm:$0xff]  ;;  %v269_v52 = vld [vmem:[#allocation2 + $0x538] sm:$0xff] }
 0x1a2   :  { %v753_v56 = vpop.f32.mrf.mxu0  ;;  %v441_v58 = vpack.c.bf16 %v269_v52, %v267_v51 }
 0x1a3   :  { %v1190_v4 = vmax.f32 %v752_v59, 0.0  ;;  %v438_v56 = vpack.c.bf16 %v264_v49, %v262_v48  ;;  %v279_v48 = vld [vmem:[#allocation2 + $0x588] sm:$0xff]  ;;  %v281_v49 = vld [vmem:[#allocation2 + $0x598] sm:$0xff] }
 0x1a4   :  { %v754_v60 = vpop.f32.mrf.mxu0 }
 0x1a5   :  { %v755_v63 = vadd.f32 %v5869_v47, %v754_v60 }
 0x1a6   :  { %v756_v3 = vpop.f32.mrf.mxu0 }
 0x1a7   :  { %v1191_v5 = vmax.f32 %v755_v63, 0.0  ;;  %v266_v3 = vld [vmem:[#allocation2 + $0x520] sm:$0xff] }
 0x1a8   :  { %v759_v6 = vpop.f32.mrf.mxu0  ;;  %950 = vmatmul.mubr.bf16.gmra.mxu0 %v432_v62 }
 0x1a9   :  { %v5921_v7 = vpack.c.bf16 %v1191_v5, %v1190_v4  ;;  %957 = vmatprep.mubr.bf16.mxu0 %v435_v2  ;;  %v760_v14 = vadd.f32 %v5869_v47, %v759_v6  ;;  %v268_v4 = vld [vmem:[#allocation2 + $0x530] sm:$0xff]  ;;  %v271_v6 = vld [vmem:[#allocation2 + $0x548] sm:$0xff] }
 0x1aa   :  { %v761_v10 = vpop.f32.mrf.mxu0  ;;  %v440_v11 = vpack.c.bf16 %v268_v4, %v266_v3  ;;  %v283_v4 = vld [vmem:[#allocation2 + $0x5a8] sm:$0xff] }
 0x1ab   :  { %v1192_v23 = vmax.f32 %v760_v14, 0.0  ;;  %v443_v14 = vpack.c.bf16 %v273_v8, %v271_v6 }
 0x1ac   :  { %v762_v16 = vpop.f32.mrf.mxu0 }
 0x1ad   :  { %v763_v19 = vadd.f32 %v5869_v47, %v762_v16 }
 0x1ae   :  { %v764_v22 = vpop.f32.mrf.mxu0 }
 0x1af   :  { %v1193_v24 = vmax.f32 %v763_v19, 0.0  ;;  %v270_v22 = vld [vmem:[#allocation2 + $0x540] sm:$0xff] }
 0x1b0   :  { %v767_v25 = vpop.f32.mrf.mxu0  ;;  %958 = vmatmul.mubr.bf16.gmra.mxu0 %v434_v17 }
 0x1b1   :  { %v5925_v26 = vpack.c.bf16 %v1193_v24, %v1192_v23  ;;  %965 = vmatprep.mubr.bf16.mxu0 %v437_v20  ;;  %v768_v34 = vadd.f32 %v5869_v47, %v767_v25  ;;  %v272_v23 = vld [vmem:[#allocation2 + $0x550] sm:$0xff]  ;;  %v275_v25 = vld [vmem:[#allocation2 + $0x568] sm:$0xff] }
 0x1b2   :  { %v769_v31 = vpop.f32.mrf.mxu0  ;;  %v442_v32 = vpack.c.bf16 %v272_v23, %v270_v22  ;;  %v284_v22 = vld [vmem:[#allocation2 + $0x5b0] sm:$0xff] }
 0x1b3   :  { %v1194_v41 = vmax.f32 %v768_v34, 0.0  ;;  %v445_v34 = vpack.c.bf16 %v277_v27, %v275_v25  ;;  %v289_v25 = vld [vmem:[#allocation2 + $0x5d8] sm:$0xff] }
 0x1b4   :  { %v770_v36 = vpop.f32.mrf.mxu0 }
 0x1b5   :  { %v771_v38 = vadd.f32 %v5869_v47, %v770_v36 }
 0x1b6   :  { %v772_v40 = vpop.f32.mrf.mxu0 }
 0x1b7   :  { %v1195_v42 = vmax.f32 %v771_v38, 0.0 }
 0x1b8   :  { %v775_v43 = vpop.f32.mrf.mxu0  ;;  %966 = vmatmul.mubr.bf16.gmra.mxu0 %v436_v37 }
 0x1b9   :  { %v5929_v44 = vpack.c.bf16 %v1195_v42, %v1194_v41  ;;  %973 = vmatprep.mubr.bf16.mxu0 %v439_v39  ;;  %v776_v54 = vadd.f32 %v5869_v47, %v775_v43  ;;  %v274_v41 = vld [vmem:[#allocation2 + $0x560] sm:$0xff]  ;;  %v276_v42 = vld [vmem:[#allocation2 + $0x570] sm:$0xff] }
 0x1ba   :  { %v777_v50 = vpop.f32.mrf.mxu0  ;;  %v444_v52 = vpack.c.bf16 %v276_v42, %v274_v41  ;;  %v286_v41 = vld [vmem:[#allocation2 + $0x5c0] sm:$0xff]  ;;  %v288_v42 = vld [vmem:[#allocation2 + $0x5d0] sm:$0xff] }
 0x1bb   :  { %v1196_v60 = vmax.f32 %v776_v54, 0.0 }
 0x1bc   :  { %v778_v55 = vpop.f32.mrf.mxu0 }
 0x1bd   :  { %v779_v57 = vadd.f32 %v5869_v47, %v778_v55  ;;  %v447_v55 = vpack.c.bf16 %v281_v49, %v279_v48  ;;  %v291_v48 = vld [vmem:[#allocation2 + $0x5e8] sm:$0xff]  ;;  %v293_v49 = vld [vmem:[#allocation2 + $0x5f8] sm:$0xff] }
 0x1be   :  { %v780_v59 = vpop.f32.mrf.mxu0 }
 0x1bf   :  { %v1197_v62 = vmax.f32 %v779_v57, 0.0 }
 0x1c0   :  { %v783_v63 = vpop.f32.mrf.mxu0  ;;  %974 = vmatmul.mubr.bf16.gmra.mxu0 %v438_v56 }
 0x1c1   :  { %v5933_v2 = vpack.c.bf16 %v1197_v62, %v1196_v60  ;;  %981 = vmatprep.mubr.bf16.mxu0 %v441_v58  ;;  %v784_v9 = vadd.f32 %v5869_v47, %v783_v63  ;;  %v278_v62 = vld [vmem:[#allocation2 + $0x580] sm:$0xff]  ;;  %v280_v63 = vld [vmem:[#allocation2 + $0x590] sm:$0xff] }
 0x1c2   :  { %v785_v5 = vpop.f32.mrf.mxu0 }
 0x1c3   :  { %v1198_v17 = vmax.f32 %v784_v9, 0.0  ;;  %v285_v5 = vld [vmem:[#allocation2 + $0x5b8] sm:$0xff]  ;;  %v446_v9 = vpack.c.bf16 %v280_v63, %v278_v62  ;;  %v290_v63 = vld [vmem:[#allocation2 + $0x5e0] sm:$0xff] }
 0x1c4   :  { %v786_v10 = vpop.f32.mrf.mxu0 }
 0x1c5   :  { %v787_v12 = vadd.f32 %v5869_v47, %v786_v10 }
 0x1c6   :  { %v788_v16 = vpop.f32.mrf.mxu0 }
 0x1c7   :  { %v1199_v19 = vmax.f32 %v787_v12, 0.0 }
 0x1c8   :  { %v791_v20 = vpop.f32.mrf.mxu0  ;;  %982 = vmatmul.mubr.bf16.gmra.mxu0 %v440_v11  ;;  %v449_v11 = vpack.c.bf16 %v285_v5, %v283_v4  ;;  %v295_v5 = vld [vmem:[#allocation2 + $0x608] sm:$0xff] }
 0x1c9   :  { %v5937_v21 = vpack.c.bf16 %v1199_v19, %v1198_v17  ;;  %989 = vmatprep.mubr.bf16.mxu0 %v443_v14  ;;  %v792_v28 = vadd.f32 %v5869_v47, %v791_v20  ;;  %v282_v20 = vld [vmem:[#allocation2 + $0x5a0] sm:$0xff] }
 0x1ca   :  { %v793_v24 = vpop.f32.mrf.mxu0 }
 0x1cb   :  { %v1200_v37 = vmax.f32 %v792_v28, 0.0  ;;  %v287_v24 = vld [vmem:[#allocation2 + $0x5c8] sm:$0xff] }
 0x1cc   :  { %v794_v31 = vpop.f32.mrf.mxu0 }
 0x1cd   :  { %v795_v33 = vadd.f32 %v5869_v47, %v794_v31  ;;  %v448_v31 = vpack.c.bf16 %v284_v22, %v282_v20 }
 0x1ce   :  { %v796_v36 = vpop.f32.mrf.mxu0 }
 0x1cf   :  { %v1201_v38 = vmax.f32 %v795_v33, 0.0  ;;  %v451_v33 = vpack.c.bf16 %v289_v25, %v287_v24  ;;  %v296_v24 = vld [vmem:[#allocation2 + $0x610] sm:$0xff] }
 0x1d0   :  { %v799_v39 = vpop.f32.mrf.mxu0  ;;  %990 = vmatmul.mubr.bf16.gmra.mxu0 %v442_v32 }
 0x1d1   :  { %v5941_v40 = vpack.c.bf16 %v1201_v38, %v1200_v37  ;;  %997 = vmatprep.mubr.bf16.mxu0 %v445_v34  ;;  %v800_v50 = vadd.f32 %v5869_v47, %v799_v39 }
 0x1d2   :  { %v801_v43 = vpop.f32.mrf.mxu0 }
 0x1d3   :  { %v1202_v57 = vmax.f32 %v800_v50, 0.0 }
 0x1d4   :  { %v802_v51 = vpop.f32.mrf.mxu0 }
 0x1d5   :  { %v803_v54 = vadd.f32 %v5869_v47, %v802_v51 }
 0x1d6   :  { %v804_v56 = vpop.f32.mrf.mxu0 }
 0x1d7   :  { %v1203_v58 = vmax.f32 %v803_v54, 0.0 }
 0x1d8   :  { %v807_v59 = vpop.f32.mrf.mxu0  ;;  %998 = vmatmul.mubr.bf16.gmra.mxu0 %v444_v52  ;;  %v450_v52 = vpack.c.bf16 %v288_v42, %v286_v41 }
 0x1d9   :  { %v5945_v60 = vpack.c.bf16 %v1203_v58, %v1202_v57  ;;  %1005 = vmatprep.mubr.bf16.mxu0 %v447_v55  ;;  %v808_v6 = vadd.f32 %v5869_v47, %v807_v59  ;;  %v453_v55 = vpack.c.bf16 %v293_v49, %v291_v48  ;;  %v298_v48 = vld [vmem:[#allocation2 + $0x620] sm:$0xff]  ;;  %v300_v49 = vld [vmem:[#allocation2 + $0x630] sm:$0xff] }
 0x1da   :  { %v809_v3 = vpop.f32.mrf.mxu0 }
 0x1db   :  { %v1204_v14 = vmax.f32 %v808_v6, 0.0  ;;  %v292_v3 = vld [vmem:[#allocation2 + $0x5f0] sm:$0xff]  ;;  %v297_v6 = vld [vmem:[#allocation2 + $0x618] sm:$0xff] }
 0x1dc   :  { %v810_v8 = vpop.f32.mrf.mxu0 }
 0x1dd   :  { %v811_v10 = vadd.f32 %v5869_v47, %v810_v8 }
 0x1de   :  { %v812_v12 = vpop.f32.mrf.mxu0 }
 0x1df   :  { %v1205_v16 = vmax.f32 %v811_v10, 0.0  ;;  %v452_v10 = vpack.c.bf16 %v292_v3, %v290_v63  ;;  %v455_v12 = vpack.c.bf16 %v297_v6, %v295_v5  ;;  %v302_v6 = vld [vmem:[#allocation2 + $0x640] sm:$0xff] }
 0x1e0   :  { %v815_v17 = vpop.f32.mrf.mxu0  ;;  %1006 = vmatmul.mubr.bf16.gmra.mxu0 %v446_v9 }
 0x1e1   :  { %v5949_v19 = vpack.c.bf16 %v1205_v16, %v1204_v14  ;;  %1013 = vmatprep.mubr.bf16.mxu0 %v449_v11  ;;  %v816_v27 = vadd.f32 %v5869_v47, %v815_v17 }
 0x1e2   :  { %v817_v23 = vpop.f32.mrf.mxu0 }
 0x1e3   :  { %v1206_v36 = vmax.f32 %v816_v27, 0.0  ;;  %v294_v23 = vld [vmem:[#allocation2 + $0x600] sm:$0xff]  ;;  %v299_v27 = vld [vmem:[#allocation2 + $0x628] sm:$0xff] }
 0x1e4   :  { %v818_v28 = vpop.f32.mrf.mxu0 }
 0x1e5   :  { %v819_v32 = vadd.f32 %v5869_v47, %v818_v28  ;;  %v301_v28 = vld [vmem:[#allocation2 + $0x638] sm:$0xff] }
 0x1e6   :  { %v820_v34 = vpop.f32.mrf.mxu0 }
 0x1e7   :  { %v1207_v37 = vmax.f32 %v819_v32, 0.0 }
 0x1e8   :  { %v823_v38 = vpop.f32.mrf.mxu0  ;;  %1014 = vmatmul.mubr.bf16.gmra.mxu0 %v448_v31 }
 0x1e9   :  { %v5953_v39 = vpack.c.bf16 %v1207_v37, %v1206_v36  ;;  %1021 = vmatprep.mubr.bf16.mxu0 %v451_v33  ;;  %v824_v50 = vadd.f32 %v5869_v47, %v823_v38  ;;  %v454_v33 = vpack.c.bf16 %v296_v24, %v294_v23  ;;  %v457_v36 = vpack.c.bf16 %v301_v28, %v299_v27 }
 0x1ea   :  { %v825_v43 = vpop.f32.mrf.mxu0 }
 0x1eb   :  { %v1208_v57 = vmax.f32 %v824_v50, 0.0 }
 0x1ec   :  { %v826_v51 = vpop.f32.mrf.mxu0 }
 0x1ed   :  { %v827_v54 = vadd.f32 %v5869_v47, %v826_v51  ;;  %v303_v51 = vld [vmem:[#allocation2 + $0x648] sm:$0xff] }
 0x1ee   :  { %v828_v56 = vpop.f32.mrf.mxu0 }
 0x1ef   :  { %v1209_v58 = vmax.f32 %v827_v54, 0.0  ;;  %v456_v56 = vpack.c.bf16 %v300_v49, %v298_v48 }
 0x1f0   :  { %v831_v59 = vpop.f32.mrf.mxu0  ;;  %1022 = vmatmul.mubr.bf16.gmra.mxu0 %v450_v52  ;;  %v305_v52 = vld [vmem:[#allocation2 + $0x658] sm:$0xff] }
 0x1f1   :  { %v5957_v62 = vpack.c.bf16 %v1209_v58, %v1208_v57  ;;  %1029 = vmatprep.mubr.bf16.mxu0 %v453_v55  ;;  %v832_v8 = vadd.f32 %v5869_v47, %v831_v59  ;;  %v459_v58 = vpack.c.bf16 %v305_v52, %v303_v51 }
 0x1f2   :  { %v833_v4 = vpop.f32.mrf.mxu0 }
 0x1f3   :  { %v1210_v16 = vmax.f32 %v832_v8, 0.0  ;;  %v304_v8 = vld [vmem:[#allocation2 + $0x650] sm:$0xff] }
 0x1f4   :  { %v834_v9 = vpop.f32.mrf.mxu0 }
 0x1f5   :  { %v835_v11 = vadd.f32 %v5869_v47, %v834_v9 }
 0x1f6   :  { %v836_v14 = vpop.f32.mrf.mxu0 }
 0x1f7   :  { %v1211_v17 = vmax.f32 %v835_v11, 0.0  ;;  %v309_v11 = vld [vmem:[#allocation2 + $0x678] sm:$0xff] }
 0x1f8   :  { %v839_v20 = vpop.f32.mrf.mxu0  ;;  %1030 = vmatmul.mubr.bf16.gmra.mxu0 %v452_v10  ;;  %v307_v10 = vld [vmem:[#allocation2 + $0x668] sm:$0xff] }
 0x1f9   :  { %v5961_v22 = vpack.c.bf16 %v1211_v17, %v1210_v16  ;;  %1037 = vmatprep.mubr.bf16.mxu0 %v455_v12  ;;  %v840_v31 = vadd.f32 %v5869_v47, %v839_v20  ;;  %v458_v16 = vpack.c.bf16 %v304_v8, %v302_v6  ;;  %v461_v20 = vpack.c.bf16 %v309_v11, %v307_v10 }
 0x1fa   :  { %v841_v25 = vpop.f32.mrf.mxu0 }
 0x1fb   :  { %v1212_v38 = vmax.f32 %v840_v31, 0.0  ;;  %v306_v31 = vld [vmem:[#allocation2 + $0x660] sm:$0xff] }
 0x1fc   :  { %v842_v32 = vpop.f32.mrf.mxu0 }
 0x1fd   :  { %v843_v34 = vadd.f32 %v5869_v47, %v842_v32  ;;  %v308_v32 = vld [vmem:[#allocation2 + $0x670] sm:$0xff] }
 0x1fe   :  { %v844_v37 = vpop.f32.mrf.mxu0 }
 0x1ff   :  { %v1213_v41 = vmax.f32 %v843_v34, 0.0  ;;  %v311_v34 = vld [vmem:[#allocation2 + $0x688] sm:$0xff] }
 0x200   :  { %v847_v42 = vpop.f32.mrf.mxu0  ;;  %1038 = vmatmul.mubr.bf16.gmra.mxu0 %v454_v33 }
 0x201   :  { %v5965_v43 = vpack.c.bf16 %v1213_v41, %v1212_v38  ;;  %1045 = vmatprep.mubr.bf16.mxu0 %v457_v36  ;;  %v848_v54 = vadd.f32 %v5869_v47, %v847_v42  ;;  %v313_v36 = vld [vmem:[#allocation2 + $0x698] sm:$0xff]  ;;  %v460_v41 = vpack.c.bf16 %v308_v32, %v306_v31 }
 0x202   :  { %v849_v50 = vpop.f32.mrf.mxu0  ;;  %v463_v48 = vpack.c.bf16 %v313_v36, %v311_v34 }
 0x203   :  { %v1214_v63 = vmax.f32 %v848_v54, 0.0 }
 0x204   :  { %v850_v55 = vpop.f32.mrf.mxu0 }
 0x205   :  { %v851_v57 = vadd.f32 %v5869_v47, %v850_v55  ;;  %v310_v55 = vld [vmem:[#allocation2 + $0x680] sm:$0xff] }
 0x206   :  { %v852_v59 = vpop.f32.mrf.mxu0 }
 0x207   :  { %v1215_v3 = vmax.f32 %v851_v57, 0.0  ;;  %v317_v59 = vld [vmem:[#allocation2 + $0x6b8] sm:$0xff] }
 0x208   :  { %v855_v4 = vpop.f32.mrf.mxu0  ;;  %1046 = vmatmul.mubr.bf16.gmra.mxu0 %v456_v56  ;;  %v312_v56 = vld [vmem:[#allocation2 + $0x690] sm:$0xff] }
 0x209   :  { %v5969_v5 = vpack.c.bf16 %v1215_v3, %v1214_v63  ;;  %1053 = vmatprep.mubr.bf16.mxu0 %v459_v58  ;;  %v856_v12 = vadd.f32 %v5869_v47, %v855_v4  ;;  %v315_v58 = vld [vmem:[#allocation2 + $0x6a8] sm:$0xff]  ;;  %v462_v4 = vpack.c.bf16 %v312_v56, %v310_v55 }
 0x20a   :  { %v857_v9 = vpop.f32.mrf.mxu0  ;;  %v465_v8 = vpack.c.bf16 %v317_v59, %v315_v58 }
 0x20b   :  { %v1216_v24 = vmax.f32 %v856_v12, 0.0 }
 0x20c   :  { %v858_v14 = vpop.f32.mrf.mxu0 }
 0x20d   :  { %v859_v17 = vadd.f32 %v5869_v47, %v858_v14 }
 0x20e   :  { %v860_v23 = vpop.f32.mrf.mxu0 }
 0x20f   :  { %v1217_v25 = vmax.f32 %v859_v17, 0.0  ;;  %v316_v17 = vld [vmem:[#allocation2 + $0x6b0] sm:$0xff]  ;;  %v319_v23 = vld [vmem:[#allocation2 + $0x6c8] sm:$0xff] }
 0x210   :  { %v863_v27 = vpop.f32.mrf.mxu0  ;;  %1054 = vmatmul.mubr.bf16.gmra.mxu0 %v458_v16  ;;  %v314_v16 = vld [vmem:[#allocation2 + $0x6a0] sm:$0xff] }
 0x211   :  { %v5973_v28 = vpack.c.bf16 %v1217_v25, %v1216_v24  ;;  %1061 = vmatprep.mubr.bf16.mxu0 %v461_v20  ;;  %v864_v37 = vadd.f32 %v5869_v47, %v863_v27  ;;  %v321_v24 = vld [vmem:[#allocation2 + $0x6d8] sm:$0xff]  ;;  %v464_v31 = vpack.c.bf16 %v316_v17, %v314_v16 }
 0x212   :  { %v865_v33 = vpop.f32.mrf.mxu0 }
 0x213   :  { %v1218_v50 = vmax.f32 %v864_v37, 0.0  ;;  %v467_v33 = vpack.c.bf16 %v321_v24, %v319_v23 }
 0x214   :  { %v866_v38 = vpop.f32.mrf.mxu0 }
 0x215   :  { %v867_v42 = vadd.f32 %v5869_v47, %v866_v38 }
 0x216   :  { %v868_v49 = vpop.f32.mrf.mxu0 }
 0x217   :  { %v1219_v51 = vmax.f32 %v867_v42, 0.0  ;;  %v318_v42 = vld [vmem:[#allocation2 + $0x6c0] sm:$0xff] }
 0x218   :  { %v871_v52 = vpop.f32.mrf.mxu0  ;;  %1062 = vmatmul.mubr.bf16.gmra.mxu0 %v460_v41 }
 0x219   :  { %v5977_v54 = vpack.c.bf16 %v1219_v51, %v1218_v50  ;;  %1069 = vmatprep.mubr.bf16.mxu0 %v463_v48  ;;  %v872_v63 = vadd.f32 %v5869_v47, %v871_v52  ;;  %v320_v48 = vld [vmem:[#allocation2 + $0x6d0] sm:$0xff]  ;;  %v323_v50 = vld [vmem:[#allocation2 + $0x6e8] sm:$0xff]  ;;  %v325_v51 = vld [vmem:[#allocation2 + $0x6f8] sm:$0xff] }
 0x21a   :  { %v873_v57 = vpop.f32.mrf.mxu0  ;;  %v5988_v52 = vld [vmem:[%s7091_s2] ss:$0 sm:$0xff]  ;;  %v466_v56 = vpack.c.bf16 %v320_v48, %v318_v42  ;;  %v469_v58 = vpack.c.bf16 %v325_v51, %v323_v50 }
 0x21b   :  { %v1220_v10 = vmax.f32 %v872_v63, 0.0 }
 0x21c   :  { %v874_v3 = vpop.f32.mrf.mxu0 }
 0x21d   :  { %v875_v6 = vadd.f32 %v5869_v47, %v874_v3 }
 0x21e   :  { %v876_v9 = vpop.f32.mrf.mxu0 }
 0x21f   :  { %v1221_v11 = vmax.f32 %v875_v6, 0.0  ;;  %v324_v9 = vld [vmem:[#allocation2 + $0x6f0] sm:$0xff] }
 0x220   :  { %v879_v12 = vpop.f32.mrf.mxu0  ;;  %1070 = vmatmul.mubr.bf16.gmra.mxu0 %v462_v4 }
 0x221   :  { %v5981_v14 = vpack.c.bf16 %v1221_v11, %v1220_v10  ;;  %1077 = vmatprep.mubr.bf16.mxu0 %v465_v8  ;;  %v880_v25 = vadd.f32 %v5869_v47, %v879_v12  ;;  %v322_v8 = vld [vmem:[#allocation2 + $0x6e0] sm:$0xff]  ;;  %v327_v11 = vld [vmem:[#allocation2 + $0x708] sm:$0xff]  ;;  %v329_v12 = vld [vmem:[#allocation2 + $0x718] sm:$0xff] }
 0x222   :  { %v881_v20 = vpop.f32.mrf.mxu0  ;;  %v471_v24 = vpack.c.bf16 %v329_v12, %v327_v11 }
 0x223   :  { %v1222_v36 = vmax.f32 %v880_v25, 0.0  ;;  %v468_v20 = vpack.c.bf16 %v324_v9, %v322_v8  ;;  %v337_v8 = vld [vmem:[#allocation2 + $0x758] sm:$0xff] }
 0x224   :  { %v882_v27 = vpop.f32.mrf.mxu0 }
 0x225   :  { %v883_v32 = vadd.f32 %v5869_v47, %v882_v27 }
 0x226   :  { %v884_v34 = vpop.f32.mrf.mxu0 }
 0x227   :  { %v1223_v37 = vmax.f32 %v883_v32, 0.0  ;;  %v326_v34 = vld [vmem:[#allocation2 + $0x700] sm:$0xff] }
 0x228   :  { %v887_v38 = vpop.f32.mrf.mxu0  ;;  %1078 = vmatmul.mubr.bf16.gmra.mxu0 %v464_v31 }
 0x229   :  { %v1322_v41 = vpack.c.bf16 %v1223_v37, %v1222_v36  ;;  %1085 = vmatprep.mubr.bf16.mxu0 %v467_v33  ;;  %v888_v47 = vadd.f32 %v5988_v52, %v887_v38  ;;  %v328_v36 = vld [vmem:[#allocation2 + $0x710] sm:$0xff]  ;;  %v331_v38 = vld [vmem:[#allocation2 + $0x728] sm:$0xff] }
 0x22a   :  { %v889_v49 = vpop.f32.mrf.mxu0 }
 0x22b   :  { %5220 = vmatprep.mubr.bf16.mxu1 %v1322_v41  ;;  %v1224_v63 = vmax.f32 %v888_v47, 0.0  ;;  %v333_v41 = vld [vmem:[#allocation2 + $0x738] sm:$0xff]  ;;  %v470_v49 = vpack.c.bf16 %v328_v36, %v326_v34 }
 0x22c   :  { %v890_v55 = vpop.f32.mrf.mxu0  ;;  %v473_v51 = vpack.c.bf16 %v333_v41, %v331_v38  ;;  %v341_v34 = vld [vmem:[#allocation2 + $0x778] sm:$0xff] }
 0x22d   :  { %v891_v57 = vadd.f32 %v5988_v52, %v890_v55 }
 0x22e   :  { %v892_v59 = vpop.f32.mrf.mxu0 }
 0x22f   :  { %v1225_v3 = vmax.f32 %v891_v57, 0.0  ;;  %v330_v59 = vld [vmem:[#allocation2 + $0x720] sm:$0xff] }
 0x230   :  { %v895_v4 = vpop.f32.mrf.mxu0  ;;  %1086 = vmatmul.mubr.bf16.gmra.mxu0 %v466_v56 }
 0x231   :  { %v1323_v6 = vpack.c.bf16 %v1225_v3, %v1224_v63  ;;  %1093 = vmatprep.mubr.bf16.mxu0 %v469_v58  ;;  %v896_v16 = vadd.f32 %v5988_v52, %v895_v4  ;;  %v332_v63 = vld [vmem:[#allocation2 + $0x730] sm:$0xff]  ;;  %v5631_v3 = vld [vmem:[#allocation8 + $0x38] sm:$0xff]  }
 0x232   :  { %v897_v10 = vpop.f32.mrf.mxu0  ;;  %5292 = vmatprep.subr.bf16.mxu1 %v5631_v3  ;;  %v472_v11 = vpack.c.bf16 %v332_v63, %v330_v59  ;;  %v345_v59 = vld [vmem:[#allocation2 + $0x798] sm:$0xff] }
 0x233   :  { %5221 = vmatmul.mubr.bf16.vlgmr.msra.gmra.mxu1 %v1323_v6  ;;  %v1226_v27 = vmax.f32 %v896_v16, 0.0  ;;  %v335_v6 = vld [vmem:[#allocation2 + $0x748] sm:$0xff] }
 0x234   :  { %v898_v17 = vpop.f32.mrf.mxu0  ;;  %5293 = vmatpush3.bf16.msra.mxu1 %v5631_v3  ;;  %v475_v16 = vpack.c.bf16 %v337_v8, %v335_v6  ;;  %v5632_v3 = vld [vmem:[#allocation8 + $0x30] sm:$0xff]  }
 0x235   :  { %v899_v23 = vadd.f32 %v5988_v52, %v898_v17  ;;  %5294 = vmatprep.subr.bf16.mxu1 %v5632_v3 }
 0x236   :  { %v900_v25 = vpop.f32.mrf.mxu0 }
 0x237   :  { %v1227_v31 = vmax.f32 %v899_v23, 0.0 }
 0x238   :  { %v903_v32 = vpop.f32.mrf.mxu0  ;;  %1094 = vmatmul.mubr.bf16.gmra.mxu0 %v468_v20  ;;  %5295 = vmatpush3.bf16.msra.mxu1 %v5632_v3 }
 0x239   :  { %v1324_v33 = vpack.c.bf16 %v1227_v31, %v1226_v27  ;;  %1101 = vmatprep.mubr.bf16.mxu0 %v471_v24  ;;  %v904_v42 = vadd.f32 %v5988_v52, %v903_v32  ;;  %v334_v27 = vld [vmem:[#allocation2 + $0x740] sm:$0xff]  ;;  %v336_v31 = vld [vmem:[#allocation2 + $0x750] sm:$0xff] }
 0x23a   :  { %v905_v37 = vpop.f32.mrf.mxu0  ;;  %v474_v38 = vpack.c.bf16 %v336_v31, %v334_v27  ;;  %v349_v27 = vld [vmem:[#allocation2 + $0x7b8] sm:$0xff] }
 0x23b   :  { %5224 = vmatprep.mubr.bf16.mxu1 %v1324_v33  ;;  %v1228_v55 = vmax.f32 %v904_v42, 0.0  ;;  %v339_v33 = vld [vmem:[#allocation2 + $0x768] sm:$0xff] }
 0x23c   :  { %v906_v48 = vpop.f32.mrf.mxu0  ;;  %v477_v42 = vpack.c.bf16 %v341_v34, %v339_v33 }
 0x23d   :  { %v907_v50 = vadd.f32 %v5988_v52, %v906_v48 }
 0x23e   :  { %v908_v47 = vpop.f32.mrf.mxu0 }
 0x23f   :  { %v1229_v56 = vmax.f32 %v907_v50, 0.0 }
 0x240   :  { %v911_v57 = vpop.f32.mrf.mxu0  ;;  %1102 = vmatmul.mubr.bf16.gmra.mxu0 %v470_v49 }
 0x241   :  { %v1325_v58 = vpack.c.bf16 %v1229_v56, %v1228_v55  ;;  %1109 = vmatprep.mubr.bf16.mxu0 %v473_v51  ;;  %v912_v9 = vadd.f32 %v5988_v52, %v911_v57  ;;  %v338_v55 = vld [vmem:[#allocation2 + $0x760] sm:$0xff]  ;;  %v340_v56 = vld [vmem:[#allocation2 + $0x770] sm:$0xff] }
 0x242   :  { %v913_v4 = vpop.f32.mrf.mxu0  ;;  %v476_v6 = vpack.c.bf16 %v340_v56, %v338_v55  ;;  %v353_v55 = vld [vmem:[#allocation2 + $0x7d8] sm:$0xff] }
 0x243   :  { %5225 = vmatmul.mubr.bf16.gmra.mxu1 %v1325_v58  ;;  %v1230_v20 = vmax.f32 %v912_v9, 0.0  ;;  %v343_v58 = vld [vmem:[#allocation2 + $0x788] sm:$0xff] }
 0x244   :  { %v914_v10 = vpop.f32.mrf.mxu0  ;;  %v479_v9 = vpack.c.bf16 %v345_v59, %v343_v58 }
 0x245   :  { %v915_v12 = vadd.f32 %v5988_v52, %v914_v10 }
 0x246   :  { %v916_v17 = vpop.f32.mrf.mxu0 }
 0x247   :  { %v1231_v23 = vmax.f32 %v915_v12, 0.0 }
 0x248   :  { %v919_v24 = vpop.f32.mrf.mxu0  ;;  %1110 = vmatmul.mubr.bf16.gmra.mxu0 %v472_v11 }
 0x249   :  { %v1326_v25 = vpack.c.bf16 %v1231_v23, %v1230_v20  ;;  %1117 = vmatprep.mubr.bf16.mxu0 %v475_v16  ;;  %v920_v36 = vadd.f32 %v5988_v52, %v919_v24  ;;  %v342_v20 = vld [vmem:[#allocation2 + $0x780] sm:$0xff]  ;;  %v344_v23 = vld [vmem:[#allocation2 + $0x790] sm:$0xff] }
 0x24a   :  { %v921_v32 = vpop.f32.mrf.mxu0  ;;  %v478_v33 = vpack.c.bf16 %v344_v23, %v342_v20  ;;  %v357_v20 = vld [vmem:[#allocation2 + $0x7f8] sm:$0xff] }
 0x24b   :  { %5228 = vmatprep.mubr.bf16.mxu1 %v1326_v25  ;;  %v1232_v49 = vmax.f32 %v920_v36, 0.0  ;;  %v347_v25 = vld [vmem:[#allocation2 + $0x7a8] sm:$0xff] }
 0x24c   :  { %v922_v37 = vpop.f32.mrf.mxu0  ;;  %v481_v36 = vpack.c.bf16 %v349_v27, %v347_v25 }
 0x24d   :  { %v923_v41 = vadd.f32 %v5988_v52, %v922_v37 }
 0x24e   :  { %v924_v48 = vpop.f32.mrf.mxu0 }
 0x24f   :  { %v1233_v50 = vmax.f32 %v923_v41, 0.0 }
 0x250   :  { %v927_v51 = vpop.f32.mrf.mxu0  ;;  %1118 = vmatmul.mubr.bf16.gmra.mxu0 %v474_v38 }
 0x251   :  { %v1327_v47 = vpack.c.bf16 %v1233_v50, %v1232_v49  ;;  %1125 = vmatprep.mubr.bf16.mxu0 %v477_v42  ;;  %v928_v63 = vadd.f32 %v5988_v52, %v927_v51  ;;  %v346_v49 = vld [vmem:[#allocation2 + $0x7a0] sm:$0xff]  ;;  %v348_v50 = vld [vmem:[#allocation2 + $0x7b0] sm:$0xff] }
 0x252   :  { %v929_v57 = vpop.f32.mrf.mxu0  ;;  %v480_v59 = vpack.c.bf16 %v348_v50, %v346_v49 }
 0x253   :  { %5229 = vmatmul.mubr.bf16.gmra.mxu1 %v1327_v47  ;;  %v1234_v11 = vmax.f32 %v928_v63, 0.0  ;;  %v351_v47 = vld [vmem:[#allocation2 + $0x7c8] sm:$0xff] }
 0x254   :  { %v930_v4 = vpop.f32.mrf.mxu0  ;;  %v5633_v57 = vld [vmem:[#allocation8 + $0x28] sm:$0xff]   ;;  %v483_v3 = vpack.c.bf16 %v353_v55, %v351_v47 }
 0x255   :  { %v931_v8 = vadd.f32 %v5988_v52, %v930_v4  ;;  %5296 = vmatprep.subr.bf16.mxu1 %v5633_v57 }
 0x256   :  { %v932_v10 = vpop.f32.mrf.mxu0  ;;  %5297 = vmatpush3.bf16.msra.mxu1 %v5633_v57 }
 0x257   :  { %v1235_v12 = vmax.f32 %v931_v8, 0.0 }
 0x258   :  { %v935_v16 = vpop.f32.mrf.mxu0  ;;  %1126 = vmatmul.mubr.bf16.gmra.mxu0 %v476_v6 }
 0x259   :  { %v1328_v17 = vpack.c.bf16 %v1235_v12, %v1234_v11  ;;  %1133 = vmatprep.mubr.bf16.mxu0 %v479_v9  ;;  %v936_v31 = vadd.f32 %v5988_v52, %v935_v16  ;;  %v350_v11 = vld [vmem:[#allocation2 + $0x7c0] sm:$0xff]  ;;  %v352_v12 = vld [vmem:[#allocation2 + $0x7d0] sm:$0xff] }
 0x25a   :  { %v937_v24 = vpop.f32.mrf.mxu0  ;;  %v482_v25 = vpack.c.bf16 %v352_v12, %v350_v11 }
 0x25b   :  { %5232 = vmatprep.mubr.bf16.mxu1 %v1328_v17  ;;  %v1236_v38 = vmax.f32 %v936_v31, 0.0  ;;  %v355_v17 = vld [vmem:[#allocation2 + $0x7e8] sm:$0xff] }
 0x25c   :  { %v938_v32 = vpop.f32.mrf.mxu0  ;;  %v485_v31 = vpack.c.bf16 %v357_v20, %v355_v17 }
 0x25d   :  { %v939_v34 = vadd.f32 %v5988_v52, %v938_v32 }
 0x25e   :  { %v940_v37 = vpop.f32.mrf.mxu0 }
 0x25f   :  { %v1237_v41 = vmax.f32 %v939_v34, 0.0 }
 0x260   :  { %v943_v42 = vpop.f32.mrf.mxu0  ;;  %1134 = vmatmul.mubr.bf16.gmra.mxu0 %v478_v33 }
 0x261   :  { %v1329_v48 = vpack.c.bf16 %v1237_v41, %v1236_v38  ;;  %1141 = vmatprep.mubr.bf16.mxu0 %v481_v36  ;;  %v944_v56 = vadd.f32 %v5988_v52, %v943_v42  ;;  %v354_v38 = vld [vmem:[#allocation2 + $0x7e0] sm:$0xff]  ;;  %v356_v41 = vld [vmem:[#allocation2 + $0x7f0] sm:$0xff] }
 0x262   :  { %v945_v51 = vpop.f32.mrf.mxu0  ;;  %v484_v50 = vpack.c.bf16 %v356_v41, %v354_v38 }
 0x263   :  { %5233 = vmatmul.mubr.bf16.gmra.mxu1 %v1329_v48  ;;  %v1238_v6 = vmax.f32 %v944_v56, 0.0 }
 0x264   :  { %v946_v58 = vpop.f32.mrf.mxu0 }
 0x265   :  { %v947_v63 = vadd.f32 %v5988_v52, %v946_v58 }
 0x266   :  { %v948_v4 = vpop.f32.mrf.mxu0 }
 0x267   :  { %v1239_v8 = vmax.f32 %v947_v63, 0.0 }
 0x268   :  { %v951_v9 = vpop.f32.mrf.mxu0  ;;  %1142 = vmatmul.mubr.bf16.gmra.mxu0 %v480_v59  ;;  %v5634_v59 = vld [vmem:[#allocation8 + $0x20] sm:$0xff]  }
 0x269   :  { %v1330_v10 = vpack.c.bf16 %v1239_v8, %v1238_v6  ;;  %1149 = vmatprep.mubr.bf16.mxu0 %v483_v3  ;;  %v952_v23 = vadd.f32 %v5988_v52, %v951_v9  ;;  %5298 = vmatprep.subr.bf16.mxu1 %v5634_v59 }
 0x26a   :  { %v953_v16 = vpop.f32.mrf.mxu0  ;;  %5299 = vmatpush3.bf16.msra.mxu1 %v5634_v59 }
 0x26b   :  { %5236 = vmatprep.mubr.bf16.mxu1 %v1330_v10  ;;  %v1240_v33 = vmax.f32 %v952_v23, 0.0 }
 0x26c   :  { %v954_v24 = vpop.f32.mrf.mxu0 }
 0x26d   :  { %v955_v27 = vadd.f32 %v5988_v52, %v954_v24 }
 0x26e   :  { %v956_v32 = vpop.f32.mrf.mxu0 }
 0x26f   :  { %v1241_v34 = vmax.f32 %v955_v27, 0.0 }
 0x270   :  { %v959_v36 = vpop.f32.mrf.mxu0  ;;  %1150 = vmatmul.mubr.bf16.gmra.mxu0 %v482_v25 }
 0x271   :  { %v1331_v37 = vpack.c.bf16 %v1241_v34, %v1240_v33  ;;  %1157 = vmatprep.mubr.bf16.mxu0 %v485_v31  ;;  %v960_v48 = vadd.f32 %v5988_v52, %v959_v36 }
 0x272   :  { %v961_v42 = vpop.f32.mrf.mxu0 }
 0x273   :  { %5237 = vmatmul.mubr.bf16.gmra.mxu1 %v1331_v37  ;;  %v1242_v55 = vmax.f32 %v960_v48, 0.0 }
 0x274   :  { %v962_v49 = vpop.f32.mrf.mxu0 }
 0x275   :  { %v963_v51 = vadd.f32 %v5988_v52, %v962_v49 }
 0x276   :  { %v964_v47 = vpop.f32.mrf.mxu0 }
 0x277   :  { %v1243_v56 = vmax.f32 %v963_v51, 0.0 }
 0x278   :  { %v967_v57 = vpop.f32.mrf.mxu0  ;;  %1158 = vmatmul.mubr.bf16.gmra.mxu0 %v484_v50 }
 0x279   :  { %v1332_v58 = vpack.c.bf16 %v1243_v56, %v1242_v55  ;;  %5164 = vmatprep.mubr.bf16.mxu0 %v5873_v0  ;;  %v968_v3 = vadd.f32 %v5988_v52, %v967_v57 }
 0x27a   :  { %v969_v63 = vpop.f32.mrf.mxu0 }
 0x27b   :  { %5240 = vmatprep.mubr.bf16.mxu1 %v1332_v58  ;;  %v1244_v9 = vmax.f32 %v968_v3, 0.0  ;;  %v5636_v58 = vld [vmem:[#allocation8 + $0x10] sm:$0xff]  }
 0x27c   :  { %v970_v4 = vpop.f32.mrf.mxu0 }
 0x27d   :  { %v971_v6 = vadd.f32 %v5988_v52, %v970_v4 }
 0x27e   :  { %v972_v8 = vpop.f32.mrf.mxu0 }
 0x27f   :  { %v1245_v10 = vmax.f32 %v971_v6, 0.0 }
 0x280   :  { %v975_v11 = vpop.f32.mrf.mxu0  ;;  %5165 = vmatmul.mubr.bf16.vlgmr.msra.gmra.mxu0 %v5877_v15  ;;  %v5635_v15 = vld [vmem:[#allocation8 + $0x18] sm:$0xff]  }
 0x281   :  { %v1333_v12 = vpack.c.bf16 %v1245_v10, %v1244_v9  ;;  %5168 = vmatprep.mubr.bf16.mxu0 %v5881_v30  ;;  %v976_v16 = vadd.f32 %v5988_v52, %v975_v11  ;;  %5300 = vmatprep.subr.bf16.mxu1 %v5635_v15 }
 0x282   :  { %v977_v0 = vpop.f32.mrf.mxu0  ;;  %5301 = vmatpush3.bf16.msra.mxu1 %v5635_v15 }
 0x283   :  { %5241 = vmatmul.mubr.bf16.gmra.mxu1 %v1333_v12  ;;  %v1246_v24 = vmax.f32 %v976_v16, 0.0  ;;  %5302 = vmatprep.subr.bf16.mxu1 %v5636_v58 }
 0x284   :  { %v978_v17 = vpop.f32.mrf.mxu0 }
 0x285   :  { %v979_v20 = vadd.f32 %v5988_v52, %v978_v17 }
 0x286   :  { %v980_v23 = vpop.f32.mrf.mxu0  ;;  %5303 = vmatpush3.bf16.msra.mxu1 %v5636_v58 }
 0x287   :  { %v1247_v25 = vmax.f32 %v979_v20, 0.0  ;;  %v5637_v23 = vld [vmem:[#allocation8 + $0x8] sm:$0xff]  }
 0x288   :  { %v983_v27 = vpop.f32.mrf.mxu0  ;;  %5169 = vmatmul.mubr.bf16.gmra.mxu0 %v5885_v45  ;;  %5304 = vmatprep.subr.bf16.mxu1 %v5637_v23 }
 0x289   :  { %v1334_v31 = vpack.c.bf16 %v1247_v25, %v1246_v24  ;;  %5172 = vmatprep.mubr.bf16.mxu0 %v5889_v61  ;;  %v984_v30 = vadd.f32 %v5988_v52, %v983_v27 }
 0x28a   :  { %v985_v32 = vpop.f32.mrf.mxu0  ;;  %5305 = vmatpush3.bf16.msra.mxu1 %v5637_v23 }
 0x28b   :  { %5244 = vmatprep.mubr.bf16.mxu1 %v1334_v31  ;;  %v1248_v37 = vmax.f32 %v984_v30, 0.0 }
 0x28c   :  { %v986_v33 = vpop.f32.mrf.mxu0 }
 0x28d   :  { %v987_v34 = vadd.f32 %v5988_v52, %v986_v33 }
 0x28e   :  { %v988_v36 = vpop.f32.mrf.mxu0 }
 0x28f   :  { %v1249_v38 = vmax.f32 %v987_v34, 0.0 }
 0x290   :  { %v991_v41 = vpop.f32.mrf.mxu0  ;;  %5173 = vmatmul.mubr.bf16.gmra.mxu0 %v5893_v13 }
 0x291   :  { %v1335_v45 = vpack.c.bf16 %v1249_v38, %v1248_v37  ;;  %5176 = vmatprep.mubr.bf16.mxu0 %v5897_v29  ;;  %v992_v42 = vadd.f32 %v5988_v52, %v991_v41 }
 0x292   :  { %v993_v61 = vpop.f32.mrf.mxu0 }
 0x293   :  { %5245 = vmatmul.mubr.bf16.gmra.mxu1 %v1335_v45  ;;  %v1250_v51 = vmax.f32 %v992_v42, 0.0 }
 0x294   :  { %v994_v48 = vpop.f32.mrf.mxu0 }
 0x295   :  { %v995_v49 = vadd.f32 %v5988_v52, %v994_v48 }
 0x296   :  { %v996_v50 = vpop.f32.mrf.mxu0 }
 0x297   :  { %v1251_v47 = vmax.f32 %v995_v49, 0.0 }
 0x298   :  { %v999_v55 = vpop.f32.mrf.mxu0  ;;  %5177 = vmatmul.mubr.bf16.gmra.mxu0 %v5901_v46 }
 0x299   :  { %v1336_v56 = vpack.c.bf16 %v1251_v47, %v1250_v51  ;;  %5180 = vmatprep.mubr.bf16.mxu0 %v5905_v1  ;;  %v1000_v57 = vadd.f32 %v5988_v52, %v999_v55 }
 0x29a   :  { %v1001_v13 = vpop.f32.mrf.mxu0 }
 0x29b   :  { %5248 = vmatprep.mubr.bf16.mxu1 %v1336_v56  ;;  %v1252_v3 = vmax.f32 %v1000_v57, 0.0 }
 0x29c   :  { %v1002_v29 = vpop.f32.mrf.mxu0 }
 0x29d   :  { %v1003_v59 = vadd.f32 %v5988_v52, %v1002_v29 }
 0x29e   :  { %v1004_v63 = vpop.f32.mrf.mxu0 }
 0x29f   :  { %v1253_v4 = vmax.f32 %v1003_v59, 0.0 }
 0x2a0   :  { %v1007_v6 = vpop.f32.mrf.mxu0  ;;  %5181 = vmatmul.mubr.bf16.gmra.mxu0 %v5909_v18 }
 0x2a1   :  { %v1337_v46 = vpack.c.bf16 %v1253_v4, %v1252_v3  ;;  %5184 = vmatprep.mubr.bf16.mxu0 %v5913_v35  ;;  %v1008_v8 = vadd.f32 %v5988_v52, %v1007_v6 }
 0x2a2   :  { %v1009_v1 = vpop.f32.mrf.mxu0 }
 0x2a3   :  { %5249 = vmatmul.mubr.bf16.gmra.mxu1 %v1337_v46  ;;  %v1254_v12 = vmax.f32 %v1008_v8, 0.0 }
 0x2a4   :  { %v1010_v9 = vpop.f32.mrf.mxu0 }
 0x2a5   :  { %v1011_v10 = vadd.f32 %v5988_v52, %v1010_v9 }
 0x2a6   :  { %v1012_v11 = vpop.f32.mrf.mxu0 }
 0x2a7   :  { %v1255_v0 = vmax.f32 %v1011_v10, 0.0 }
 0x2a8   :  { %v1015_v16 = vpop.f32.mrf.mxu0  ;;  %5185 = vmatmul.mubr.bf16.gmra.mxu0 %v5917_v53 }
 0x2a9   :  { %v1338_v17 = vpack.c.bf16 %v1255_v0, %v1254_v12  ;;  %5188 = vmatprep.mubr.bf16.mxu0 %v5921_v7  ;;  %v1016_v20 = vadd.f32 %v5988_v52, %v1015_v16 }
 0x2aa   :  { %v1017_v18 = vpop.f32.mrf.mxu0 }
 0x2ab   :  { %5252 = vmatprep.mubr.bf16.mxu1 %v1338_v17  ;;  %v1256_v27 = vmax.f32 %v1016_v20, 0.0 }
 0x2ac   :  { %v1018_v35 = vpop.f32.mrf.mxu0 }
 0x2ad   :  { %v1019_v24 = vadd.f32 %v5988_v52, %v1018_v35 }
 0x2ae   :  { %v1020_v25 = vpop.f32.mrf.mxu0 }
 0x2af   :  { %v1257_v31 = vmax.f32 %v1019_v24, 0.0 }
 0x2b0   :  { %v1023_v15 = vpop.f32.mrf.mxu0  ;;  %5189 = vmatmul.mubr.bf16.gmra.mxu0 %v5925_v26 }
 0x2b1   :  { %v1339_v53 = vpack.c.bf16 %v1257_v31, %v1256_v27  ;;  %5192 = vmatprep.mubr.bf16.mxu0 %v5929_v44  ;;  %v1024_v32 = vadd.f32 %v5988_v52, %v1023_v15 }
 0x2b2   :  { %v1025_v7 = vpop.f32.mrf.mxu0 }
 0x2b3   :  { %5253 = vmatmul.mubr.bf16.gmra.mxu1 %v1339_v53  ;;  %v1258_v36 = vmax.f32 %v1024_v32, 0.0 }
 0x2b4   :  { %v1026_v30 = vpop.f32.mrf.mxu0 }
 0x2b5   :  { %v1027_v33 = vadd.f32 %v5988_v52, %v1026_v30 }
 0x2b6   :  { %v1028_v34 = vpop.f32.mrf.mxu0 }
 0x2b7   :  { %v1259_v37 = vmax.f32 %v1027_v33, 0.0 }
 0x2b8   :  { %v1031_v38 = vpop.f32.mrf.mxu0  ;;  %5193 = vmatmul.mubr.bf16.gmra.mxu0 %v5933_v2  ;;  %v5638_v2 = vld [vmem:[#allocation8] sm:$0xff]  }
 0x2b9   :  { %v1340_v41 = vpack.c.bf16 %v1259_v37, %v1258_v36  ;;  %5196 = vmatprep.mubr.bf16.mxu0 %v5937_v21  ;;  %v1032_v45 = vadd.f32 %v5988_v52, %v1031_v38  ;;  %5306 = vmatprep.subr.bf16.mxu1 %v5638_v2 }
 0x2ba   :  { %v1033_v26 = vpop.f32.mrf.mxu0  ;;  %5307 = vmatpush3.bf16.msra.mxu1 %v5638_v2 }
 0x2bb   :  { %5256 = vmatprep.mubr.bf16.mxu1 %v1340_v41  ;;  %v1260_v48 = vmax.f32 %v1032_v45, 0.0 }
 0x2bc   :  { %v1034_v44 = vpop.f32.mrf.mxu0 }
 0x2bd   :  { %v1035_v61 = vadd.f32 %v5988_v52, %v1034_v44 }
 0x2be   :  { %v1036_v42 = vpop.f32.mrf.mxu0 }
 0x2bf   :  { %v1261_v49 = vmax.f32 %v1035_v61, 0.0 }
 0x2c0   :  { %v1039_v50 = vpop.f32.mrf.mxu0  ;;  %5197 = vmatmul.mubr.bf16.gmra.mxu0 %v5941_v40 }
 0x2c1   :  { %v1341_v51 = vpack.c.bf16 %v1261_v49, %v1260_v48  ;;  %5200 = vmatprep.mubr.bf16.mxu0 %v5945_v60  ;;  %v1040_v21 = vadd.f32 %v5988_v52, %v1039_v50 }
 0x2c2   :  { %v1041_v47 = vpop.f32.mrf.mxu0 }
 0x2c3   :  { %5257 = vmatmul.mubr.bf16.gmra.mxu1 %v1341_v51  ;;  %v1262_v57 = vmax.f32 %v1040_v21, 0.0 }
 0x2c4   :  { %v1042_v55 = vpop.f32.mrf.mxu0 }
 0x2c5   :  { %v1043_v56 = vadd.f32 %v5988_v52, %v1042_v55 }
 0x2c6   :  { %v1044_v13 = vpop.f32.mrf.mxu0 }
 0x2c7   :  { %v1263_v29 = vmax.f32 %v1043_v56, 0.0 }
 0x2c8   :  { %v1047_v58 = vpop.f32.mrf.mxu0  ;;  %5201 = vmatmul.mubr.bf16.gmra.mxu0 %v5949_v19 }
 0x2c9   :  { %v1342_v40 = vpack.c.bf16 %v1263_v29, %v1262_v57  ;;  %5204 = vmatprep.mubr.bf16.mxu0 %v5953_v39  ;;  %v1048_v59 = vadd.f32 %v5988_v52, %v1047_v58  ;;  %v6056_v39 = vld [vmem:[#allocation10 + $0x38] sm:$0xff]  }
 0x2ca   :  { %v1049_v60 = vpop.f32.mrf.mxu0  ;;  %5436 = vmatprep.subr.bf16.mxu1 %v6056_v39 }
 0x2cb   :  { %5260 = vmatprep.mubr.bf16.mxu1 %v1342_v40  ;;  %v1264_v6 = vmax.f32 %v1048_v59, 0.0 }
 0x2cc   :  { %v1050_v63 = vpop.f32.mrf.mxu0 }
 0x2cd   :  { %v1051_v3 = vadd.f32 %v5988_v52, %v1050_v63 }
 0x2ce   :  { %v1052_v4 = vpop.f32.mrf.mxu0 }
 0x2cf   :  { %v1265_v46 = vmax.f32 %v1051_v3, 0.0 }
 0x2d0   :  { %v1055_v1 = vpop.f32.mrf.mxu0  ;;  %5205 = vmatmul.mubr.bf16.gmra.mxu0 %v5957_v62 }
 0x2d1   :  { %v1343_v8 = vpack.c.bf16 %v1265_v46, %v1264_v6  ;;  %5208 = vmatprep.mubr.bf16.mxu0 %v5961_v22  ;;  %v1056_v9 = vadd.f32 %v5988_v52, %v1055_v1 }
 0x2d2   :  { %v1057_v19 = vpop.f32.mrf.mxu0 }
 0x2d3   :  { %5261 = vmatmul.mubr.bf16.gmra.mxu1 %v1343_v8  ;;  %v1266_v0 = vmax.f32 %v1056_v9, 0.0 }
 0x2d4   :  { %v1058_v10 = vpop.f32.mrf.mxu0 }
 0x2d5   :  { %v1059_v11 = vadd.f32 %v5988_v52, %v1058_v10 }
 0x2d6   :  { %v1060_v12 = vpop.f32.mrf.mxu0 }
 0x2d7   :  { %v1267_v16 = vmax.f32 %v1059_v11, 0.0 }
 0x2d8   :  { %v1063_v17 = vpop.f32.mrf.mxu0  ;;  %5209 = vmatmul.mubr.bf16.gmra.mxu0 %v5965_v43 }
 0x2d9   :  { %v1344_v62 = vpack.c.bf16 %v1267_v16, %v1266_v0  ;;  %5212 = vmatprep.mubr.bf16.mxu0 %v5969_v5  ;;  %v1064_v18 = vadd.f32 %v5988_v52, %v1063_v17 }
 0x2da   :  { %v1065_v22 = vpop.f32.mrf.mxu0 }
 0x2db   :  { %5264 = vmatprep.mubr.bf16.mxu1 %v1344_v62  ;;  %v1268_v24 = vmax.f32 %v1064_v18, 0.0 }
 0x2dc   :  { %v1066_v20 = vpop.f32.mrf.mxu0 }
 0x2dd   :  { %v1067_v35 = vadd.f32 %v5988_v52, %v1066_v20 }
 0x2de   :  { %v1068_v23 = vpop.f32.mrf.mxu0 }
 0x2df   :  { %v1269_v25 = vmax.f32 %v1067_v35, 0.0 }
 0x2e0   :  { %v1071_v27 = vpop.f32.mrf.mxu0  ;;  %5213 = vmatmul.mubr.bf16.gmra.mxu0 %v5973_v28 }
 0x2e1   :  { %v1345_v31 = vpack.c.bf16 %v1269_v25, %v1268_v24  ;;  %5216 = vmatprep.mubr.bf16.mxu0 %v5977_v54  ;;  %v1072_v15 = vadd.f32 %v5988_v52, %v1071_v27 }
 0x2e2   :  { %v1073_v43 = vpop.f32.mrf.mxu0 }
 0x2e3   :  { %5265 = vmatmul.mubr.bf16.gmra.mxu1 %v1345_v31  ;;  %v1270_v32 = vmax.f32 %v1072_v15, 0.0 }
 0x2e4   :  { %v1074_v5 = vpop.f32.mrf.mxu0 }
 0x2e5   :  { %v1075_v53 = vadd.f32 %v5988_v52, %v1074_v5 }
 0x2e6   :  { %v1076_v7 = vpop.f32.mrf.mxu0 }
 0x2e7   :  { %v1271_v30 = vmax.f32 %v1075_v53, 0.0 }
 0x2e8   :  { %v1079_v33 = vpop.f32.mrf.mxu0  ;;  %5217 = vmatmul.mubr.bf16.gmra.mxu0 %v5981_v14 }
 0x2e9   :  { %v1346_v34 = vpack.c.bf16 %v1271_v30, %v1270_v32  ;;  %v1080_v28 = vadd.f32 %v5988_v52, %v1079_v33 }
 0x2ea   :  { %v1081_v36 = vpop.f32.mrf.mxu0 }
 0x2eb   :  { %5268 = vmatprep.mubr.bf16.mxu1 %v1346_v34  ;;  %v1272_v41 = vmax.f32 %v1080_v28, 0.0 }
 0x2ec   :  { %v1082_v37 = vpop.f32.mrf.mxu0 }
 0x2ed   :  { %v1083_v54 = vadd.f32 %v5988_v52, %v1082_v37 }
 0x2ee   :  { %v1084_v38 = vpop.f32.mrf.mxu0 }
 0x2ef   :  { %v1273_v26 = vmax.f32 %v1083_v54, 0.0 }
 0x2f0   :  { %v1087_v45 = vpop.f32.mrf.mxu0 }
 0x2f1   :  { %v1347_v44 = vpack.c.bf16 %v1273_v26, %v1272_v41  ;;  %v1088_v42 = vadd.f32 %v5988_v52, %v1087_v45 }
 0x2f2   :  { %v1089_v61 = vpop.f32.mrf.mxu0 }
 0x2f3   :  { %5269 = vmatmul.mubr.bf16.gmra.mxu1 %v1347_v44  ;;  %v1274_v50 = vmax.f32 %v1088_v42, 0.0  ;;  %v6080_v23 = vpop.f32.mrf.mxu1 }
 0x2f4   :  { %v1090_v48 = vpop.f32.mrf.mxu0 }
 0x2f5   :  { %v1091_v14 = vadd.f32 %v5988_v52, %v1090_v48  ;;  %v6083_v15 = vpop.f32.mrf.mxu1 }
 0x2f6   :  { %v1092_v49 = vpop.f32.mrf.mxu0 }
 0x2f7   :  { %v1275_v51 = vmax.f32 %v1091_v14, 0.0  ;;  %v6086_v30 = vpop.f32.mrf.mxu1 }
 0x2f8   :  { %v1095_v2 = vpop.f32.mrf.mxu0 }
 0x2f9   :  { %v1348_v47 = vpack.c.bf16 %v1275_v51, %v1274_v50  ;;  %v1096_v55 = vadd.f32 %v5988_v52, %v1095_v2  ;;  %v6089_v54 = vpop.f32.mrf.mxu1 }
 0x2fa   :  { %v1097_v21 = vpop.f32.mrf.mxu0 }
 0x2fb   :  { %5272 = vmatprep.mubr.bf16.mxu1 %v1348_v47  ;;  %v1276_v29 = vmax.f32 %v1096_v55, 0.0 }
 0x2fc   :  { %v1098_v56 = vpop.f32.mrf.mxu0 }
 0x2fd   :  { %v1099_v13 = vadd.f32 %v5988_v52, %v1098_v56 }
 0x2fe   :  { %v1100_v57 = vpop.f32.mrf.mxu0 }
 0x2ff   :  { %v1277_v58 = vmax.f32 %v1099_v13, 0.0 }
 0x300   :  { %v1103_v40 = vpop.f32.mrf.mxu0 }
 0x301   :  { %v1349_v60 = vpack.c.bf16 %v1277_v58, %v1276_v29  ;;  %v1104_v63 = vadd.f32 %v5988_v52, %v1103_v40 }
 0x302   :  { %v1105_v59 = vpop.f32.mrf.mxu0 }
 0x303   :  { %5273 = vmatmul.mubr.bf16.gmra.mxu1 %v1349_v60  ;;  %v1278_v46 = vmax.f32 %v1104_v63, 0.0  ;;  %v6091_v26 = vpop.f32.mrf.mxu1 }
 0x304   :  { %v1106_v3 = vpop.f32.mrf.mxu0 }
 0x305   :  { %v1107_v4 = vadd.f32 %v5988_v52, %v1106_v3  ;;  %v6095_v48 = vpop.f32.mrf.mxu1 }
 0x306   :  { %v1108_v6 = vpop.f32.mrf.mxu0 }
 0x307   :  { %v1279_v1 = vmax.f32 %v1107_v4, 0.0  ;;  %v6097_v47 = vpop.f32.mrf.mxu1 }
 0x308   :  { %v1111_v8 = vpop.f32.mrf.mxu0 }
 0x309   :  { %v1350_v19 = vpack.c.bf16 %v1279_v1, %v1278_v46  ;;  %v1112_v10 = vadd.f32 %v5988_v52, %v1111_v8  ;;  %v6101_v57 = vpop.f32.mrf.mxu1 }
 0x30a   :  { %v1113_v9 = vpop.f32.mrf.mxu0 }
 0x30b   :  { %5276 = vmatprep.mubr.bf16.mxu1 %v1350_v19  ;;  %v1280_v16 = vmax.f32 %v1112_v10, 0.0 }
 0x30c   :  { %v1114_v11 = vpop.f32.mrf.mxu0 }
 0x30d   :  { %v1115_v12 = vadd.f32 %v5988_v52, %v1114_v11 }
 0x30e   :  { %v1116_v0 = vpop.f32.mrf.mxu0 }
 0x30f   :  { %v1281_v17 = vmax.f32 %v1115_v12, 0.0 }
 0x310   :  { %v1119_v62 = vpop.f32.mrf.mxu0 }
 0x311   :  { %v1351_v22 = vpack.c.bf16 %v1281_v17, %v1280_v16  ;;  %v1120_v20 = vadd.f32 %v5988_v52, %v1119_v62 }
 0x312   :  { %v1121_v18 = vpop.f32.mrf.mxu0 }
 0x313   :  { %5277 = vmatmul.mubr.bf16.gmra.mxu1 %v1351_v22  ;;  %v1282_v27 = vmax.f32 %v1120_v20, 0.0  ;;  %v6103_v60 = vpop.f32.mrf.mxu1 }
 0x314   :  { %v1122_v35 = vpop.f32.mrf.mxu0 }
 0x315   :  { %v1123_v24 = vadd.f32 %v5988_v52, %v1122_v35  ;;  %v6106_v6 = vpop.f32.mrf.mxu1 }
 0x316   :  { %v1124_v25 = vpop.f32.mrf.mxu0 }
 0x317   :  { %v1283_v31 = vmax.f32 %v1123_v24, 0.0  ;;  %v6109_v10 = vpop.f32.mrf.mxu1 }
 0x318   :  { %v1127_v43 = vpop.f32.mrf.mxu0 }
 0x319   :  { %v1352_v5 = vpack.c.bf16 %v1283_v31, %v1282_v27  ;;  %v1128_v7 = vadd.f32 %v5988_v52, %v1127_v43  ;;  %v6112_v17 = vpop.f32.mrf.mxu1  ;;  %v6122_v43 = vld [vmem:[%s7093_s4] ss:$0 sm:$0xff] }
 0x31a   :  { %v1129_v53 = vpop.f32.mrf.mxu0 }
 0x31b   :  { %5280 = vmatprep.mubr.bf16.mxu1 %v1352_v5  ;;  %v1284_v36 = vmax.f32 %v1128_v7, 0.0 }
 0x31c   :  { %v1130_v32 = vpop.f32.mrf.mxu0 }
 0x31d   :  { %v1131_v33 = vadd.f32 %v5988_v52, %v1130_v32 }
 0x31e   :  { %v1132_v34 = vpop.f32.mrf.mxu0 }
 0x31f   :  { %v1285_v28 = vmax.f32 %v1131_v33, 0.0 }
 0x320   :  { %v1135_v37 = vpop.f32.mrf.mxu0 }
 0x321   :  { %v1353_v38 = vpack.c.bf16 %v1285_v28, %v1284_v36  ;;  %v1136_v45 = vadd.f32 %v5988_v52, %v1135_v37 }
 0x322   :  { %v1137_v41 = vpop.f32.mrf.mxu0 }
 0x323   :  { %5281 = vmatmul.mubr.bf16.gmra.mxu1 %v1353_v38  ;;  %v1286_v14 = vmax.f32 %v1136_v45, 0.0  ;;  %v6115_v18 = vpop.f32.mrf.mxu1 }
 0x324   :  { %v1138_v44 = vpop.f32.mrf.mxu0 }
 0x325   :  { %v1139_v61 = vadd.f32 %v5988_v52, %v1138_v44  ;;  %v6117_v31 = vpop.f32.mrf.mxu1 }
 0x326   :  { %v1140_v42 = vpop.f32.mrf.mxu0 }
 0x327   :  { %v1287_v49 = vmax.f32 %v1139_v61, 0.0  ;;  %v6127_v33 = vpop.f32.mrf.mxu1 }
 0x328   :  { %v1143_v50 = vpop.f32.mrf.mxu0 }
 0x329   :  { %v1354_v51 = vpack.c.bf16 %v1287_v49, %v1286_v14  ;;  %v1144_v21 = vadd.f32 %v5988_v52, %v1143_v50  ;;  %v6130_v44 = vpop.f32.mrf.mxu1  ;;  %v5640_v49 = vld [vmem:[#allocation10 + $0x30] sm:$0xff]  }
 0x32a   :  { %v1145_v2 = vpop.f32.mrf.mxu0 }
 0x32b   :  { %5284 = vmatprep.mubr.bf16.mxu1 %v1354_v51  ;;  %v1288_v29 = vmax.f32 %v1144_v21, 0.0 }
 0x32c   :  { %v1146_v55 = vpop.f32.mrf.mxu0 }
 0x32d   :  { %v1147_v56 = vadd.f32 %v5988_v52, %v1146_v55 }
 0x32e   :  { %v1148_v13 = vpop.f32.mrf.mxu0 }
 0x32f   :  { %v1289_v58 = vmax.f32 %v1147_v56, 0.0 }
 0x330   :  { %v1151_v40 = vpop.f32.mrf.mxu0 }
 0x331   :  { %v1355_v59 = vpack.c.bf16 %v1289_v58, %v1288_v29  ;;  %v1152_v3 = vadd.f32 %v5988_v52, %v1151_v40  ;;  %v5641_v58 = vld [vmem:[#allocation10 + $0x28] sm:$0xff]  }
 0x332   :  { %v1153_v63 = vpop.f32.mrf.mxu0 }
 0x333   :  { %5285 = vmatmul.mubr.bf16.gmra.mxu1 %v1355_v59  ;;  %v1290_v8 = vmax.f32 %v1152_v3, 0.0  ;;  %v6132_v50 = vpop.f32.mrf.mxu1 }
 0x334   :  { %v1154_v4 = vpop.f32.mrf.mxu0 }
 0x335   :  { %v1155_v46 = vadd.f32 %v5988_v52, %v1154_v4  ;;  %v6139_v40 = vpop.f32.mrf.mxu1 }
 0x336   :  { %v1156_v1 = vpop.f32.mrf.mxu0 }
 0x337   :  { %v1291_v19 = vmax.f32 %v1155_v46, 0.0 }
 0x338   :  { %v1159_v9 = vpop.f32.mrf.mxu0 }
 0x339   :  { %v1356_v11 = vpack.c.bf16 %v1291_v19, %v1290_v8  ;;  %v1160_v0 = vadd.f32 %v5988_v52, %v1159_v9  ;;  %v5642_v19 = vld [vmem:[#allocation10 + $0x20] sm:$0xff]   ;;  %v6141_v9 = vpop.f32.mrf.mxu1 }
 0x33a   :  { %v1161_v12 = vpop.f32.mrf.mxu0 }
 0x33b   :  { %5288 = vmatprep.mubr.bf16.mxu1 %v1356_v11  ;;  %v1292_v20 = vmax.f32 %v1160_v0, 0.0 }
 0x33c   :  { %v1162_v16 = vpop.f32.mrf.mxu0 }
 0x33d   :  { %v1163_v62 = vadd.f32 %v5988_v52, %v1162_v16 }
 0x33e   :  { %v1164_v22 = vpop.f32.mrf.mxu0 }
 0x33f   :  { %v1293_v35 = vmax.f32 %v1163_v62, 0.0 }
 0x340   :  { %v5166_v24 = vpop.f32.mrf.mxu0 }
 0x341   :  { %v1357_v25 = vpack.c.bf16 %v1293_v35, %v1292_v20  ;;  %v1472_v7 = vadd.f32 %v5166_v24, %v6122_v43  ;;  %v5643_v20 = vld [vmem:[#allocation10 + $0x18] sm:$0xff]   ;;  %v6147_v35 = vpop.f32.mrf.mxu1 }
 0x342   :  { %v1463_v27 = vpop.f32.mrf.mxu0 }
 0x343   :  { %5289 = vmatmul.mubr.bf16.gmra.mxu1 %v1357_v25  ;;  %v1464_v53 = vadd.f32 %v6122_v43, %v1463_v27  ;;  %v1976_v41 = vmax.f32 %v1472_v7, 0.0 }
 0x344   :  { %v5167_v5 = vpop.f32.mrf.mxu0 }
 0x345   :  { %v1475_v52 = vadd.f32 %v5167_v5, %v6122_v43  ;;  %v1974_v37 = vmax.f32 %v1464_v53, 0.0  ;;  %v6149_v53 = vpop.f32.mrf.mxu1 }
 0x346   :  { %v1466_v32 = vpop.f32.mrf.mxu0 }
 0x347   :  { %v1467_v34 = vadd.f32 %v6122_v43, %v1466_v32  ;;  %v1977_v36 = vmax.f32 %v1475_v52, 0.0 }
 0x348   :  { %v5170_v28 = vpop.f32.mrf.mxu0 }
 0x349   :  { %v1975_v38 = vmax.f32 %v1467_v34, 0.0  ;;  %v2103_v42 = vpack.c.bf16 %v1977_v36, %v1976_v41  ;;  %v1488_v21 = vadd.f32 %v5170_v28, %v6122_v43 }
 0x34a   :  { %v1479_v45 = vpop.f32.mrf.mxu0 }
 0x34b   :  { %v2102_v61 = vpack.c.bf16 %v1975_v38, %v1974_v37  ;;  %v1480_v51 = vadd.f32 %v6122_v43, %v1479_v45  ;;  %v1980_v3 = vmax.f32 %v1488_v21, 0.0  ;;  %v6154_v38 = vpop.f32.mrf.mxu1 }
 0x34c   :  { %v5171_v14 = vpop.f32.mrf.mxu0 }
 0x34d   :  { %v1491_v2 = vadd.f32 %v5171_v14, %v6122_v43  ;;  %5308 = vmatprep.mubr.bf16.mxu1 %v2102_v61  ;;  %v1978_v59 = vmax.f32 %v1480_v51, 0.0 }
 0x34e   :  { %v1482_v55 = vpop.f32.mrf.mxu0  ;;  %5309 = vmatmul.mubr.bf16.vlgmr.msra.gmra.mxu1 %v2103_v42 }
 0x34f   :  { %v1483_v56 = vadd.f32 %v6122_v43, %v1482_v55  ;;  %5437 = vmatpush3.bf16.msra.mxu1 %v6056_v39  ;;  %v1981_v13 = vmax.f32 %v1491_v2, 0.0  ;;  %v6157_v2 = vpop.f32.mrf.mxu1 }
 0x350   :  { %v5174_v29 = vpop.f32.mrf.mxu0  ;;  %5438 = vmatprep.subr.bf16.mxu1 %v5640_v49 }
 0x351   :  { %v1979_v63 = vmax.f32 %v1483_v56, 0.0  ;;  %v2105_v1 = vpack.c.bf16 %v1981_v13, %v1980_v3  ;;  %v1504_v12 = vadd.f32 %v5174_v29, %v6122_v43 }
 0x352   :  { %v1495_v4 = vpop.f32.mrf.mxu0 }
 0x353   :  { %v2104_v46 = vpack.c.bf16 %v1979_v63, %v1978_v59  ;;  %5439 = vmatpush3.bf16.msra.mxu1 %v5640_v49  ;;  %v1496_v39 = vadd.f32 %v6122_v43, %v1495_v4  ;;  %v1984_v27 = vmax.f32 %v1504_v12, 0.0  ;;  %v6162_v63 = vpop.f32.mrf.mxu1 }
 0x354   :  { %v5175_v8 = vpop.f32.mrf.mxu0  ;;  %5440 = vmatprep.subr.bf16.mxu1 %v5641_v58 }
 0x355   :  { %v1507_v11 = vadd.f32 %v5175_v8, %v6122_v43  ;;  %5312 = vmatprep.mubr.bf16.mxu1 %v2104_v46  ;;  %v1982_v24 = vmax.f32 %v1496_v39, 0.0 }
 0x356   :  { %v1498_v0 = vpop.f32.mrf.mxu0  ;;  %5313 = vmatmul.mubr.bf16.gmra.mxu1 %v2105_v1  ;;  %v6165_v1 = vpop.f32.mrf.mxu1 }
 0x357   :  { %v1499_v16 = vadd.f32 %v6122_v43, %v1498_v0  ;;  %5441 = vmatpush3.bf16.msra.mxu1 %v5641_v58  ;;  %v1985_v62 = vmax.f32 %v1507_v11, 0.0 }
 0x358   :  { %v5178_v22 = vpop.f32.mrf.mxu0  ;;  %5442 = vmatprep.subr.bf16.mxu1 %v5642_v19 }
 0x359   :  { %v1983_v25 = vmax.f32 %v1499_v16, 0.0  ;;  %v2107_v7 = vpack.c.bf16 %v1985_v62, %v1984_v27  ;;  %v1520_v28 = vadd.f32 %v5178_v22, %v6122_v43  ;;  %v6167_v62 = vpop.f32.mrf.mxu1  ;;  %v5644_v27 = vld [vmem:[#allocation10 + $0x10] sm:$0xff]  }
 0x35a   :  { %v1511_v5 = vpop.f32.mrf.mxu0 }
 0x35b   :  { %v2106_v52 = vpack.c.bf16 %v1983_v25, %v1982_v24  ;;  %5443 = vmatpush3.bf16.msra.mxu1 %v5642_v19  ;;  %v1512_v34 = vadd.f32 %v6122_v43, %v1511_v5  ;;  %v1988_v49 = vmax.f32 %v1520_v28, 0.0 }
 0x35c   :  { %v5179_v32 = vpop.f32.mrf.mxu0  ;;  %5444 = vmatprep.subr.bf16.mxu1 %v5643_v20 }
 0x35d   :  { %v1523_v36 = vadd.f32 %v5179_v32, %v6122_v43  ;;  %5316 = vmatprep.mubr.bf16.mxu1 %v2106_v52  ;;  %v1986_v42 = vmax.f32 %v1512_v34, 0.0  ;;  %v6173_v32 = vpop.f32.mrf.mxu1 }
 0x35e   :  { %v1514_v37 = vpop.f32.mrf.mxu0  ;;  %5317 = vmatmul.mubr.bf16.gmra.mxu1 %v2107_v7 }
 0x35f   :  { %v1515_v41 = vadd.f32 %v6122_v43, %v1514_v37  ;;  %5445 = vmatpush3.bf16.msra.mxu1 %v5643_v20  ;;  %v1989_v45 = vmax.f32 %v1523_v36, 0.0 }
 0x360   :  { %v5182_v61 = vpop.f32.mrf.mxu0  ;;  %5446 = vmatprep.subr.bf16.mxu1 %v5644_v27 }
 0x361   :  { %v1987_v14 = vmax.f32 %v1515_v41, 0.0  ;;  %v2109_v55 = vpack.c.bf16 %v1989_v45, %v1988_v49  ;;  %v1536_v58 = vadd.f32 %v5182_v61, %v6122_v43 }
 0x362   :  { %v1527_v51 = vpop.f32.mrf.mxu0 }
 0x363   :  { %v2108_v21 = vpack.c.bf16 %v1987_v14, %v1986_v42  ;;  %v1528_v13 = vadd.f32 %v6122_v43, %v1527_v51  ;;  %v1992_v39 = vmax.f32 %v1536_v58, 0.0  ;;  %5447 = vmatpush3.bf16.msra.mxu1 %v5644_v27  ;;  %v6175_v42 = vpop.f32.mrf.mxu1 }
 0x364   :  { %v5183_v56 = vpop.f32.mrf.mxu0 }
 0x365   :  { %v1539_v29 = vadd.f32 %v5183_v56, %v6122_v43  ;;  %5320 = vmatprep.mubr.bf16.mxu1 %v2108_v21  ;;  %v1990_v8 = vmax.f32 %v1528_v13, 0.0 }
 0x366   :  { %v1530_v59 = vpop.f32.mrf.mxu0  ;;  %5321 = vmatmul.mubr.bf16.gmra.mxu1 %v2109_v55  ;;  %v6180_v55 = vpop.f32.mrf.mxu1 }
 0x367   :  { %v1531_v3 = vadd.f32 %v6122_v43, %v1530_v59  ;;  %v1993_v4 = vmax.f32 %v1539_v29, 0.0 }
 0x368   :  { %v5186_v46 = vpop.f32.mrf.mxu0 }
 0x369   :  { %v1991_v19 = vmax.f32 %v1531_v3, 0.0  ;;  %v2111_v0 = vpack.c.bf16 %v1993_v4, %v1992_v39  ;;  %v1552_v24 = vadd.f32 %v5186_v46, %v6122_v43  ;;  %v6183_v46 = vpop.f32.mrf.mxu1 }
 0x36a   :  { %v1543_v11 = vpop.f32.mrf.mxu0 }
 0x36b   :  { %v2110_v12 = vpack.c.bf16 %v1991_v19, %v1990_v8  ;;  %v1544_v22 = vadd.f32 %v6122_v43, %v1543_v11  ;;  %v1996_v28 = vmax.f32 %v1552_v24, 0.0 }
 0x36c   :  { %v5187_v16 = vpop.f32.mrf.mxu0 }
 0x36d   :  { %v1555_v20 = vadd.f32 %v5187_v16, %v6122_v43  ;;  %5324 = vmatprep.mubr.bf16.mxu1 %v2110_v12  ;;  %v1994_v34 = vmax.f32 %v1544_v22, 0.0  ;;  %v6188_v22 = vpop.f32.mrf.mxu1 }
 0x36e   :  { %v1546_v25 = vpop.f32.mrf.mxu0  ;;  %5325 = vmatmul.mubr.bf16.gmra.mxu1 %v2111_v0 }
 0x36f   :  { %v1547_v5 = vadd.f32 %v6122_v43, %v1546_v25  ;;  %v1997_v52 = vmax.f32 %v1555_v20, 0.0 }
 0x370   :  { %v5190_v7 = vpop.f32.mrf.mxu0 }
 0x371   :  { %v1995_v36 = vmax.f32 %v1547_v5, 0.0  ;;  %v2113_v45 = vpack.c.bf16 %v1997_v52, %v1996_v28  ;;  %v1568_v51 = vadd.f32 %v5190_v7, %v6122_v43 }
 0x372   :  { %v1559_v37 = vpop.f32.mrf.mxu0 }
 0x373   :  { %v2112_v41 = vpack.c.bf16 %v1995_v36, %v1994_v34  ;;  %v1560_v14 = vadd.f32 %v6122_v43, %v1559_v37  ;;  %v2000_v3 = vmax.f32 %v1568_v51, 0.0  ;;  %v6191_v34 = vpop.f32.mrf.mxu1 }
 0x374   :  { %v5191_v61 = vpop.f32.mrf.mxu0 }
 0x375   :  { %v1571_v49 = vadd.f32 %v5191_v61, %v6122_v43  ;;  %5328 = vmatprep.mubr.bf16.mxu1 %v2112_v41  ;;  %v1998_v58 = vmax.f32 %v1560_v14, 0.0  ;;  %v6193_v41 = vpop.f32.mrf.mxu1 }
 0x376   :  { %v1562_v21 = vpop.f32.mrf.mxu0  ;;  %5329 = vmatmul.mubr.bf16.gmra.mxu1 %v2113_v45 }
 0x377   :  { %v1563_v56 = vadd.f32 %v6122_v43, %v1562_v21  ;;  %v2001_v13 = vmax.f32 %v1571_v49, 0.0 }
 0x378   :  { %v5194_v29 = vpop.f32.mrf.mxu0 }
 0x379   :  { %v1999_v59 = vmax.f32 %v1563_v56, 0.0  ;;  %v2115_v19 = vpack.c.bf16 %v2001_v13, %v2000_v3  ;;  %v1584_v0 = vadd.f32 %v5194_v29, %v6122_v43  ;;  %v6199_v13 = vpop.f32.mrf.mxu1 }
 0x37a   :  { %v1575_v4 = vpop.f32.mrf.mxu0 }
 0x37b   :  { %v2114_v8 = vpack.c.bf16 %v1999_v59, %v1998_v58  ;;  %v1576_v11 = vadd.f32 %v6122_v43, %v1575_v4  ;;  %v2004_v52 = vmax.f32 %v1584_v0, 0.0 }
 0x37c   :  { %v5195_v39 = vpop.f32.mrf.mxu0 }
 0x37d   :  { %v1587_v12 = vadd.f32 %v5195_v39, %v6122_v43  ;;  %5332 = vmatprep.mubr.bf16.mxu1 %v2114_v8  ;;  %v2002_v27 = vmax.f32 %v1576_v11, 0.0  ;;  %v6201_v39 = vpop.f32.mrf.mxu1 }
 0x37e   :  { %v1578_v16 = vpop.f32.mrf.mxu0  ;;  %5333 = vmatmul.mubr.bf16.gmra.mxu1 %v2115_v19 }
 0x37f   :  { %v1579_v20 = vadd.f32 %v6122_v43, %v1578_v16  ;;  %v2005_v24 = vmax.f32 %v1587_v12, 0.0 }
 0x380   :  { %v5198_v25 = vpop.f32.mrf.mxu0 }
 0x381   :  { %v2003_v5 = vmax.f32 %v1579_v20, 0.0  ;;  %v2117_v28 = vpack.c.bf16 %v2005_v24, %v2004_v52  ;;  %v1600_v14 = vadd.f32 %v5198_v25, %v6122_v43 }
 0x382   :  { %v1591_v7 = vpop.f32.mrf.mxu0 }
 0x383   :  { %v2116_v36 = vpack.c.bf16 %v2003_v5, %v2002_v27  ;;  %v1592_v45 = vadd.f32 %v6122_v43, %v1591_v7  ;;  %v2008_v59 = vmax.f32 %v1600_v14, 0.0  ;;  %v6207_v27 = vpop.f32.mrf.mxu1  ;;  %v5645_v7 = vld [vmem:[#allocation10 + $0x8] sm:$0xff]  }
 0x384   :  { %v5199_v37 = vpop.f32.mrf.mxu0  ;;  %5448 = vmatprep.subr.bf16.mxu1 %v5645_v7 }
 0x385   :  { %v1603_v61 = vadd.f32 %v5199_v37, %v6122_v43  ;;  %5336 = vmatprep.mubr.bf16.mxu1 %v2116_v36  ;;  %v2006_v29 = vmax.f32 %v1592_v45, 0.0  ;;  %v6209_v37 = vpop.f32.mrf.mxu1  ;;  %5449 = vmatpush3.bf16.msra.mxu1 %v5645_v7 }
 0x386   :  { %v1594_v49 = vpop.f32.mrf.mxu0  ;;  %5337 = vmatmul.mubr.bf16.gmra.mxu1 %v2117_v28 }
 0x387   :  { %v1595_v51 = vadd.f32 %v6122_v43, %v1594_v49  ;;  %v2009_v21 = vmax.f32 %v1603_v61, 0.0 }
 0x388   :  { %v5202_v56 = vpop.f32.mrf.mxu0 }
 0x389   :  { %v2007_v58 = vmax.f32 %v1595_v51, 0.0  ;;  %v2119_v8 = vpack.c.bf16 %v2009_v21, %v2008_v59  ;;  %v1616_v0 = vadd.f32 %v5202_v56, %v6122_v43 }
 0x38a   :  { %v1607_v3 = vpop.f32.mrf.mxu0 }
 0x38b   :  { %v2118_v4 = vpack.c.bf16 %v2007_v58, %v2006_v29  ;;  %v1608_v11 = vadd.f32 %v6122_v43, %v1607_v3  ;;  %v2012_v36 = vmax.f32 %v1616_v0, 0.0  ;;  %v6214_v29 = vpop.f32.mrf.mxu1 }
 0x38c   :  { %v5203_v19 = vpop.f32.mrf.mxu0 }
 0x38d   :  { %v1619_v12 = vadd.f32 %v5203_v19, %v6122_v43  ;;  %5340 = vmatprep.mubr.bf16.mxu1 %v2118_v4  ;;  %v2010_v5 = vmax.f32 %v1608_v11, 0.0 }
 0x38e   :  { %v1610_v16 = vpop.f32.mrf.mxu0  ;;  %5341 = vmatmul.mubr.bf16.gmra.mxu1 %v2119_v8 }
 0x38f   :  { %v1611_v20 = vadd.f32 %v6122_v43, %v1610_v16  ;;  %v2013_v24 = vmax.f32 %v1619_v12, 0.0  ;;  %v6217_v12 = vpop.f32.mrf.mxu1 }
 0x390   :  { %v5206_v25 = vpop.f32.mrf.mxu0 }
 0x391   :  { %v2011_v52 = vmax.f32 %v1611_v20, 0.0  ;;  %v2121_v61 = vpack.c.bf16 %v2013_v24, %v2012_v36  ;;  %v1632_v21 = vadd.f32 %v5206_v25, %v6122_v43  ;;  %v6222_v7 = vpop.f32.mrf.mxu1 }
 0x392   :  { %v1623_v28 = vpop.f32.mrf.mxu0 }
 0x393   :  { %v2120_v45 = vpack.c.bf16 %v2011_v52, %v2010_v5  ;;  %v1624_v49 = vadd.f32 %v6122_v43, %v1623_v28  ;;  %v2016_v19 = vmax.f32 %v1632_v21, 0.0 }
 0x394   :  { %v5207_v14 = vpop.f32.mrf.mxu0 }
 0x395   :  { %v1635_v51 = vadd.f32 %v5207_v14, %v6122_v43  ;;  %5344 = vmatprep.mubr.bf16.mxu1 %v2120_v45  ;;  %v2014_v4 = vmax.f32 %v1624_v49, 0.0 }
 0x396   :  { %v1626_v56 = vpop.f32.mrf.mxu0  ;;  %5345 = vmatmul.mubr.bf16.gmra.mxu1 %v2121_v61  ;;  %v6225_v61 = vpop.f32.mrf.mxu1 }
 0x397   :  { %v1627_v58 = vadd.f32 %v6122_v43, %v1626_v56  ;;  %v2017_v59 = vmax.f32 %v1635_v51, 0.0 }
 0x398   :  { %v5210_v3 = vpop.f32.mrf.mxu0 }
 0x399   :  { %v2015_v8 = vmax.f32 %v1627_v58, 0.0  ;;  %v2123_v16 = vpack.c.bf16 %v2017_v59, %v2016_v19  ;;  %v1648_v5 = vadd.f32 %v5210_v3, %v6122_v43 }
 0x39a   :  { %v1639_v11 = vpop.f32.mrf.mxu0 }
 0x39b   :  { %v2122_v0 = vpack.c.bf16 %v2015_v8, %v2014_v4  ;;  %v1640_v24 = vadd.f32 %v6122_v43, %v1639_v11  ;;  %v2020_v51 = vmax.f32 %v1648_v5, 0.0  ;;  %v6227_v4 = vpop.f32.mrf.mxu1 }
 0x39c   :  { %v5211_v20 = vpop.f32.mrf.mxu0 }
 0x39d   :  { %v1651_v25 = vadd.f32 %v5211_v20, %v6122_v43  ;;  %5348 = vmatprep.mubr.bf16.mxu1 %v2122_v0  ;;  %v2018_v14 = vmax.f32 %v1640_v24, 0.0  ;;  %v6233_v24 = vpop.f32.mrf.mxu1 }
 0x39e   :  { %v1642_v52 = vpop.f32.mrf.mxu0  ;;  %5349 = vmatmul.mubr.bf16.gmra.mxu1 %v2123_v16 }
 0x39f   :  { %v1643_v36 = vadd.f32 %v6122_v43, %v1642_v52  ;;  %v2021_v28 = vmax.f32 %v1651_v25, 0.0 }
 0x3a0   :  { %v5214_v45 = vpop.f32.mrf.mxu0 }
 0x3a1   :  { %v2019_v49 = vmax.f32 %v1643_v36, 0.0  ;;  %v2125_v58 = vpack.c.bf16 %v2021_v28, %v2020_v51  ;;  %v1664_v19 = vadd.f32 %v5214_v45, %v6122_v43  ;;  %v1691_v51 = vadd.f32 %v6122_v43, %v6089_v54 }
 0x3a2   :  { %v1655_v21 = vpop.f32.mrf.mxu0 }
 0x3a3   :  { %v2124_v56 = vpack.c.bf16 %v2019_v49, %v2018_v14  ;;  %v1656_v3 = vadd.f32 %v6122_v43, %v1655_v21  ;;  %v2024_v52 = vmax.f32 %v1664_v19, 0.0  ;;  %v6237_v21 = vpop.f32.mrf.mxu1  ;;  %v2031_v54 = vmax.f32 %v1691_v51, 0.0 }
 0x3a4   :  { %v5215_v59 = vpop.f32.mrf.mxu0  ;;  %v1696_v51 = vadd.f32 %v6080_v23, %v6122_v43  ;;  %v1723_v23 = vadd.f32 %v6122_v43, %v6112_v17  ;;  %v1731_v17 = vadd.f32 %v6109_v10, %v6122_v43 }
 0x3a5   :  { %v1667_v8 = vadd.f32 %v5215_v59, %v6122_v43  ;;  %5352 = vmatprep.mubr.bf16.mxu1 %v2124_v56  ;;  %v2022_v25 = vmax.f32 %v1656_v3, 0.0  ;;  %v1688_v3 = vadd.f32 %v6122_v43, %v6083_v15  ;;  %v1707_v15 = vadd.f32 %v6122_v43, %v6101_v57 }
 0x3a6   :  { %v1658_v11 = vpop.f32.mrf.mxu0  ;;  %5353 = vmatmul.mubr.bf16.gmra.mxu1 %v2125_v58  ;;  %v1715_v57 = vadd.f32 %v6097_v47, %v6122_v43 }
 0x3a7   :  { %v1659_v0 = vadd.f32 %v6122_v43, %v1658_v11  ;;  %v2025_v16 = vmax.f32 %v1667_v8, 0.0  ;;  %v6244_v8 = vpop.f32.mrf.mxu1 }
 0x3a8   :  { %v5218_v20 = vpop.f32.mrf.mxu0 }
 0x3a9   :  { %v2023_v5 = vmax.f32 %v1659_v0, 0.0  ;;  %v2127_v14 = vpack.c.bf16 %v2025_v16, %v2024_v52  ;;  %v1680_v58 = vadd.f32 %v5218_v20, %v6122_v43  ;;  %v2030_v52 = vmax.f32 %v1688_v3, 0.0 }
 0x3aa   :  { %v1671_v36 = vpop.f32.mrf.mxu0  ;;  %v1699_v20 = vadd.f32 %v6086_v30, %v6122_v43  ;;  %v2032_v30 = vmax.f32 %v1696_v51, 0.0  ;;  %v2041_v51 = vmax.f32 %v1731_v17, 0.0 }
 0x3ab   :  { %v2126_v28 = vpack.c.bf16 %v2023_v5, %v2022_v25  ;;  %v1672_v45 = vadd.f32 %v6122_v43, %v1671_v36  ;;  %v5646_v25 = vld [vmem:[#allocation10] sm:$0xff]   ;;  %v2028_v5 = vmax.f32 %v1680_v58, 0.0  ;;  %v6247_v36 = vpop.f32.mrf.mxu1 }
 0x3ac   :  { %v5219_v49 = vpop.f32.mrf.mxu0  ;;  %5450 = vmatprep.subr.bf16.mxu1 %v5646_v25  ;;  %v2033_v58 = vmax.f32 %v1699_v20, 0.0 }
 0x3ad   :  { %v1683_v56 = vadd.f32 %v5219_v49, %v6122_v43  ;;  %5356 = vmatprep.mubr.bf16.mxu1 %v2126_v28  ;;  %v2026_v0 = vmax.f32 %v1672_v45, 0.0  ;;  %5451 = vmatpush3.bf16.msra.mxu1 %v5646_v25  ;;  %v2130_v49 = vpack.c.bf16 %v2031_v54, %v2030_v52  ;;  %v1704_v45 = vadd.f32 %v6122_v43, %v6095_v48 }
 0x3ae   :  { %v1674_v59 = vpop.f32.mrf.mxu0  ;;  %5357 = vmatmul.mubr.bf16.gmra.mxu1 %v2127_v14  ;;  %v1712_v48 = vadd.f32 %v6091_v26, %v6122_v43  ;;  %v2037_v25 = vmax.f32 %v1715_v57, 0.0  ;;  %v1752_v57 = vadd.f32 %v6122_v43, %v6139_v40  ;;  %v1760_v40 = vadd.f32 %v6132_v50, %v6122_v43 }
 0x3af   :  { %v1675_v19 = vadd.f32 %v6122_v43, %v1674_v59  ;;  %v2029_v11 = vmax.f32 %v1683_v56, 0.0  ;;  %v6257_v56 = vpop.f32.mrf.mxu1  ;;  %v2035_v59 = vmax.f32 %v1707_v15, 0.0  ;;  %v2034_v3 = vmax.f32 %v1704_v45, 0.0 }
 0x3b0   :  { %v1787_v50 = vadd.f32 %v6122_v43, %v6175_v42  ;;  %v1795_v42 = vadd.f32 %v6173_v32, %v6122_v43 }
 0x3b1   :  { %v2027_v16 = vmax.f32 %v1675_v19, 0.0  ;;  %v2129_v14 = vpack.c.bf16 %v2029_v11, %v2028_v5  ;;  %v6259_v19 = vpop.f32.mrf.mxu1  ;;  %v2131_v11 = vpack.c.bf16 %v2033_v58, %v2032_v30  ;;  %v2039_v5 = vmax.f32 %v1723_v23, 0.0 }
 0x3b3   :  { %v2128_v28 = vpack.c.bf16 %v2027_v16, %v2026_v0  ;;  %v6265_v54 = vpop.f32.mrf.mxu1  ;;  %v2132_v0 = vpack.c.bf16 %v2035_v59, %v2034_v3  ;;  %v1720_v16 = vadd.f32 %v6122_v43, %v6106_v6  ;;  %v1728_v6 = vadd.f32 %v6103_v60, %v6122_v43 }
 0x3b4   :  { %v1747_v3 = vadd.f32 %v6127_v33, %v6122_v43  ;;  %v1755_v60 = vadd.f32 %v6122_v43, %v6147_v35  ;;  %v1763_v35 = vadd.f32 %v6141_v9, %v6122_v43 }
 0x3b5   :  { %5360 = vmatprep.mubr.bf16.mxu1 %v2128_v28  ;;  %v6271_v52 = vpop.f32.mrf.mxu1  ;;  %v2036_v28 = vmax.f32 %v1712_v48, 0.0  ;;  %v2038_v47 = vmax.f32 %v1720_v16, 0.0  ;;  %v2040_v59 = vmax.f32 %v1728_v6, 0.0  ;;  %v2048_v6 = vmax.f32 %v1760_v40, 0.0 }
 0x3b6   :  { %5361 = vmatmul.mubr.bf16.gmra.mxu1 %v2129_v14  ;;  %v1739_v14 = vadd.f32 %v6122_v43, %v6130_v44  ;;  %v2047_v48 = vmax.f32 %v1755_v60, 0.0  ;;  %v2049_v17 = vmax.f32 %v1763_v35, 0.0  ;;  %v1816_v40 = vadd.f32 %v6122_v43, %v6199_v13 }
 0x3b7   :  { %5364 = vmatprep.mubr.bf16.mxu1 %v2130_v49  ;;  %v2133_v20 = vpack.c.bf16 %v2037_v25, %v2036_v28  ;;  %v6277_v15 = vpop.f32.mrf.mxu1  ;;  %v2134_v26 = vpack.c.bf16 %v2039_v5, %v2038_v47  ;;  %v1736_v49 = vadd.f32 %v6122_v43, %v6117_v31  ;;  %v2135_v44 = vpack.c.bf16 %v2041_v51, %v2040_v59 }
 0x3b8   :  { %v2043_v45 = vmax.f32 %v1739_v14, 0.0  ;;  %v1744_v31 = vadd.f32 %v6115_v18, %v6122_v43  ;;  %v2046_v25 = vmax.f32 %v1752_v57, 0.0  ;;  %v1771_v18 = vadd.f32 %v6122_v43, %v6162_v63 }
 0x3b9   :  { %v6283_v58 = vpop.f32.mrf.mxu1  ;;  %v2042_v10 = vmax.f32 %v1736_v49, 0.0  ;;  %v1768_v47 = vadd.f32 %v6122_v43, %v6154_v38  ;;  %v2139_v49 = vpack.c.bf16 %v2049_v17, %v2048_v6  ;;  %v1779_v63 = vadd.f32 %v6157_v2, %v6122_v43 }
 0x3ba   :  { %v2044_v16 = vmax.f32 %v1744_v31, 0.0  ;;  %v2138_v28 = vpack.c.bf16 %v2047_v48, %v2046_v25  ;;  %v2051_v14 = vmax.f32 %v1771_v18, 0.0  ;;  %v1776_v38 = vadd.f32 %v6149_v53, %v6122_v43 }
 0x3bb   :  { %v2050_v9 = vmax.f32 %v1768_v47, 0.0  ;;  %v1784_v59 = vadd.f32 %v6122_v43, %v6167_v62  ;;  %v1803_v31 = vadd.f32 %v6122_v43, %v6191_v34  ;;  %v1792_v62 = vadd.f32 %v6165_v1, %v6122_v43 }
 0x3bc   :  { %v2052_v60 = vmax.f32 %v1776_v38, 0.0  ;;  %v1811_v18 = vadd.f32 %v6188_v22, %v6122_v43  ;;  %v1819_v1 = vadd.f32 %v6122_v43, %v6207_v27  ;;  %v1827_v27 = vadd.f32 %v6201_v39, %v6122_v43 }
 0x3bd   :  { %v2054_v2 = vmax.f32 %v1784_v59, 0.0  ;;  %v2059_v25 = vmax.f32 %v1803_v31, 0.0  ;;  %v1824_v13 = vadd.f32 %v6193_v41, %v6122_v43 }
 0x3be   :  { %5365 = vmatmul.mubr.bf16.gmra.mxu1 %v2131_v11  ;;  %v2136_v11 = vpack.c.bf16 %v2043_v45, %v2042_v10  ;;  %v2140_v45 = vpack.c.bf16 %v2051_v14, %v2050_v9  ;;  %v2053_v10 = vmax.f32 %v1779_v63, 0.0  ;;  %v2061_v17 = vmax.f32 %v1811_v18, 0.0 }
 0x3bf   :  { %5368 = vmatprep.mubr.bf16.mxu1 %v2132_v0  ;;  %v2045_v0 = vmax.f32 %v1747_v3, 0.0  ;;  %v2063_v14 = vmax.f32 %v1819_v1, 0.0  ;;  %v2062_v9 = vmax.f32 %v1816_v40, 0.0  ;;  %v2065_v38 = vmax.f32 %v1827_v27, 0.0 }
 0x3c1   :  { %v2137_v33 = vpack.c.bf16 %v2045_v0, %v2044_v16  ;;  %v1800_v0 = vadd.f32 %v6122_v43, %v6183_v46  ;;  %v2057_v16 = vmax.f32 %v1795_v42, 0.0  ;;  %v1808_v46 = vadd.f32 %v6180_v55, %v6122_v43 }
 0x3c2   :  { %v1835_v55 = vadd.f32 %v6122_v43, %v6222_v7  ;;  %v1843_v7 = vadd.f32 %v6217_v12, %v6122_v43  ;;  %v1848_v42 = vadd.f32 %v6122_v43, %v6227_v4  ;;  %v1856_v4 = vadd.f32 %v6225_v61, %v6122_v43 }
 0x3c3   :  { %v6285_v30 = vpop.f32.mrf.mxu1  ;;  %v2058_v32 = vmax.f32 %v1800_v0, 0.0  ;;  %v2060_v6 = vmax.f32 %v1808_v46, 0.0  ;;  %v1883_v61 = vadd.f32 %v6122_v43, %v6283_v58 }
 0x3c4   :  { %v2067_v59 = vmax.f32 %v1835_v55, 0.0  ;;  %v2069_v31 = vmax.f32 %v1843_v7, 0.0  ;;  %v2070_v12 = vmax.f32 %v1848_v42, 0.0  ;;  %v2072_v46 = vmax.f32 %v1856_v4, 0.0 }
 0x3c5   :  { %v6295_v23 = vpop.f32.mrf.mxu1  ;;  %v2145_v22 = vpack.c.bf16 %v2061_v17, %v2060_v6 }
 0x3c6   :  { %5369 = vmatmul.mubr.bf16.gmra.mxu1 %v2133_v20 }
 0x3c7   :  { %5372 = vmatprep.mubr.bf16.mxu1 %v2134_v26  ;;  %v6297_v5 = vpop.f32.mrf.mxu1 }
 0x3c8   :  { %v1907_v42 = vadd.f32 %v6297_v5, %v6122_v43 }
 0x3c9   :  { %v6307_v20 = vpop.f32.mrf.mxu1 }
 0x3ce   :  { %5373 = vmatmul.mubr.bf16.gmra.mxu1 %v2135_v44  ;;  %v2055_v44 = vmax.f32 %v1787_v50, 0.0  ;;  %v2146_v50 = vpack.c.bf16 %v2063_v14, %v2062_v9  ;;  %v1880_v9 = vadd.f32 %v6122_v43, %v6271_v52  ;;  %v1888_v52 = vadd.f32 %v6265_v54, %v6122_v43 }
 0x3cf   :  { %5376 = vmatprep.mubr.bf16.mxu1 %v2136_v11  ;;  %v2141_v11 = vpack.c.bf16 %v2053_v10, %v2052_v60 }
 0x3d0   :  { %v2142_v53 = vpack.c.bf16 %v2055_v44, %v2054_v2  ;;  %v2064_v44 = vmax.f32 %v1824_v13, 0.0  ;;  %v1851_v2 = vadd.f32 %v6122_v43, %v6237_v21  ;;  %v2078_v13 = vmax.f32 %v1880_v9, 0.0 }
 0x3d2   :  { %v2147_v60 = vpack.c.bf16 %v2065_v38, %v2064_v44  ;;  %v1899_v38 = vadd.f32 %v6122_v43, %v6307_v20 }
 0x3d3   :  { %v6309_v26 = vpop.f32.mrf.mxu1 }
 0x3d5   :  { %v6315_v51 = vpop.f32.mrf.mxu1 }
 0x3d6   :  { %5377 = vmatmul.mubr.bf16.gmra.mxu1 %v2137_v33  ;;  %v2056_v33 = vmax.f32 %v1792_v62, 0.0 }
 0x3d7   :  { %5380 = vmatprep.mubr.bf16.mxu1 %v2138_v28  ;;  %v6321_v3 = vpop.f32.mrf.mxu1  ;;  %v2144_v28 = vpack.c.bf16 %v2059_v25, %v2058_v32  ;;  %v1859_v25 = vadd.f32 %v6233_v24, %v6122_v43 }
 0x3d8   :  { %v2143_v34 = vpack.c.bf16 %v2057_v16, %v2056_v33 }
 0x3d9   :  { %v6327_v57 = vpop.f32.mrf.mxu1  ;;  %v2073_v18 = vmax.f32 %v1859_v25, 0.0 }
 0x3db   :  { %v2151_v40 = vpack.c.bf16 %v2073_v18, %v2072_v46 }
 0x3de   :  { %5381 = vmatmul.mubr.bf16.gmra.mxu1 %v2139_v49 }
 0x3df   :  { %5384 = vmatprep.mubr.bf16.mxu1 %v2140_v45  ;;  %v1832_v45 = vadd.f32 %v6122_v43, %v6214_v29  ;;  %v1840_v29 = vadd.f32 %v6209_v37, %v6122_v43  ;;  %v1867_v37 = vadd.f32 %v6122_v43, %v6259_v19  ;;  %v1875_v19 = vadd.f32 %v6257_v56, %v6122_v43 }
 0x3e0   :  { %v2079_v56 = vmax.f32 %v1883_v61, 0.0 }
 0x3e1   :  { %v2066_v39 = vmax.f32 %v1832_v45, 0.0  ;;  %v2068_v0 = vmax.f32 %v1840_v29, 0.0  ;;  %v1891_v45 = vadd.f32 %v6277_v15, %v6122_v43  ;;  %v2083_v15 = vmax.f32 %v1899_v38, 0.0 }
 0x3e3   :  { %v6333_v48 = vpop.f32.mrf.mxu1  ;;  %v2148_v41 = vpack.c.bf16 %v2067_v59, %v2066_v39  ;;  %v2149_v21 = vpack.c.bf16 %v2069_v31, %v2068_v0  ;;  %v2154_v59 = vpack.c.bf16 %v2079_v56, %v2078_v13  ;;  %v1896_v39 = vadd.f32 %v6122_v43, %v6295_v23 }
 0x3e4   :  { %v1915_v31 = vadd.f32 %v6122_v43, %v6327_v57  ;;  %v1904_v23 = vadd.f32 %v6285_v30, %v6122_v43 }
 0x3e5   :  { %v6335_v35 = vpop.f32.mrf.mxu1  ;;  %v2082_v29 = vmax.f32 %v1896_v39, 0.0 }
 0x3e6   :  { %5385 = vmatmul.mubr.bf16.gmra.mxu1 %v2141_v11  ;;  %v2087_v5 = vmax.f32 %v1915_v31, 0.0 }
 0x3e7   :  { %5388 = vmatprep.mubr.bf16.mxu1 %v2142_v53  ;;  %v6345_v47 = vpop.f32.mrf.mxu1  ;;  %v2071_v53 = vmax.f32 %v1851_v2, 0.0  ;;  %v2080_v2 = vmax.f32 %v1888_v52, 0.0 }
 0x3e8   :  { %v1939_v9 = vadd.f32 %v6345_v47, %v6122_v43 }
 0x3e9   :  { %v6347_v49 = vpop.f32.mrf.mxu1  ;;  %v2150_v32 = vpack.c.bf16 %v2071_v53, %v2070_v12  ;;  %v2156_v53 = vpack.c.bf16 %v2083_v15, %v2082_v29  ;;  %v1912_v12 = vadd.f32 %v6122_v43, %v6315_v51  ;;  %v1920_v51 = vadd.f32 %v6309_v26, %v6122_v43 }
 0x3ea   :  { %v1931_v18 = vadd.f32 %v6122_v43, %v6347_v49 }
 0x3eb   :  { %v2086_v4 = vmax.f32 %v1912_v12, 0.0  ;;  %v2088_v61 = vmax.f32 %v1920_v51, 0.0 }
 0x3ee   :  { %5389 = vmatmul.mubr.bf16.gmra.mxu1 %v2143_v34  ;;  %v1864_v34 = vadd.f32 %v6122_v43, %v6247_v36  ;;  %v1872_v36 = vadd.f32 %v6244_v8, %v6122_v43 }
 0x3ef   :  { %5392 = vmatprep.mubr.bf16.mxu1 %v2144_v28  ;;  %v2075_v28 = vmax.f32 %v1867_v37, 0.0  ;;  %v2084_v37 = vmax.f32 %v1904_v23, 0.0 }
 0x3f0   :  { %v2074_v24 = vmax.f32 %v1864_v34, 0.0  ;;  %v2076_v55 = vmax.f32 %v1872_v36, 0.0  ;;  %v1923_v34 = vadd.f32 %v6321_v3, %v6122_v43  ;;  %v2091_v3 = vmax.f32 %v1931_v18, 0.0 }
 0x3f2   :  { %v2152_v14 = vpack.c.bf16 %v2075_v28, %v2074_v24  ;;  %v2158_v28 = vpack.c.bf16 %v2087_v5, %v2086_v4  ;;  %v1928_v24 = vadd.f32 %v6122_v43, %v6335_v35  ;;  %v1936_v35 = vadd.f32 %v6333_v48, %v6122_v43  ;;  %v5648_v48 = vld [vmem:[%s7093_s4] ss:$0 sm:$0xff] }
 0x3f3   :  { %v6353_v63 = vpop.f32.mrf.mxu1 }
 0x3f4   :  { %v2090_v36 = vmax.f32 %v1928_v24, 0.0  ;;  %v2092_v38 = vmax.f32 %v1936_v35, 0.0  ;;  %v1952_v15 = vadd.f32 %v5648_v48, %v6353_v63  ;;  %v6486_v63 = vld [vmem:[%s7095_s6] ss:$0 sm:$0xff] }
 0x3f5   :  { %v6359_v10 = vpop.f32.mrf.mxu1 }
 0x3f6   :  { %5393 = vmatmul.mubr.bf16.gmra.mxu1 %v2145_v22  ;;  %v2077_v22 = vmax.f32 %v1875_v19, 0.0  ;;  %v2160_v56 = vpack.c.bf16 %v2091_v3, %v2090_v36  ;;  %v1944_v13 = vadd.f32 %v6122_v43, %v6359_v10 }
 0x3f7   :  { %5396 = vmatprep.mubr.bf16.mxu1 %v2146_v50  ;;  %v6365_v11 = vpop.f32.mrf.mxu1 }
 0x3f8   :  { %v2153_v58 = vpack.c.bf16 %v2077_v22, %v2076_v55  ;;  %v2094_v52 = vmax.f32 %v1944_v13, 0.0  ;;  %v1955_v39 = vadd.f32 %v5648_v48, %v6365_v11 }
 0x3f9   :  { %v6371_v62 = vpop.f32.mrf.mxu1 }
 0x3fa   :  { %v1947_v22 = vadd.f32 %v6122_v43, %v6371_v62 }
 0x3fc   :  { %v2095_v47 = vmax.f32 %v1947_v22, 0.0 }
 0x3fe   :  { %5397 = vmatmul.mubr.bf16.gmra.mxu1 %v2147_v60  ;;  %v2081_v60 = vmax.f32 %v1891_v45, 0.0  ;;  %v2162_v10 = vpack.c.bf16 %v2095_v47, %v2094_v52 }
 0x3ff   :  { %5400 = vmatprep.mubr.bf16.mxu1 %v2148_v41 }
 0x400   :  { %v2155_v20 = vpack.c.bf16 %v2081_v60, %v2080_v2 }
 0x403   :  { %v6373_v16 = vpop.f32.mrf.mxu1 }
 0x405   :  { %v6379_v33 = vpop.f32.mrf.mxu1 }
 0x406   :  { %5401 = vmatmul.mubr.bf16.gmra.mxu1 %v2149_v21  ;;  %v2085_v21 = vmax.f32 %v1907_v42, 0.0  ;;  %v1960_v29 = vadd.f32 %v5648_v48, %v6379_v33 }
 0x407   :  { %5404 = vmatprep.mubr.bf16.mxu1 %v2150_v32  ;;  %v6385_v1 = vpop.f32.mrf.mxu1 }
 0x408   :  { %v2157_v57 = vpack.c.bf16 %v2085_v21, %v2084_v37  ;;  %v2098_v11 = vmax.f32 %v1960_v29, 0.0  ;;  %v1968_v37 = vadd.f32 %v5648_v48, %v6373_v16 }
 0x409   :  { %v6389_v17 = vpop.f32.mrf.mxu1 }
 0x40a   :  { %v1963_v43 = vadd.f32 %v5648_v48, %v6389_v17  ;;  %v1971_v17 = vadd.f32 %v5648_v48, %v6385_v1 }
 0x40c   :  { %v2099_v31 = vmax.f32 %v1963_v43, 0.0  ;;  %v2101_v1 = vmax.f32 %v1971_v17, 0.0 }
 0x40e   :  { %v6395_v6 = vpop.f32.mrf.mxu1  ;;  %5405 = vmatmul.mubr.bf16.gmra.mxu1 %v2151_v40  ;;  %v2089_v40 = vmax.f32 %v1923_v34, 0.0  ;;  %v2164_v5 = vpack.c.bf16 %v2099_v31, %v2098_v11 }
 0x40f   :  { %5408 = vmatprep.mubr.bf16.mxu1 %v2152_v14 }
 0x410   :  { %v6399_v27 = vpop.f32.mrf.mxu1  ;;  %v2159_v49 = vpack.c.bf16 %v2089_v40, %v2088_v61 }
 0x412   :  { %v6401_v50 = vpop.f32.mrf.mxu1 }
 0x414   :  { %v6405_v8 = vpop.f32.mrf.mxu1 }
 0x415   :  { %v2275_v33 = vadd.f32 %v6486_v63, %v6405_v8  ;;  %v2283_v8 = vadd.f32 %v6401_v50, %v6486_v63 }
 0x416   :  { %v6411_v44 = vpop.f32.mrf.mxu1  ;;  %5409 = vmatmul.mubr.bf16.gmra.mxu1 %v2153_v58  ;;  %v2093_v58 = vmax.f32 %v1939_v9, 0.0 }
 0x417   :  { %5412 = vmatprep.mubr.bf16.mxu1 %v2154_v59  ;;  %v2783_v18 = vmax.f32 %v2275_v33, 0.0  ;;  %v2785_v9 = vmax.f32 %v2283_v8, 0.0 }
 0x418   :  { %v6415_v7 = vpop.f32.mrf.mxu1  ;;  %v2161_v62 = vpack.c.bf16 %v2093_v58, %v2092_v38 }
 0x41a   :  { %v6417_v41 = vpop.f32.mrf.mxu1 }
 0x41b   :  { %v2299_v58 = vadd.f32 %v6417_v41, %v6486_v63 }
 0x41c   :  { %v6421_v54 = vpop.f32.mrf.mxu1 }
 0x41d   :  { %v2291_v3 = vadd.f32 %v6486_v63, %v6421_v54  ;;  %v2789_v48 = vmax.f32 %v2299_v58, 0.0 }
 0x41e   :  { %v6427_v0 = vpop.f32.mrf.mxu1  ;;  %5413 = vmatmul.mubr.bf16.gmra.mxu1 %v2155_v20  ;;  %v2097_v20 = vmax.f32 %v1955_v39, 0.0 }
 0x41f   :  { %5416 = vmatprep.mubr.bf16.mxu1 %v2156_v53  ;;  %v2096_v53 = vmax.f32 %v1952_v15, 0.0  ;;  %v2787_v50 = vmax.f32 %v2291_v3, 0.0 }
 0x420   :  { %v6431_v25 = vpop.f32.mrf.mxu1 }
 0x421   :  { %v2163_v12 = vpack.c.bf16 %v2097_v20, %v2096_v53 }
 0x422   :  { %v6433_v32 = vpop.f32.mrf.mxu1 }
 0x423   :  { %v2315_v29 = vadd.f32 %v6433_v32, %v6486_v63 }
 0x424   :  { %v6437_v30 = vpop.f32.mrf.mxu1 }
 0x425   :  { %v2307_v47 = vadd.f32 %v6486_v63, %v6437_v30 }
 0x426   :  { %v6443_v46 = vpop.f32.mrf.mxu1  ;;  %5417 = vmatmul.mubr.bf16.gmra.mxu1 %v2157_v57  ;;  %v2272_v57 = vadd.f32 %v6486_v63, %v6399_v27  ;;  %v2280_v27 = vadd.f32 %v6395_v6, %v6486_v63 }
 0x427   :  { %5420 = vmatprep.mubr.bf16.mxu1 %v2158_v28  ;;  %v2100_v28 = vmax.f32 %v1968_v37, 0.0  ;;  %v2791_v41 = vmax.f32 %v2307_v47, 0.0 }
 0x428   :  { %v6447_v19 = vpop.f32.mrf.mxu1  ;;  %v2782_v24 = vmax.f32 %v2272_v57, 0.0 }
 0x429   :  { %v2165_v40 = vpack.c.bf16 %v2101_v1, %v2100_v28  ;;  %v2320_v11 = vadd.f32 %v6486_v63, %v6447_v19  ;;  %v2328_v19 = vadd.f32 %v6443_v46, %v6486_v63 }
 0x42a   :  { %v6449_v14 = vpop.f32.mrf.mxu1  ;;  %v2910_v61 = vpack.c.bf16 %v2783_v18, %v2782_v24 }
 0x42b   :  { %v2794_v37 = vmax.f32 %v2320_v11, 0.0  ;;  %v2331_v57 = vadd.f32 %v6449_v14, %v6486_v63  ;;  %v2796_v3 = vmax.f32 %v2328_v19, 0.0 }
 0x42c   :  { %v6453_v26 = vpop.f32.mrf.mxu1 }
 0x42d   :  { %v2323_v20 = vadd.f32 %v6486_v63, %v6453_v26 }
 0x42e   :  { %v6459_v55 = vpop.f32.mrf.mxu1  ;;  %5421 = vmatmul.mubr.bf16.gmra.mxu1 %v2159_v49  ;;  %v2288_v49 = vadd.f32 %v6486_v63, %v6415_v7  ;;  %v2296_v7 = vadd.f32 %v6411_v44, %v6486_v63 }
 0x42f   :  { %5424 = vmatprep.mubr.bf16.mxu1 %v2160_v56  ;;  %v2784_v56 = vmax.f32 %v2280_v27, 0.0  ;;  %v2795_v32 = vmax.f32 %v2323_v20, 0.0 }
 0x430   :  { %v6463_v45 = vpop.f32.mrf.mxu1  ;;  %v2786_v13 = vmax.f32 %v2288_v49, 0.0  ;;  %v2788_v43 = vmax.f32 %v2296_v7, 0.0 }
 0x431   :  { %v2911_v54 = vpack.c.bf16 %v2785_v9, %v2784_v56  ;;  %v2916_v18 = vpack.c.bf16 %v2795_v32, %v2794_v37  ;;  %v2336_v24 = vadd.f32 %v6486_v63, %v6463_v45  ;;  %v2344_v45 = vadd.f32 %v6459_v55, %v6486_v63 }
 0x432   :  { %v6465_v59 = vpop.f32.mrf.mxu1  ;;  %v2912_v38 = vpack.c.bf16 %v2787_v50, %v2786_v13  ;;  %v2913_v30 = vpack.c.bf16 %v2789_v48, %v2788_v43 }
 0x433   :  { %v2798_v27 = vmax.f32 %v2336_v24, 0.0  ;;  %v2347_v49 = vadd.f32 %v6465_v59, %v6486_v63  ;;  %v2800_v47 = vmax.f32 %v2344_v45, 0.0 }
 0x434   :  { %v6471_v60 = vpop.f32.mrf.mxu1 }
 0x435   :  { %v2339_v1 = vadd.f32 %v6486_v63, %v6471_v60 }
 0x436   :  { %v6475_v2 = vpop.f32.mrf.mxu1  ;;  %5425 = vmatmul.mubr.bf16.gmra.mxu1 %v2161_v62  ;;  %v2304_v62 = vadd.f32 %v6486_v63, %v6431_v25  ;;  %v2312_v25 = vadd.f32 %v6427_v0, %v6486_v63 }
 0x437   :  { %5428 = vmatprep.mubr.bf16.mxu1 %v2162_v10  ;;  %v2799_v14 = vmax.f32 %v2339_v1, 0.0 }
 0x438   :  { %v6478_v42 = vpop.f32.mrf.mxu1  ;;  %v2790_v15 = vmax.f32 %v2304_v62, 0.0  ;;  %v2792_v33 = vmax.f32 %v2312_v25, 0.0 }
 0x439   :  { %v2918_v50 = vpack.c.bf16 %v2799_v14, %v2798_v27  ;;  %v2352_v13 = vadd.f32 %v6486_v63, %v6478_v42  ;;  %v2360_v42 = vadd.f32 %v6475_v2, %v6486_v63 }
 0x43a   :  { %v6480_v23 = vpop.f32.mrf.mxu1  ;;  %v2914_v31 = vpack.c.bf16 %v2791_v41, %v2790_v15 }
 0x43b   :  { %v2802_v7 = vmax.f32 %v2352_v13, 0.0  ;;  %v2363_v62 = vadd.f32 %v6480_v23, %v6486_v63  ;;  %v2804_v20 = vmax.f32 %v2360_v42, 0.0 }
 0x43c   :  { %v6488_v21 = vpop.f32.mrf.mxu1 }
 0x43d   :  { %v2355_v9 = vadd.f32 %v6486_v63, %v6488_v21 }
 0x43e   :  { %v6493_v4 = vpop.f32.mrf.mxu1  ;;  %5429 = vmatmul.mubr.bf16.gmra.mxu1 %v2163_v12  ;;  %v2793_v12 = vmax.f32 %v2315_v29, 0.0 }
 0x43f   :  { %5432 = vmatprep.mubr.bf16.mxu1 %v2164_v5  ;;  %v2803_v59 = vmax.f32 %v2355_v9, 0.0 }
 0x440   :  { %v6497_v34 = vpop.f32.mrf.mxu1  ;;  %v2915_v26 = vpack.c.bf16 %v2793_v12, %v2792_v33 }
 0x441   :  { %v2920_v41 = vpack.c.bf16 %v2803_v59, %v2802_v7  ;;  %v2368_v15 = vadd.f32 %v6486_v63, %v6497_v34  ;;  %v2376_v34 = vadd.f32 %v6493_v4, %v6486_v63 }
 0x442   :  { %v6499_v51 = vpop.f32.mrf.mxu1 }
 0x443   :  { %v2806_v25 = vmax.f32 %v2368_v15, 0.0  ;;  %v2379_v11 = vadd.f32 %v6499_v51, %v6486_v63  ;;  %v2808_v1 = vmax.f32 %v2376_v34, 0.0 }
 0x444   :  { %v6503_v16 = vpop.f32.mrf.mxu1 }
 0x445   :  { %v2371_v48 = vadd.f32 %v6486_v63, %v6503_v16 }
 0x446   :  { %v6509_v36 = vpop.f32.mrf.mxu1  ;;  %5433 = vmatmul.mubr.bf16.gmra.mxu1 %v2165_v40  ;;  %v2797_v40 = vmax.f32 %v2331_v57, 0.0 }
 0x447   :  { %5452 = vmatprep.mubr.bf16.mxu1 %v2910_v61  ;;  %v2807_v23 = vmax.f32 %v2371_v48, 0.0 }
 0x448   :  { %v6513_v22 = vpop.f32.mrf.mxu1  ;;  %v2917_v60 = vpack.c.bf16 %v2797_v40, %v2796_v3 }
 0x449   :  { %v2922_v32 = vpack.c.bf16 %v2807_v23, %v2806_v25  ;;  %v2384_v37 = vadd.f32 %v6486_v63, %v6513_v22  ;;  %v2392_v22 = vadd.f32 %v6509_v36, %v6486_v63 }
 0x44a   :  { %v6515_v35 = vpop.f32.mrf.mxu1 }
 0x44b   :  { %v2810_v19 = vmax.f32 %v2384_v37, 0.0  ;;  %v2395_v24 = vadd.f32 %v6515_v35, %v6486_v63  ;;  %v2812_v9 = vmax.f32 %v2392_v22, 0.0 }
 0x44c   :  { %v6519_v6 = vpop.f32.mrf.mxu1 }
 0x44d   :  { %v2387_v12 = vadd.f32 %v6486_v63, %v6519_v6 }
 0x44e   :  { %v6525_v52 = vpop.f32.mrf.mxu1  ;;  %5453 = vmatmul.mubr.bf16.vlgmr.msra.gmra.mxu1 %v2911_v54  ;;  %v2801_v54 = vmax.f32 %v2347_v49, 0.0 }
 0x44f   :  { %5456 = vmatprep.mubr.bf16.mxu1 %v2912_v38  ;;  %v2811_v51 = vmax.f32 %v2387_v12, 0.0 }
 0x450   :  { %v6529_v39 = vpop.f32.mrf.mxu1  ;;  %v2919_v21 = vpack.c.bf16 %v2801_v54, %v2800_v47 }
 0x451   :  { %v2924_v14 = vpack.c.bf16 %v2811_v51, %v2810_v19  ;;  %v2400_v27 = vadd.f32 %v6486_v63, %v6529_v39  ;;  %v2408_v39 = vadd.f32 %v6525_v52, %v6486_v63 }
 0x452   :  { %v6531_v10 = vpop.f32.mrf.mxu1 }
 0x453   :  { %v2814_v45 = vmax.f32 %v2400_v27, 0.0  ;;  %v2411_v13 = vadd.f32 %v6531_v10, %v6486_v63  ;;  %v2816_v48 = vmax.f32 %v2408_v39, 0.0 }
 0x454   :  { %v6535_v44 = vpop.f32.mrf.mxu1 }
 0x455   :  { %v2403_v40 = vadd.f32 %v6486_v63, %v6535_v44 }
 0x456   :  { %v6541_v53 = vpop.f32.mrf.mxu1  ;;  %5457 = vmatmul.mubr.bf16.gmra.mxu1 %v2913_v30  ;;  %v2805_v30 = vmax.f32 %v2363_v62, 0.0 }
 0x457   :  { %5460 = vmatprep.mubr.bf16.mxu1 %v2914_v31  ;;  %v2815_v35 = vmax.f32 %v2403_v40, 0.0 }
 0x458   :  { %v6545_v17 = vpop.f32.mrf.mxu1  ;;  %v2921_v16 = vpack.c.bf16 %v2805_v30, %v2804_v20 }
 0x459   :  { %v2926_v59 = vpack.c.bf16 %v2815_v35, %v2814_v45  ;;  %v2416_v7 = vadd.f32 %v6486_v63, %v6545_v17  ;;  %v2424_v17 = vadd.f32 %v6541_v53, %v6486_v63 }
 0x45a   :  { %v6547_v5 = vpop.f32.mrf.mxu1 }
 0x45b   :  { %v2818_v42 = vmax.f32 %v2416_v7, 0.0  ;;  %v2427_v15 = vadd.f32 %v6547_v5, %v6486_v63  ;;  %v2820_v12 = vmax.f32 %v2424_v17, 0.0 }
 0x45c   :  { %v6551_v0 = vpop.f32.mrf.mxu1 }
 0x45d   :  { %v2419_v54 = vadd.f32 %v6486_v63, %v6551_v0 }
 0x45e   :  { %v6557_v28 = vpop.f32.mrf.mxu1  ;;  %5461 = vmatmul.mubr.bf16.gmra.mxu1 %v2915_v26  ;;  %v2809_v26 = vmax.f32 %v2379_v11, 0.0 }
 0x45f   :  { %5464 = vmatprep.mubr.bf16.mxu1 %v2916_v18  ;;  %v2819_v10 = vmax.f32 %v2419_v54, 0.0 }
 0x460   :  { %v6561_v8 = vpop.f32.mrf.mxu1  ;;  %v2923_v6 = vpack.c.bf16 %v2809_v26, %v2808_v1 }
 0x461   :  { %v2928_v23 = vpack.c.bf16 %v2819_v10, %v2818_v42  ;;  %v2432_v25 = vadd.f32 %v6486_v63, %v6561_v8  ;;  %v2440_v8 = vadd.f32 %v6557_v28, %v6486_v63 }
 0x462   :  { %v6563_v61 = vpop.f32.mrf.mxu1 }
 0x463   :  { %v2822_v34 = vmax.f32 %v2432_v25, 0.0  ;;  %v2443_v37 = vadd.f32 %v6563_v61, %v6486_v63  ;;  %v2824_v40 = vmax.f32 %v2440_v8, 0.0 }
 0x464   :  { %v6567_v46 = vpop.f32.mrf.mxu1 }
 0x465   :  { %v2435_v30 = vadd.f32 %v6486_v63, %v6567_v46 }
 0x466   :  { %v6573_v56 = vpop.f32.mrf.mxu1  ;;  %5465 = vmatmul.mubr.bf16.gmra.mxu1 %v2917_v60  ;;  %v2813_v60 = vmax.f32 %v2395_v24, 0.0 }
 0x467   :  { %5468 = vmatprep.mubr.bf16.mxu1 %v2918_v50  ;;  %v2823_v5 = vmax.f32 %v2435_v30, 0.0 }
 0x468   :  { %v6577_v58 = vpop.f32.mrf.mxu1  ;;  %v2925_v44 = vpack.c.bf16 %v2813_v60, %v2812_v9 }
 0x469   :  { %v2930_v51 = vpack.c.bf16 %v2823_v5, %v2822_v34  ;;  %v2448_v19 = vadd.f32 %v6486_v63, %v6577_v58  ;;  %v2456_v58 = vadd.f32 %v6573_v56, %v6486_v63 }
 0x46a   :  { %v6579_v38 = vpop.f32.mrf.mxu1 }
 0x46b   :  { %v2826_v22 = vmax.f32 %v2448_v19, 0.0  ;;  %v2459_v27 = vadd.f32 %v6579_v38, %v6486_v63  ;;  %v2828_v54 = vmax.f32 %v2456_v58, 0.0 }
 0x46c   :  { %v6583_v55 = vpop.f32.mrf.mxu1 }
 0x46d   :  { %v2451_v26 = vadd.f32 %v6486_v63, %v6583_v55 }
 0x46e   :  { %v6589_v43 = vpop.f32.mrf.mxu1  ;;  %5469 = vmatmul.mubr.bf16.gmra.mxu1 %v2919_v21  ;;  %v2817_v21 = vmax.f32 %v2411_v13, 0.0 }
 0x46f   :  { %5472 = vmatprep.mubr.bf16.mxu1 %v2920_v41  ;;  %v2827_v61 = vmax.f32 %v2451_v26, 0.0 }
 0x470   :  { %v6593_v29 = vpop.f32.mrf.mxu1  ;;  %v2927_v0 = vpack.c.bf16 %v2817_v21, %v2816_v48 }
 0x471   :  { %v2932_v35 = vpack.c.bf16 %v2827_v61, %v2826_v22  ;;  %v2464_v45 = vadd.f32 %v6486_v63, %v6593_v29  ;;  %v2472_v29 = vadd.f32 %v6589_v43, %v6486_v63 }
 0x472   :  { %v6595_v31 = vpop.f32.mrf.mxu1 }
 0x473   :  { %v2830_v39 = vmax.f32 %v2464_v45, 0.0  ;;  %v2475_v7 = vadd.f32 %v6595_v31, %v6486_v63  ;;  %v2832_v30 = vmax.f32 %v2472_v29, 0.0 }
 0x474   :  { %v6599_v2 = vpop.f32.mrf.mxu1 }
 0x475   :  { %v2467_v60 = vadd.f32 %v6486_v63, %v6599_v2 }
 0x476   :  { %v6605_v33 = vpop.f32.mrf.mxu1  ;;  %5473 = vmatmul.mubr.bf16.gmra.mxu1 %v2921_v16  ;;  %v2821_v16 = vmax.f32 %v2427_v15, 0.0 }
 0x477   :  { %5476 = vmatprep.mubr.bf16.mxu1 %v2922_v32  ;;  %v2831_v38 = vmax.f32 %v2467_v60, 0.0 }
 0x478   :  { %v6609_v57 = vpop.f32.mrf.mxu1  ;;  %v2929_v46 = vpack.c.bf16 %v2821_v16, %v2820_v12 }
 0x479   :  { %v2934_v10 = vpack.c.bf16 %v2831_v38, %v2830_v39  ;;  %v2480_v42 = vadd.f32 %v6486_v63, %v6609_v57  ;;  %v2488_v57 = vadd.f32 %v6605_v33, %v6486_v63 }
 0x47a   :  { %v6611_v18 = vpop.f32.mrf.mxu1 }
 0x47b   :  { %v2834_v17 = vmax.f32 %v2480_v42, 0.0  ;;  %v2491_v25 = vadd.f32 %v6611_v18, %v6486_v63  ;;  %v2836_v26 = vmax.f32 %v2488_v57, 0.0 }
 0x47c   :  { %v6615_v4 = vpop.f32.mrf.mxu1 }
 0x47d   :  { %v2483_v21 = vadd.f32 %v6486_v63, %v6615_v4 }
 0x47e   :  { %v6621_v3 = vpop.f32.mrf.mxu1  ;;  %5477 = vmatmul.mubr.bf16.gmra.mxu1 %v2923_v6  ;;  %v2825_v6 = vmax.f32 %v2443_v37, 0.0 }
 0x47f   :  { %5480 = vmatprep.mubr.bf16.mxu1 %v2924_v14  ;;  %v2835_v31 = vmax.f32 %v2483_v21, 0.0 }
 0x480   :  { %v6625_v49 = vpop.f32.mrf.mxu1  ;;  %v2931_v55 = vpack.c.bf16 %v2825_v6, %v2824_v40 }
 0x481   :  { %v2936_v5 = vpack.c.bf16 %v2835_v31, %v2834_v17  ;;  %v2496_v34 = vadd.f32 %v6486_v63, %v6625_v49  ;;  %v2504_v49 = vadd.f32 %v6621_v3, %v6486_v63 }
 0x482   :  { %v6627_v50 = vpop.f32.mrf.mxu1 }
 0x483   :  { %v2838_v8 = vmax.f32 %v2496_v34, 0.0  ;;  %v2507_v19 = vadd.f32 %v6627_v50, %v6486_v63  ;;  %v2840_v60 = vmax.f32 %v2504_v49, 0.0 }
 0x484   :  { %v6631_v36 = vpop.f32.mrf.mxu1 }
 0x485   :  { %v2499_v16 = vadd.f32 %v6486_v63, %v6631_v36 }
 0x486   :  { %v6637_v47 = vpop.f32.mrf.mxu1  ;;  %5481 = vmatmul.mubr.bf16.gmra.mxu1 %v2925_v44  ;;  %v2829_v44 = vmax.f32 %v2459_v27, 0.0 }
 0x487   :  { %5484 = vmatprep.mubr.bf16.mxu1 %v2926_v59  ;;  %v2839_v18 = vmax.f32 %v2499_v16, 0.0 }
 0x488   :  { %v6641_v62 = vpop.f32.mrf.mxu1  ;;  %v2933_v2 = vpack.c.bf16 %v2829_v44, %v2828_v54 }
 0x489   :  { %v2938_v61 = vpack.c.bf16 %v2839_v18, %v2838_v8  ;;  %v2512_v22 = vadd.f32 %v6486_v63, %v6641_v62  ;;  %v2520_v62 = vadd.f32 %v6637_v47, %v6486_v63 }
 0x48a   :  { %v6643_v41 = vpop.f32.mrf.mxu1 }
 0x48b   :  { %v2842_v58 = vmax.f32 %v2512_v22, 0.0  ;;  %v2523_v45 = vadd.f32 %v6643_v41, %v6486_v63  ;;  %v2844_v21 = vmax.f32 %v2520_v62, 0.0 }
 0x48c   :  { %v6647_v52 = vpop.f32.mrf.mxu1 }
 0x48d   :  { %v2515_v6 = vadd.f32 %v6486_v63, %v6647_v52 }
 0x48e   :  { %v6653_v20 = vpop.f32.mrf.mxu1  ;;  %5485 = vmatmul.mubr.bf16.gmra.mxu1 %v2927_v0  ;;  %v2833_v0 = vmax.f32 %v2475_v7, 0.0 }
 0x48f   :  { %5488 = vmatprep.mubr.bf16.mxu1 %v2928_v23  ;;  %v2843_v50 = vmax.f32 %v2515_v6, 0.0 }
 0x490   :  { %v6657_v11 = vpop.f32.mrf.mxu1  ;;  %v2935_v4 = vpack.c.bf16 %v2833_v0, %v2832_v30 }
 0x491   :  { %v2940_v38 = vpack.c.bf16 %v2843_v50, %v2842_v58  ;;  %v2528_v39 = vadd.f32 %v6486_v63, %v6657_v11  ;;  %v2536_v11 = vadd.f32 %v6653_v20, %v6486_v63 }
 0x492   :  { %v6659_v32 = vpop.f32.mrf.mxu1 }
 0x493   :  { %v2846_v29 = vmax.f32 %v2528_v39, 0.0  ;;  %v2539_v42 = vadd.f32 %v6659_v32, %v6486_v63  ;;  %v2848_v16 = vmax.f32 %v2536_v11, 0.0 }
 0x494   :  { %v6663_v53 = vpop.f32.mrf.mxu1 }
 0x495   :  { %v2531_v44 = vadd.f32 %v6486_v63, %v6663_v53 }
 0x496   :  { %v6669_v1 = vpop.f32.mrf.mxu1  ;;  %5489 = vmatmul.mubr.bf16.gmra.mxu1 %v2929_v46  ;;  %v2837_v46 = vmax.f32 %v2491_v25, 0.0 }
 0x497   :  { %5492 = vmatprep.mubr.bf16.mxu1 %v2930_v51  ;;  %v2847_v41 = vmax.f32 %v2531_v44, 0.0 }
 0x498   :  { %v6673_v24 = vpop.f32.mrf.mxu1  ;;  %v2937_v36 = vpack.c.bf16 %v2837_v46, %v2836_v26 }
 0x499   :  { %v2942_v31 = vpack.c.bf16 %v2847_v41, %v2846_v29  ;;  %v2544_v17 = vadd.f32 %v6486_v63, %v6673_v24  ;;  %v2552_v24 = vadd.f32 %v6669_v1, %v6486_v63 }
 0x49a   :  { %v6675_v14 = vpop.f32.mrf.mxu1 }
 0x49b   :  { %v2850_v57 = vmax.f32 %v2544_v17, 0.0  ;;  %v2555_v34 = vadd.f32 %v6675_v14, %v6486_v63  ;;  %v2852_v6 = vmax.f32 %v2552_v24, 0.0 }
 0x49c   :  { %v6679_v28 = vpop.f32.mrf.mxu1 }
 0x49d   :  { %v2547_v0 = vadd.f32 %v6486_v63, %v6679_v28 }
 0x49e   :  { %v6685_v9 = vpop.f32.mrf.mxu1  ;;  %5493 = vmatmul.mubr.bf16.gmra.mxu1 %v2931_v55  ;;  %v2841_v55 = vmax.f32 %v2507_v19, 0.0 }
 0x49f   :  { %5496 = vmatprep.mubr.bf16.mxu1 %v2932_v35  ;;  %v2851_v32 = vmax.f32 %v2547_v0, 0.0 }
 0x4a0   :  { %v6689_v13 = vpop.f32.mrf.mxu1  ;;  %v2939_v52 = vpack.c.bf16 %v2841_v55, %v2840_v60 }
 0x4a1   :  { %v2944_v18 = vpack.c.bf16 %v2851_v32, %v2850_v57  ;;  %v2560_v8 = vadd.f32 %v6486_v63, %v6689_v13  ;;  %v2568_v13 = vadd.f32 %v6685_v9, %v6486_v63 }
 0x4a2   :  { %v6691_v59 = vpop.f32.mrf.mxu1 }
 0x4a3   :  { %v2854_v49 = vmax.f32 %v2560_v8, 0.0  ;;  %v2571_v22 = vadd.f32 %v6691_v59, %v6486_v63  ;;  %v2856_v44 = vmax.f32 %v2568_v13, 0.0 }
 0x4a4   :  { %v6695_v56 = vpop.f32.mrf.mxu1 }
 0x4a5   :  { %v2563_v46 = vadd.f32 %v6486_v63, %v6695_v56 }
 0x4a6   :  { %v6701_v48 = vpop.f32.mrf.mxu1  ;;  %5497 = vmatmul.mubr.bf16.gmra.mxu1 %v2933_v2  ;;  %v2845_v2 = vmax.f32 %v2523_v45, 0.0 }
 0x4a7   :  { %5500 = vmatprep.mubr.bf16.mxu1 %v2934_v10  ;;  %v2855_v14 = vmax.f32 %v2563_v46, 0.0 }
 0x4a8   :  { %v6705_v15 = vpop.f32.mrf.mxu1  ;;  %v2941_v53 = vpack.c.bf16 %v2845_v2, %v2844_v21 }
 0x4a9   :  { %v2946_v50 = vpack.c.bf16 %v2855_v14, %v2854_v49  ;;  %v2576_v58 = vadd.f32 %v6486_v63, %v6705_v15  ;;  %v2584_v15 = vadd.f32 %v6701_v48, %v6486_v63 }
 0x4aa   :  { %v6707_v23 = vpop.f32.mrf.mxu1 }
 0x4ab   :  { %v2858_v62 = vmax.f32 %v2576_v58, 0.0  ;;  %v2587_v39 = vadd.f32 %v6707_v23, %v6486_v63  ;;  %v2860_v0 = vmax.f32 %v2584_v15, 0.0 }
 0x4ac   :  { %v6711_v43 = vpop.f32.mrf.mxu1 }
 0x4ad   :  { %v2579_v55 = vadd.f32 %v6486_v63, %v6711_v43 }
 0x4ae   :  { %v6717_v12 = vpop.f32.mrf.mxu1  ;;  %5501 = vmatmul.mubr.bf16.gmra.mxu1 %v2935_v4  ;;  %v2849_v4 = vmax.f32 %v2539_v42, 0.0 }
 0x4af   :  { %5504 = vmatprep.mubr.bf16.mxu1 %v2936_v5  ;;  %v2859_v59 = vmax.f32 %v2579_v55, 0.0 }
 0x4b0   :  { %v6721_v37 = vpop.f32.mrf.mxu1  ;;  %v2943_v28 = vpack.c.bf16 %v2849_v4, %v2848_v16 }
 0x4b1   :  { %v2948_v41 = vpack.c.bf16 %v2859_v59, %v2858_v62  ;;  %v2592_v29 = vadd.f32 %v6486_v63, %v6721_v37  ;;  %v2600_v37 = vadd.f32 %v6717_v12, %v6486_v63 }
 0x4b2   :  { %v6723_v51 = vpop.f32.mrf.mxu1 }
 0x4b3   :  { %v2862_v11 = vmax.f32 %v2592_v29, 0.0  ;;  %v2603_v17 = vadd.f32 %v6723_v51, %v6486_v63  ;;  %v2864_v46 = vmax.f32 %v2600_v37, 0.0 }
 0x4b4   :  { %v6727_v33 = vpop.f32.mrf.mxu1 }
 0x4b5   :  { %v2595_v2 = vadd.f32 %v6486_v63, %v6727_v33 }
 0x4b6   :  { %v6733_v40 = vpop.f32.mrf.mxu1  ;;  %5505 = vmatmul.mubr.bf16.gmra.mxu1 %v2937_v36  ;;  %v2853_v36 = vmax.f32 %v2555_v34, 0.0 }
 0x4b7   :  { %5508 = vmatprep.mubr.bf16.mxu1 %v2938_v61  ;;  %v2863_v23 = vmax.f32 %v2595_v2, 0.0 }
 0x4b8   :  { %v6737_v27 = vpop.f32.mrf.mxu1  ;;  %v2945_v56 = vpack.c.bf16 %v2853_v36, %v2852_v6 }
 0x4b9   :  { %v2950_v32 = vpack.c.bf16 %v2863_v23, %v2862_v11  ;;  %v2608_v57 = vadd.f32 %v6486_v63, %v6737_v27  ;;  %v2616_v27 = vadd.f32 %v6733_v40, %v6486_v63 }
 0x4ba   :  { %v6739_v35 = vpop.f32.mrf.mxu1 }
 0x4bb   :  { %v2866_v24 = vmax.f32 %v2608_v57, 0.0  ;;  %v2619_v8 = vadd.f32 %v6739_v35, %v6486_v63  ;;  %v2868_v55 = vmax.f32 %v2616_v27, 0.0 }
 0x4bc   :  { %v6743_v3 = vpop.f32.mrf.mxu1 }
 0x4bd   :  { %v2611_v4 = vadd.f32 %v6486_v63, %v6743_v3 }
 0x4be   :  { %v6749_v54 = vpop.f32.mrf.mxu1  ;;  %5509 = vmatmul.mubr.bf16.gmra.mxu1 %v2939_v52  ;;  %v2857_v52 = vmax.f32 %v2571_v22, 0.0 }
 0x4bf   :  { %5512 = vmatprep.mubr.bf16.mxu1 %v2940_v38  ;;  %v2867_v51 = vmax.f32 %v2611_v4, 0.0 }
 0x4c0   :  { %v6753_v7 = vpop.f32.mrf.mxu1  ;;  %v2947_v43 = vpack.c.bf16 %v2857_v52, %v2856_v44 }
 0x4c1   :  { %v2952_v14 = vpack.c.bf16 %v2867_v51, %v2866_v24  ;;  %v2624_v49 = vadd.f32 %v6486_v63, %v6753_v7  ;;  %v2632_v7 = vadd.f32 %v6749_v54, %v6486_v63 }
 0x4c2   :  { %v6755_v10 = vpop.f32.mrf.mxu1 }
 0x4c3   :  { %v2870_v13 = vmax.f32 %v2624_v49, 0.0  ;;  %v2635_v58 = vadd.f32 %v6755_v10, %v6486_v63  ;;  %v2872_v2 = vmax.f32 %v2632_v7, 0.0 }
 0x4c4   :  { %v6759_v47 = vpop.f32.mrf.mxu1 }
 0x4c5   :  { %v2627_v36 = vadd.f32 %v6486_v63, %v6759_v47 }
 0x4c6   :  { %v6765_v30 = vpop.f32.mrf.mxu1  ;;  %5513 = vmatmul.mubr.bf16.gmra.mxu1 %v2941_v53  ;;  %v2861_v53 = vmax.f32 %v2587_v39, 0.0 }
 0x4c7   :  { %5516 = vmatprep.mubr.bf16.mxu1 %v2942_v31  ;;  %v2871_v35 = vmax.f32 %v2627_v36, 0.0 }
 0x4c8   :  { %v6769_v25 = vpop.f32.mrf.mxu1  ;;  %v2949_v33 = vpack.c.bf16 %v2861_v53, %v2860_v0 }
 0x4c9   :  { %v2954_v59 = vpack.c.bf16 %v2871_v35, %v2870_v13  ;;  %v2640_v62 = vadd.f32 %v6486_v63, %v6769_v25  ;;  %v2648_v25 = vadd.f32 %v6765_v30, %v6486_v63 }
 0x4ca   :  { %v6771_v5 = vpop.f32.mrf.mxu1 }
 0x4cb   :  { %v2874_v15 = vmax.f32 %v2640_v62, 0.0  ;;  %v2651_v29 = vadd.f32 %v6771_v5, %v6486_v63  ;;  %v2876_v4 = vmax.f32 %v2648_v25, 0.0 }
 0x4cc   :  { %v6775_v20 = vpop.f32.mrf.mxu1 }
 0x4cd   :  { %v2643_v52 = vadd.f32 %v6486_v63, %v6775_v20 }
 0x4ce   :  { %v6781_v26 = vpop.f32.mrf.mxu1  ;;  %5517 = vmatmul.mubr.bf16.gmra.mxu1 %v2943_v28  ;;  %v2865_v28 = vmax.f32 %v2603_v17, 0.0 }
 0x4cf   :  { %5520 = vmatprep.mubr.bf16.mxu1 %v2944_v18  ;;  %v2875_v10 = vmax.f32 %v2643_v52, 0.0 }
 0x4d0   :  { %v6785_v19 = vpop.f32.mrf.mxu1  ;;  %v2951_v3 = vpack.c.bf16 %v2865_v28, %v2864_v46 }
 0x4d1   :  { %v2956_v23 = vpack.c.bf16 %v2875_v10, %v2874_v15  ;;  %v2656_v11 = vadd.f32 %v6486_v63, %v6785_v19  ;;  %v2664_v19 = vadd.f32 %v6781_v26, %v6486_v63 }
 0x4d2   :  { %v6787_v61 = vpop.f32.mrf.mxu1 }
 0x4d3   :  { %v2878_v37 = vmax.f32 %v2656_v11, 0.0  ;;  %v2667_v57 = vadd.f32 %v6787_v61, %v6486_v63  ;;  %v2880_v36 = vmax.f32 %v2664_v19, 0.0 }
 0x4d4   :  { %v6791_v1 = vpop.f32.mrf.mxu1 }
 0x4d5   :  { %v2659_v53 = vadd.f32 %v6486_v63, %v6791_v1 }
 0x4d6   :  { %v6797_v60 = vpop.f32.mrf.mxu1  ;;  %5521 = vmatmul.mubr.bf16.gmra.mxu1 %v2945_v56  ;;  %v2869_v56 = vmax.f32 %v2619_v8, 0.0 }
 0x4d7   :  { %5524 = vmatprep.mubr.bf16.mxu1 %v2946_v50  ;;  %v2879_v5 = vmax.f32 %v2659_v53, 0.0 }
 0x4d8   :  { %v6801_v45 = vpop.f32.mrf.mxu1  ;;  %v2953_v47 = vpack.c.bf16 %v2869_v56, %v2868_v55 }
 0x4d9   :  { %v2958_v51 = vpack.c.bf16 %v2879_v5, %v2878_v37  ;;  %v2672_v24 = vadd.f32 %v6486_v63, %v6801_v45  ;;  %v2680_v45 = vadd.f32 %v6797_v60, %v6486_v63 }
 0x4da   :  { %v6803_v38 = vpop.f32.mrf.mxu1 }
 0x4db   :  { %v2882_v27 = vmax.f32 %v2672_v24, 0.0  ;;  %v2683_v49 = vadd.f32 %v6803_v38, %v6486_v63  ;;  %v6914_v38 = vld [vmem:[%s7097_s8] ss:$0 sm:$0xff]  ;;  %v2884_v52 = vmax.f32 %v2680_v45, 0.0 }
 0x4dc   :  { %v6807_v9 = vpop.f32.mrf.mxu1 }
 0x4dd   :  { %v2675_v28 = vadd.f32 %v6486_v63, %v6807_v9 }
 0x4de   :  { %v6813_v21 = vpop.f32.mrf.mxu1  ;;  %5525 = vmatmul.mubr.bf16.gmra.mxu1 %v2947_v43  ;;  %v2873_v43 = vmax.f32 %v2635_v58, 0.0 }
 0x4df   :  { %5528 = vmatprep.mubr.bf16.mxu1 %v2948_v41  ;;  %v2883_v61 = vmax.f32 %v2675_v28, 0.0 }
 0x4e0   :  { %v6817_v42 = vpop.f32.mrf.mxu1  ;;  %v2955_v20 = vpack.c.bf16 %v2873_v43, %v2872_v2 }
 0x4e1   :  { %v2960_v35 = vpack.c.bf16 %v2883_v61, %v2882_v27  ;;  %v2688_v55 = vadd.f32 %v6486_v63, %v6817_v42 }
 0x4e2   :  { %v6819_v31 = vpop.f32.mrf.mxu1 }
 0x4e3   :  { %v2699_v42 = vadd.f32 %v6819_v31, %v6486_v63 }
 0x4e4   :  { %v6823_v48 = vpop.f32.mrf.mxu1 }
 0x4e5   :  { %v2691_v26 = vadd.f32 %v6486_v63, %v6823_v48 }
 0x4e6   :  { %v6829_v16 = vpop.f32.mrf.mxu1  ;;  %5529 = vmatmul.mubr.bf16.gmra.mxu1 %v2949_v33  ;;  %v2877_v33 = vmax.f32 %v2651_v29, 0.0 }
 0x4e7   :  { %5532 = vmatprep.mubr.bf16.mxu1 %v2950_v32  ;;  %v2887_v58 = vmax.f32 %v2691_v26, 0.0  ;;  %v2712_v27 = vadd.f32 %v6829_v16, %v6486_v63 }
 0x4e8   :  { %v6833_v34 = vpop.f32.mrf.mxu1  ;;  %v2957_v1 = vpack.c.bf16 %v2877_v33, %v2876_v4  ;;  %v2889_v33 = vmax.f32 %v2699_v42, 0.0 }
 0x4e9   :  { %v2704_v11 = vadd.f32 %v6486_v63, %v6833_v34  ;;  %v2892_v45 = vmax.f32 %v2712_v27, 0.0 }
 0x4ea   :  { %v6835_v18 = vpop.f32.mrf.mxu1 }
 0x4ec   :  { %v6839_v12 = vpop.f32.mrf.mxu1 }
 0x4ed   :  { %v2707_v15 = vadd.f32 %v6486_v63, %v6839_v12 }
 0x4ee   :  { %v6845_v6 = vpop.f32.mrf.mxu1  ;;  %5533 = vmatmul.mubr.bf16.gmra.mxu1 %v2951_v3  ;;  %v2881_v3 = vmax.f32 %v2667_v57, 0.0 }
 0x4ef   :  { %5536 = vmatprep.mubr.bf16.mxu1 %v2952_v14  ;;  %v2891_v4 = vmax.f32 %v2707_v15, 0.0 }
 0x4f0   :  { %v6849_v22 = vpop.f32.mrf.mxu1  ;;  %v2959_v9 = vpack.c.bf16 %v2881_v3, %v2880_v36 }
 0x4f2   :  { %v6851_v50 = vpop.f32.mrf.mxu1 }
 0x4f4   :  { %v6855_v40 = vpop.f32.mrf.mxu1 }
 0x4f5   :  { %v2723_v34 = vadd.f32 %v6486_v63, %v6855_v40 }
 0x4f6   :  { %v6861_v44 = vpop.f32.mrf.mxu1  ;;  %5537 = vmatmul.mubr.bf16.gmra.mxu1 %v2953_v47  ;;  %v2885_v47 = vmax.f32 %v2683_v49, 0.0 }
 0x4f7   :  { %5540 = vmatprep.mubr.bf16.mxu1 %v2954_v59  ;;  %v2886_v59 = vmax.f32 %v2688_v55, 0.0  ;;  %v2895_v40 = vmax.f32 %v2723_v34, 0.0 }
 0x4f8   :  { %v6865_v39 = vpop.f32.mrf.mxu1  ;;  %v2961_v43 = vpack.c.bf16 %v2885_v47, %v2884_v52 }
 0x4f9   :  { %v2962_v2 = vpack.c.bf16 %v2887_v58, %v2886_v59 }
 0x4fa   :  { %v6867_v41 = vpop.f32.mrf.mxu1 }
 0x4fc   :  { %v6871_v54 = vpop.f32.mrf.mxu1 }
 0x4fd   :  { %v2739_v59 = vadd.f32 %v6486_v63, %v6871_v54 }
 0x4fe   :  { %v6877_v0 = vpop.f32.mrf.mxu1  ;;  %5541 = vmatmul.mubr.bf16.gmra.mxu1 %v2955_v20 }
 0x4ff   :  { %5544 = vmatprep.mubr.bf16.mxu1 %v2956_v23  ;;  %v2696_v23 = vadd.f32 %v6813_v21, %v6486_v63 }
 0x500   :  { %v6881_v17 = vpop.f32.mrf.mxu1 }
 0x501   :  { %v2888_v12 = vmax.f32 %v2696_v23, 0.0 }
 0x502   :  { %v6883_v32 = vpop.f32.mrf.mxu1 }
 0x503   :  { %v2963_v21 = vpack.c.bf16 %v2889_v33, %v2888_v12 }
 0x504   :  { %v6887_v30 = vpop.f32.mrf.mxu1 }
 0x506   :  { %v6893_v46 = vpop.f32.mrf.mxu1  ;;  %5545 = vmatmul.mubr.bf16.gmra.mxu1 %v2957_v1  ;;  %v2890_v1 = vmax.f32 %v2704_v11, 0.0  ;;  %v2747_v11 = vadd.f32 %v6867_v41, %v6486_v63 }
 0x507   :  { %5548 = vmatprep.mubr.bf16.mxu1 %v2958_v51  ;;  %v2715_v51 = vadd.f32 %v6835_v18, %v6486_v63 }
 0x508   :  { %v6897_v8 = vpop.f32.mrf.mxu1  ;;  %v2964_v36 = vpack.c.bf16 %v2891_v4, %v2890_v1 }
 0x509   :  { %v2893_v26 = vmax.f32 %v2715_v51, 0.0 }
 0x50a   :  { %v6899_v14 = vpop.f32.mrf.mxu1 }
 0x50b   :  { %v2965_v16 = vpack.c.bf16 %v2893_v26, %v2892_v45 }
 0x50c   :  { %v6905_v56 = vpop.f32.mrf.mxu1 }
 0x50e   :  { %v5454_v13 = vpop.f32.mrf.mxu1  ;;  %5549 = vmatmul.mubr.bf16.gmra.mxu1 %v2959_v9  ;;  %v2720_v9 = vadd.f32 %v6486_v63, %v6849_v22  ;;  %v2731_v22 = vadd.f32 %v6851_v50, %v6486_v63 }
 0x50f   :  { %5552 = vmatprep.mubr.bf16.mxu1 %v2960_v35  ;;  %v3088_v62 = vadd.f32 %v5454_v13, %v6914_v38 }
 0x510   :  { %v3079_v48 = vpop.f32.mrf.mxu1  ;;  %v2894_v55 = vmax.f32 %v2720_v9, 0.0 }
 0x511   :  { %v3080_v20 = vadd.f32 %v6914_v38, %v3079_v48 }
 0x512   :  { %v5455_v7 = vpop.f32.mrf.mxu1  ;;  %v2966_v52 = vpack.c.bf16 %v2895_v40, %v2894_v55 }
 0x513   :  { %v3091_v60 = vadd.f32 %v5455_v7, %v6914_v38 }
 0x514   :  { %v3082_v10 = vpop.f32.mrf.mxu1 }
 0x515   :  { %v4557_v29 = vpack.c.bf16 %v3091_v60, %v3088_v62  ;;  %v3083_v53 = vadd.f32 %v6914_v38, %v3082_v10  ;;  %v2736_v10 = vadd.f32 %v6486_v63, %v6865_v39  ;;  %v2755_v39 = vadd.f32 %v6486_v63, %v6887_v30 }
 0x516   :  { %v5458_v25 = vpop.f32.mrf.mxu1  ;;  %5553 = vmatmul.mubr.bf16.gmra.mxu1 %v2961_v43  ;;  %v2728_v43 = vadd.f32 %v6845_v6, %v6486_v63  ;;  %v2901_v63 = vmax.f32 %v2747_v11, 0.0 }
 0x517   :  { %4869 = vst [vmem:[#allocation11 + $0x8] sm:$0xff] %v4557_v29   ;;  %v4552_v31 = vpack.c.bf16 %v3083_v53, %v3080_v20  ;;  %5556 = vmatprep.mubr.bf16.mxu1 %v2962_v2  ;;  %v3104_v57 = vadd.f32 %v5458_v25, %v6914_v38  ;;  %v2897_v2 = vmax.f32 %v2731_v22, 0.0  ;;  %v2899_v20 = vmax.f32 %v2739_v59, 0.0 }
 0x518   :  { %v3095_v5 = vpop.f32.mrf.mxu1  ;;  %v2896_v54 = vmax.f32 %v2728_v43, 0.0  ;;  %v2898_v53 = vmax.f32 %v2736_v10, 0.0  ;;  %v2903_v30 = vmax.f32 %v2755_v39, 0.0 }
 0x519   :  { %4553 = vst [vmem:[#allocation11] sm:$0xff] %v4552_v31   ;;  %v3096_v24 = vadd.f32 %v6914_v38, %v3095_v5 }
 0x51a   :  { %v5459_v37 = vpop.f32.mrf.mxu1  ;;  %v2967_v6 = vpack.c.bf16 %v2897_v2, %v2896_v54  ;;  %v2968_v12 = vpack.c.bf16 %v2899_v20, %v2898_v53 }
 0x51b   :  { %v3107_v28 = vadd.f32 %v5459_v37, %v6914_v38  ;;  %v5649_v37 = vld [vmem:[%s7095_s6] ss:$0 sm:$0xff] }
 0x51c   :  { %v3098_v19 = vpop.f32.mrf.mxu1  ;;  %v2744_v1 = vadd.f32 %v5649_v37, %v6861_v44  ;;  %v2763_v44 = vadd.f32 %v5649_v37, %v6883_v32  ;;  %v2771_v27 = vadd.f32 %v5649_v37, %v6905_v56  ;;  %v2760_v26 = vadd.f32 %v5649_v37, %v6877_v0 }
 0x51d   :  { %v4567_v3 = vpack.c.bf16 %v3107_v28, %v3104_v57  ;;  %v3099_v61 = vadd.f32 %v6914_v38, %v3098_v19  ;;  %v2752_v57 = vadd.f32 %v5649_v37, %v6881_v17  ;;  %v2779_v0 = vadd.f32 %v5649_v37, %v6899_v14 }
 0x51e   :  { %v5462_v49 = vpop.f32.mrf.mxu1  ;;  %5557 = vmatmul.mubr.bf16.gmra.mxu1 %v2963_v21  ;;  %v2900_v51 = vmax.f32 %v2744_v1, 0.0  ;;  %v2905_v55 = vmax.f32 %v2763_v44, 0.0 }
 0x51f   :  { %4871 = vst [vmem:[#allocation11 + $0x18] sm:$0xff] %v4567_v3   ;;  %v4562_v18 = vpack.c.bf16 %v3099_v61, %v3096_v24  ;;  %5560 = vmatprep.mubr.bf16.mxu1 %v2964_v36  ;;  %v3120_v47 = vadd.f32 %v5462_v49, %v6914_v38  ;;  %v2902_v34 = vmax.f32 %v2752_v57, 0.0  ;;  %v2909_v10 = vmax.f32 %v2779_v0, 0.0 }
 0x520   :  { %v3111_v35 = vpop.f32.mrf.mxu1  ;;  %v2969_v61 = vpack.c.bf16 %v2901_v63, %v2900_v51 }
 0x521   :  { %4870 = vst [vmem:[#allocation11 + $0x10] sm:$0xff] %v4562_v18   ;;  %v3112_v7 = vadd.f32 %v6914_v38, %v3111_v35  ;;  %v2970_v36 = vpack.c.bf16 %v2903_v30, %v2902_v34  ;;  %v2768_v35 = vadd.f32 %v5649_v37, %v6897_v8 }
 0x522   :  { %v5463_v13 = vpop.f32.mrf.mxu1 }
 0x523   :  { %v3123_v58 = vadd.f32 %v5463_v13, %v6914_v38  ;;  %v2907_v13 = vmax.f32 %v2771_v27, 0.0 }
 0x524   :  { %v3114_v48 = vpop.f32.mrf.mxu1 }
 0x525   :  { %v4577_v62 = vpack.c.bf16 %v3123_v58, %v3120_v47  ;;  %v3115_v60 = vadd.f32 %v6914_v38, %v3114_v48  ;;  %v2904_v47 = vmax.f32 %v2760_v26, 0.0  ;;  %v2906_v58 = vmax.f32 %v2768_v35, 0.0 }
 0x526   :  { %v5466_v42 = vpop.f32.mrf.mxu1  ;;  %5561 = vmatmul.mubr.bf16.gmra.mxu1 %v2965_v16 }
 0x527   :  { %4873 = vst [vmem:[#allocation11 + $0x28] sm:$0xff] %v4577_v62   ;;  %v4572_v50 = vpack.c.bf16 %v3115_v60, %v3112_v7  ;;  %5564 = vmatprep.mubr.bf16.mxu1 %v2966_v52  ;;  %v3136_v23 = vadd.f32 %v5466_v42, %v6914_v38  ;;  %v2971_v48 = vpack.c.bf16 %v2905_v55, %v2904_v47 }
 0x528   :  { %v3127_v15 = vpop.f32.mrf.mxu1  ;;  %v2972_v62 = vpack.c.bf16 %v2907_v13, %v2906_v58  ;;  %v2776_v60 = vadd.f32 %v5649_v37, %v6893_v46 }
 0x529   :  { %4872 = vst [vmem:[#allocation11 + $0x20] sm:$0xff] %v4572_v50   ;;  %v3128_v33 = vadd.f32 %v6914_v38, %v3127_v15 }
 0x52a   :  { %v5467_v29 = vpop.f32.mrf.mxu1  ;;  %v2908_v2 = vmax.f32 %v2776_v60, 0.0 }
 0x52b   :  { %v3139_v25 = vadd.f32 %v5467_v29, %v6914_v38 }
 0x52c   :  { %v3130_v31 = vpop.f32.mrf.mxu1  ;;  %v2973_v54 = vpack.c.bf16 %v2909_v10, %v2908_v2 }
 0x52d   :  { %v4587_v5 = vpack.c.bf16 %v3139_v25, %v3136_v23  ;;  %v3131_v4 = vadd.f32 %v6914_v38, %v3130_v31 }
 0x52e   :  { %v5470_v28 = vpop.f32.mrf.mxu1  ;;  %5565 = vmatmul.mubr.bf16.gmra.mxu1 %v2967_v6 }
 0x52f   :  { %4875 = vst [vmem:[#allocation11 + $0x38] sm:$0xff] %v4587_v5   ;;  %v4582_v41 = vpack.c.bf16 %v3131_v4, %v3128_v33  ;;  %5568 = vmatprep.mubr.bf16.mxu1 %v2968_v12  ;;  %v3152_v24 = vadd.f32 %v5470_v28, %v6914_v38 }
 0x530   :  { %v3143_v21 = vpop.f32.mrf.mxu1 }
 0x531   :  { %4874 = vst [vmem:[#allocation11 + $0x30] sm:$0xff] %v4582_v41   ;;  %v3144_v9 = vadd.f32 %v6914_v38, %v3143_v21 }
 0x532   :  { %v5471_v19 = vpop.f32.mrf.mxu1 }
 0x533   :  { %v3155_v3 = vadd.f32 %v5471_v19, %v6914_v38 }
 0x534   :  { %v3146_v17 = vpop.f32.mrf.mxu1 }
 0x535   :  { %v4597_v49 = vpack.c.bf16 %v3155_v3, %v3152_v24  ;;  %v3147_v18 = vadd.f32 %v6914_v38, %v3146_v17 }
 0x536   :  { %v5474_v40 = vpop.f32.mrf.mxu1  ;;  %5569 = vmatmul.mubr.bf16.gmra.mxu1 %v2969_v61 }
 0x537   :  { %4877 = vst [vmem:[#allocation11 + $0x48] sm:$0xff] %v4597_v49   ;;  %v4592_v45 = vpack.c.bf16 %v3147_v18, %v3144_v9  ;;  %5572 = vmatprep.mubr.bf16.mxu1 %v2970_v36  ;;  %v3168_v16 = vadd.f32 %v5474_v40, %v6914_v38 }
 0x538   :  { %v3159_v32 = vpop.f32.mrf.mxu1 }
 0x539   :  { %4876 = vst [vmem:[#allocation11 + $0x40] sm:$0xff] %v4592_v45   ;;  %v3160_v8 = vadd.f32 %v6914_v38, %v3159_v32 }
 0x53a   :  { %v5475_v56 = vpop.f32.mrf.mxu1 }
 0x53b   :  { %v3171_v22 = vadd.f32 %v5475_v56, %v6914_v38 }
 0x53c   :  { %v3162_v52 = vpop.f32.mrf.mxu1 }
 0x53d   :  { %v4607_v59 = vpack.c.bf16 %v3171_v22, %v3168_v16  ;;  %v3163_v7 = vadd.f32 %v6914_v38, %v3162_v52 }
 0x53e   :  { %v5478_v43 = vpop.f32.mrf.mxu1  ;;  %5573 = vmatmul.mubr.bf16.gmra.mxu1 %v2971_v48 }
 0x53f   :  { %4879 = vst [vmem:[#allocation11 + $0x58] sm:$0xff] %v4607_v59   ;;  %v4602_v42 = vpack.c.bf16 %v3163_v7, %v3160_v8  ;;  %5576 = vmatprep.mubr.bf16.mxu1 %v2972_v62  ;;  %v3184_v14 = vadd.f32 %v5478_v43, %v6914_v38 }
 0x540   :  { %v3175_v50 = vpop.f32.mrf.mxu1 }
 0x541   :  { %4878 = vst [vmem:[#allocation11 + $0x50] sm:$0xff] %v4602_v42   ;;  %v3176_v53 = vadd.f32 %v6914_v38, %v3175_v50 }
 0x542   :  { %v5479_v15 = vpop.f32.mrf.mxu1 }
 0x543   :  { %v3187_v20 = vadd.f32 %v5479_v15, %v6914_v38 }
 0x544   :  { %v3178_v29 = vpop.f32.mrf.mxu1 }
 0x545   :  { %v4617_v23 = vpack.c.bf16 %v3187_v20, %v3184_v14  ;;  %v3179_v46 = vadd.f32 %v6914_v38, %v3178_v29 }
 0x546   :  { %v5482_v25 = vpop.f32.mrf.mxu1  ;;  %5577 = vmatmul.mubr.bf16.gmra.mxu1 %v2973_v54 }
 0x547   :  { %4881 = vst [vmem:[#allocation11 + $0x68] sm:$0xff] %v4617_v23   ;;  %v4612_v6 = vpack.c.bf16 %v3179_v46, %v3176_v53  ;;  %v3200_v31 = vadd.f32 %v5482_v25, %v6914_v38 }
 0x548   :  { %v3191_v11 = vpop.f32.mrf.mxu1 }
 0x549   :  { %4880 = vst [vmem:[#allocation11 + $0x60] sm:$0xff] %v4612_v6   ;;  %v3192_v4 = vadd.f32 %v6914_v38, %v3191_v11 }
 0x54a   :  { %v5483_v39 = vpop.f32.mrf.mxu1 }
 0x54b   :  { %v3203_v33 = vadd.f32 %v5483_v39, %v6914_v38 }
 0x54c   :  { %v3194_v5 = vpop.f32.mrf.mxu1 }
 0x54d   :  { %v4627_v12 = vpack.c.bf16 %v3203_v33, %v3200_v31  ;;  %v3195_v37 = vadd.f32 %v6914_v38, %v3194_v5 }
 0x54e   :  { %v5486_v1 = vpop.f32.mrf.mxu1 }
 0x54f   :  { %4883 = vst [vmem:[#allocation11 + $0x78] sm:$0xff] %v4627_v12   ;;  %v4622_v57 = vpack.c.bf16 %v3195_v37, %v3192_v4  ;;  %v3216_v63 = vadd.f32 %v5486_v1, %v6914_v38 }
 0x550   :  { %v3207_v28 = vpop.f32.mrf.mxu1 }
 0x551   :  { %4882 = vst [vmem:[#allocation11 + $0x70] sm:$0xff] %v4622_v57   ;;  %v3208_v51 = vadd.f32 %v6914_v38, %v3207_v28 }
 0x552   :  { %v5487_v41 = vpop.f32.mrf.mxu1 }
 0x553   :  { %v3219_v30 = vadd.f32 %v5487_v41, %v6914_v38 }
 0x554   :  { %v3210_v21 = vpop.f32.mrf.mxu1 }
 0x555   :  { %v4637_v34 = vpack.c.bf16 %v3219_v30, %v3216_v63  ;;  %v3211_v19 = vadd.f32 %v6914_v38, %v3210_v21 }
 0x556   :  { %v5490_v24 = vpop.f32.mrf.mxu1 }
 0x557   :  { %4885 = vst [vmem:[#allocation11 + $0x88] sm:$0xff] %v4637_v34   ;;  %v4632_v3 = vpack.c.bf16 %v3211_v19, %v3208_v51  ;;  %v3232_v17 = vadd.f32 %v5490_v24, %v6914_v38 }
 0x558   :  { %v3223_v61 = vpop.f32.mrf.mxu1 }
 0x559   :  { %4884 = vst [vmem:[#allocation11 + $0x80] sm:$0xff] %v4632_v3   ;;  %v3224_v9 = vadd.f32 %v6914_v38, %v3223_v61 }
 0x55a   :  { %v5491_v44 = vpop.f32.mrf.mxu1 }
 0x55b   :  { %v3235_v36 = vadd.f32 %v5491_v44, %v6914_v38 }
 0x55c   :  { %v3226_v27 = vpop.f32.mrf.mxu1 }
 0x55d   :  { %v4647_v49 = vpack.c.bf16 %v3235_v36, %v3232_v17  ;;  %v3227_v18 = vadd.f32 %v6914_v38, %v3226_v27 }
 0x55e   :  { %v5494_v26 = vpop.f32.mrf.mxu1 }
 0x55f   :  { %4887 = vst [vmem:[#allocation11 + $0x98] sm:$0xff] %v4647_v49   ;;  %v4642_v40 = vpack.c.bf16 %v3227_v18, %v3224_v9  ;;  %v3248_v55 = vadd.f32 %v5494_v26, %v6914_v38 }
 0x560   :  { %v3239_v35 = vpop.f32.mrf.mxu1 }
 0x561   :  { %4886 = vst [vmem:[#allocation11 + $0x90] sm:$0xff] %v4642_v40   ;;  %v3240_v47 = vadd.f32 %v6914_v38, %v3239_v35 }
 0x562   :  { %v5495_v45 = vpop.f32.mrf.mxu1 }
 0x563   :  { %v3251_v32 = vadd.f32 %v5495_v45, %v6914_v38 }
 0x564   :  { %v3242_v13 = vpop.f32.mrf.mxu1 }
 0x565   :  { %v4657_v56 = vpack.c.bf16 %v3251_v32, %v3248_v55  ;;  %v3243_v58 = vadd.f32 %v6914_v38, %v3242_v13 }
 0x566   :  { %v5498_v16 = vpop.f32.mrf.mxu1 }
 0x567   :  { %4889 = vst [vmem:[#allocation11 + $0xa8] sm:$0xff] %v4657_v56   ;;  %v4652_v22 = vpack.c.bf16 %v3243_v58, %v3240_v47  ;;  %v3264_v52 = vadd.f32 %v5498_v16, %v6914_v38 }
 0x568   :  { %v3255_v48 = vpop.f32.mrf.mxu1 }
 0x569   :  { %4888 = vst [vmem:[#allocation11 + $0xa0] sm:$0xff] %v4652_v22   ;;  %v3256_v7 = vadd.f32 %v6914_v38, %v3255_v48 }
 0x56a   :  { %v5499_v0 = vpop.f32.mrf.mxu1 }
 0x56b   :  { %v3267_v8 = vadd.f32 %v5499_v0, %v6914_v38 }
 0x56c   :  { %v3258_v59 = vpop.f32.mrf.mxu1 }
 0x56d   :  { %v4667_v62 = vpack.c.bf16 %v3267_v8, %v3264_v52  ;;  %v3259_v60 = vadd.f32 %v6914_v38, %v3258_v59 }
 0x56e   :  { %v5502_v43 = vpop.f32.mrf.mxu1 }
 0x56f   :  { %4891 = vst [vmem:[#allocation11 + $0xb8] sm:$0xff] %v4667_v62   ;;  %v4662_v42 = vpack.c.bf16 %v3259_v60, %v3256_v7  ;;  %v3280_v2 = vadd.f32 %v5502_v43, %v6914_v38 }
 0x570   :  { %v3271_v10 = vpop.f32.mrf.mxu1 }
 0x571   :  { %4890 = vst [vmem:[#allocation11 + $0xb0] sm:$0xff] %v4662_v42   ;;  %v3272_v20 = vadd.f32 %v6914_v38, %v3271_v10 }
 0x572   :  { %v5503_v50 = vpop.f32.mrf.mxu1 }
 0x573   :  { %v3283_v15 = vadd.f32 %v5503_v50, %v6914_v38 }
 0x574   :  { %v3274_v14 = vpop.f32.mrf.mxu1 }
 0x575   :  { %v4677_v54 = vpack.c.bf16 %v3283_v15, %v3280_v2  ;;  %v3275_v29 = vadd.f32 %v6914_v38, %v3274_v14 }
 0x576   :  { %v5506_v53 = vpop.f32.mrf.mxu1 }
 0x577   :  { %4893 = vst [vmem:[#allocation11 + $0xc8] sm:$0xff] %v4677_v54   ;;  %v4672_v23 = vpack.c.bf16 %v3275_v29, %v3272_v20  ;;  %v3296_v6 = vadd.f32 %v5506_v53, %v6914_v38 }
 0x578   :  { %v3287_v46 = vpop.f32.mrf.mxu1 }
 0x579   :  { %4892 = vst [vmem:[#allocation11 + $0xc0] sm:$0xff] %v4672_v23   ;;  %v3288_v31 = vadd.f32 %v6914_v38, %v3287_v46 }
 0x57a   :  { %v5507_v25 = vpop.f32.mrf.mxu1 }
 0x57b   :  { %v3299_v11 = vadd.f32 %v5507_v25, %v6914_v38 }
 0x57c   :  { %v3290_v39 = vpop.f32.mrf.mxu1 }
 0x57d   :  { %v4687_v33 = vpack.c.bf16 %v3299_v11, %v3296_v6  ;;  %v3291_v5 = vadd.f32 %v6914_v38, %v3290_v39 }
 0x57e   :  { %v5510_v4 = vpop.f32.mrf.mxu1 }
 0x57f   :  { %4895 = vst [vmem:[#allocation11 + $0xd8] sm:$0xff] %v4687_v33   ;;  %v4682_v12 = vpack.c.bf16 %v3291_v5, %v3288_v31  ;;  %v3312_v57 = vadd.f32 %v5510_v4, %v6914_v38 }
 0x580   :  { %v3303_v37 = vpop.f32.mrf.mxu1 }
 0x581   :  { %4894 = vst [vmem:[#allocation11 + $0xd0] sm:$0xff] %v4682_v12   ;;  %v3304_v63 = vadd.f32 %v6914_v38, %v3303_v37 }
 0x582   :  { %v5511_v1 = vpop.f32.mrf.mxu1 }
 0x583   :  { %v3315_v28 = vadd.f32 %v5511_v1, %v6914_v38 }
 0x584   :  { %v3306_v41 = vpop.f32.mrf.mxu1 }
 0x585   :  { %v4697_v30 = vpack.c.bf16 %v3315_v28, %v3312_v57  ;;  %v3307_v21 = vadd.f32 %v6914_v38, %v3306_v41 }
 0x586   :  { %v5514_v51 = vpop.f32.mrf.mxu1 }
 0x587   :  { %4897 = vst [vmem:[#allocation11 + $0xe8] sm:$0xff] %v4697_v30   ;;  %v4692_v34 = vpack.c.bf16 %v3307_v21, %v3304_v63  ;;  %v3328_v3 = vadd.f32 %v5514_v51, %v6914_v38 }
 0x588   :  { %v3319_v19 = vpop.f32.mrf.mxu1 }
 0x589   :  { %4896 = vst [vmem:[#allocation11 + $0xe0] sm:$0xff] %v4692_v34   ;;  %v3320_v17 = vadd.f32 %v6914_v38, %v3319_v19 }
 0x58a   :  { %v5515_v24 = vpop.f32.mrf.mxu1 }
 0x58b   :  { %v3331_v61 = vadd.f32 %v5515_v24, %v6914_v38 }
 0x58c   :  { %v3322_v44 = vpop.f32.mrf.mxu1 }
 0x58d   :  { %v4707_v36 = vpack.c.bf16 %v3331_v61, %v3328_v3  ;;  %v3323_v27 = vadd.f32 %v6914_v38, %v3322_v44 }
 0x58e   :  { %v5518_v9 = vpop.f32.mrf.mxu1 }
 0x58f   :  { %4899 = vst [vmem:[#allocation11 + $0xf8] sm:$0xff] %v4707_v36   ;;  %v4702_v49 = vpack.c.bf16 %v3323_v27, %v3320_v17  ;;  %v3344_v40 = vadd.f32 %v5518_v9, %v6914_v38 }
 0x590   :  { %v3335_v18 = vpop.f32.mrf.mxu1 }
 0x591   :  { %4898 = vst [vmem:[#allocation11 + $0xf0] sm:$0xff] %v4702_v49   ;;  %v3336_v55 = vadd.f32 %v6914_v38, %v3335_v18 }
 0x592   :  { %v5519_v26 = vpop.f32.mrf.mxu1 }
 0x593   :  { %v3347_v35 = vadd.f32 %v5519_v26, %v6914_v38 }
 0x594   :  { %v3338_v45 = vpop.f32.mrf.mxu1 }
 0x595   :  { %v4717_v32 = vpack.c.bf16 %v3347_v35, %v3344_v40  ;;  %v3339_v13 = vadd.f32 %v6914_v38, %v3338_v45 }
 0x596   :  { %v5522_v47 = vpop.f32.mrf.mxu1 }
 0x597   :  { %4901 = vst [vmem:[#allocation11 + $0x108] sm:$0xff] %v4717_v32   ;;  %v4712_v56 = vpack.c.bf16 %v3339_v13, %v3336_v55  ;;  %v3360_v22 = vadd.f32 %v5522_v47, %v6914_v38 }
 0x598   :  { %v3351_v58 = vpop.f32.mrf.mxu1 }
 0x599   :  { %4900 = vst [vmem:[#allocation11 + $0x100] sm:$0xff] %v4712_v56   ;;  %v3352_v52 = vadd.f32 %v6914_v38, %v3351_v58 }
 0x59a   :  { %v5523_v16 = vpop.f32.mrf.mxu1 }
 0x59b   :  { %v3363_v48 = vadd.f32 %v5523_v16, %v6914_v38 }
 0x59c   :  { %v3354_v0 = vpop.f32.mrf.mxu1 }
 0x59d   :  { %v4727_v8 = vpack.c.bf16 %v3363_v48, %v3360_v22  ;;  %v3355_v59 = vadd.f32 %v6914_v38, %v3354_v0 }
 0x59e   :  { %v5526_v7 = vpop.f32.mrf.mxu1 }
 0x59f   :  { %4903 = vst [vmem:[#allocation11 + $0x118] sm:$0xff] %v4727_v8   ;;  %v4722_v62 = vpack.c.bf16 %v3355_v59, %v3352_v52  ;;  %v3376_v42 = vadd.f32 %v5526_v7, %v6914_v38 }
 0x5a0   :  { %v3367_v60 = vpop.f32.mrf.mxu1 }
 0x5a1   :  { %4902 = vst [vmem:[#allocation11 + $0x110] sm:$0xff] %v4722_v62   ;;  %v3368_v2 = vadd.f32 %v6914_v38, %v3367_v60 }
 0x5a2   :  { %v5527_v43 = vpop.f32.mrf.mxu1 }
 0x5a3   :  { %v3379_v10 = vadd.f32 %v5527_v43, %v6914_v38 }
 0x5a4   :  { %v3370_v50 = vpop.f32.mrf.mxu1 }
 0x5a5   :  { %v4737_v15 = vpack.c.bf16 %v3379_v10, %v3376_v42  ;;  %v3371_v14 = vadd.f32 %v6914_v38, %v3370_v50 }
 0x5a6   :  { %v5530_v20 = vpop.f32.mrf.mxu1 }
 0x5a7   :  { %4905 = vst [vmem:[#allocation11 + $0x128] sm:$0xff] %v4737_v15   ;;  %v4732_v54 = vpack.c.bf16 %v3371_v14, %v3368_v2  ;;  %v3392_v23 = vadd.f32 %v5530_v20, %v6914_v38 }
 0x5a8   :  { %v3383_v29 = vpop.f32.mrf.mxu1 }
 0x5a9   :  { %4904 = vst [vmem:[#allocation11 + $0x120] sm:$0xff] %v4732_v54   ;;  %v3384_v6 = vadd.f32 %v6914_v38, %v3383_v29 }
 0x5aa   :  { %v5531_v53 = vpop.f32.mrf.mxu1 }
 0x5ab   :  { %v3395_v46 = vadd.f32 %v5531_v53, %v6914_v38 }
 0x5ac   :  { %v3386_v25 = vpop.f32.mrf.mxu1 }
 0x5ad   :  { %v4747_v11 = vpack.c.bf16 %v3395_v46, %v3392_v23  ;;  %v3387_v39 = vadd.f32 %v6914_v38, %v3386_v25 }
 0x5ae   :  { %v5534_v31 = vpop.f32.mrf.mxu1 }
 0x5af   :  { %4907 = vst [vmem:[#allocation11 + $0x138] sm:$0xff] %v4747_v11   ;;  %v4742_v33 = vpack.c.bf16 %v3387_v39, %v3384_v6  ;;  %v3408_v12 = vadd.f32 %v5534_v31, %v6914_v38 }
 0x5b0   :  { %v3399_v5 = vpop.f32.mrf.mxu1 }
 0x5b1   :  { %4906 = vst [vmem:[#allocation11 + $0x130] sm:$0xff] %v4742_v33   ;;  %v3400_v57 = vadd.f32 %v6914_v38, %v3399_v5 }
 0x5b2   :  { %v5535_v4 = vpop.f32.mrf.mxu1 }
 0x5b3   :  { %v3411_v37 = vadd.f32 %v5535_v4, %v6914_v38 }
 0x5b4   :  { %v3402_v1 = vpop.f32.mrf.mxu1 }
 0x5b5   :  { %v4757_v28 = vpack.c.bf16 %v3411_v37, %v3408_v12  ;;  %v3403_v41 = vadd.f32 %v6914_v38, %v3402_v1 }
 0x5b6   :  { %v5538_v63 = vpop.f32.mrf.mxu1 }
 0x5b7   :  { %4909 = vst [vmem:[#allocation11 + $0x148] sm:$0xff] %v4757_v28   ;;  %v4752_v30 = vpack.c.bf16 %v3403_v41, %v3400_v57  ;;  %v3424_v34 = vadd.f32 %v5538_v63, %v6914_v38 }
 0x5b8   :  { %v3415_v21 = vpop.f32.mrf.mxu1 }
 0x5b9   :  { %4908 = vst [vmem:[#allocation11 + $0x140] sm:$0xff] %v4752_v30   ;;  %v3416_v3 = vadd.f32 %v6914_v38, %v3415_v21 }
 0x5ba   :  { %v5539_v51 = vpop.f32.mrf.mxu1 }
 0x5bb   :  { %v3427_v19 = vadd.f32 %v5539_v51, %v6914_v38 }
 0x5bc   :  { %v3418_v24 = vpop.f32.mrf.mxu1 }
 0x5bd   :  { %v4767_v61 = vpack.c.bf16 %v3427_v19, %v3424_v34  ;;  %v3419_v44 = vadd.f32 %v6914_v38, %v3418_v24 }
 0x5be   :  { %v5542_v17 = vpop.f32.mrf.mxu1 }
 0x5bf   :  { %4911 = vst [vmem:[#allocation11 + $0x158] sm:$0xff] %v4767_v61   ;;  %v4762_v36 = vpack.c.bf16 %v3419_v44, %v3416_v3  ;;  %v3440_v49 = vadd.f32 %v5542_v17, %v6914_v38 }
 0x5c0   :  { %v3431_v27 = vpop.f32.mrf.mxu1 }
 0x5c1   :  { %4910 = vst [vmem:[#allocation11 + $0x150] sm:$0xff] %v4762_v36   ;;  %v3432_v40 = vadd.f32 %v6914_v38, %v3431_v27 }
 0x5c2   :  { %v5543_v9 = vpop.f32.mrf.mxu1 }
 0x5c3   :  { %v3443_v18 = vadd.f32 %v5543_v9, %v6914_v38 }
 0x5c4   :  { %v3434_v26 = vpop.f32.mrf.mxu1 }
 0x5c5   :  { %v4777_v35 = vpack.c.bf16 %v3443_v18, %v3440_v49  ;;  %v3435_v45 = vadd.f32 %v6914_v38, %v3434_v26 }
 0x5c6   :  { %v5546_v55 = vpop.f32.mrf.mxu1 }
 0x5c7   :  { %4913 = vst [vmem:[#allocation11 + $0x168] sm:$0xff] %v4777_v35   ;;  %v4772_v32 = vpack.c.bf16 %v3435_v45, %v3432_v40  ;;  %v3456_v56 = vadd.f32 %v5546_v55, %v6914_v38 }
 0x5c8   :  { %v3447_v13 = vpop.f32.mrf.mxu1 }
 0x5c9   :  { %4912 = vst [vmem:[#allocation11 + $0x160] sm:$0xff] %v4772_v32   ;;  %v3448_v22 = vadd.f32 %v6914_v38, %v3447_v13 }
 0x5ca   :  { %v5547_v47 = vpop.f32.mrf.mxu1 }
 0x5cb   :  { %v3459_v58 = vadd.f32 %v5547_v47, %v6914_v38 }
 0x5cc   :  { %v3450_v16 = vpop.f32.mrf.mxu1 }
 0x5cd   :  { %v4787_v48 = vpack.c.bf16 %v3459_v58, %v3456_v56  ;;  %v3451_v0 = vadd.f32 %v6914_v38, %v3450_v16 }
 0x5ce   :  { %v5550_v52 = vpop.f32.mrf.mxu1 }
 0x5cf   :  { %4915 = vst [vmem:[#allocation11 + $0x178] sm:$0xff] %v4787_v48   ;;  %v4782_v8 = vpack.c.bf16 %v3451_v0, %v3448_v22  ;;  %v3472_v62 = vadd.f32 %v5550_v52, %v6914_v38 }
 0x5d0   :  { %v3463_v59 = vpop.f32.mrf.mxu1 }
 0x5d1   :  { %4914 = vst [vmem:[#allocation11 + $0x170] sm:$0xff] %v4782_v8   ;;  %v3464_v42 = vadd.f32 %v6914_v38, %v3463_v59 }
 0x5d2   :  { %v5551_v7 = vpop.f32.mrf.mxu1 }
 0x5d3   :  { %v3475_v60 = vadd.f32 %v5551_v7, %v6914_v38 }
 0x5d4   :  { %v3466_v43 = vpop.f32.mrf.mxu1 }
 0x5d5   :  { %v4797_v10 = vpack.c.bf16 %v3475_v60, %v3472_v62  ;;  %v3467_v50 = vadd.f32 %v6914_v38, %v3466_v43 }
 0x5d6   :  { %v5554_v2 = vpop.f32.mrf.mxu1 }
 0x5d7   :  { %4917 = vst [vmem:[#allocation11 + $0x188] sm:$0xff] %v4797_v10   ;;  %v4792_v15 = vpack.c.bf16 %v3467_v50, %v3464_v42  ;;  %v3488_v54 = vadd.f32 %v5554_v2, %v6914_v38 }
 0x5d8   :  { %v3479_v14 = vpop.f32.mrf.mxu1 }
 0x5d9   :  { %4916 = vst [vmem:[#allocation11 + $0x180] sm:$0xff] %v4792_v15   ;;  %v3480_v23 = vadd.f32 %v6914_v38, %v3479_v14 }
 0x5da   :  { %v5555_v20 = vpop.f32.mrf.mxu1 }
 0x5db   :  { %v3491_v29 = vadd.f32 %v5555_v20, %v6914_v38 }
 0x5dc   :  { %v3482_v53 = vpop.f32.mrf.mxu1 }
 0x5dd   :  { %v4807_v46 = vpack.c.bf16 %v3491_v29, %v3488_v54  ;;  %v3483_v25 = vadd.f32 %v6914_v38, %v3482_v53 }
 0x5de   :  { %v5558_v6 = vpop.f32.mrf.mxu1 }
 0x5df   :  { %4919 = vst [vmem:[#allocation11 + $0x198] sm:$0xff] %v4807_v46   ;;  %v4802_v11 = vpack.c.bf16 %v3483_v25, %v3480_v23  ;;  %v3504_v33 = vadd.f32 %v5558_v6, %v6914_v38 }
 0x5e0   :  { %v3495_v39 = vpop.f32.mrf.mxu1 }
 0x5e1   :  { %4918 = vst [vmem:[#allocation11 + $0x190] sm:$0xff] %v4802_v11   ;;  %v3496_v12 = vadd.f32 %v6914_v38, %v3495_v39 }
 0x5e2   :  { %v5559_v31 = vpop.f32.mrf.mxu1 }
 0x5e3   :  { %v3507_v5 = vadd.f32 %v5559_v31, %v6914_v38 }
 0x5e4   :  { %v3498_v4 = vpop.f32.mrf.mxu1 }
 0x5e5   :  { %v4817_v37 = vpack.c.bf16 %v3507_v5, %v3504_v33  ;;  %v3499_v1 = vadd.f32 %v6914_v38, %v3498_v4 }
 0x5e6   :  { %v5562_v57 = vpop.f32.mrf.mxu1 }
 0x5e7   :  { %4921 = vst [vmem:[#allocation11 + $0x1a8] sm:$0xff] %v4817_v37   ;;  %v4812_v28 = vpack.c.bf16 %v3499_v1, %v3496_v12  ;;  %v3520_v30 = vadd.f32 %v5562_v57, %v6914_v38 }
 0x5e8   :  { %v3511_v41 = vpop.f32.mrf.mxu1 }
 0x5e9   :  { %4920 = vst [vmem:[#allocation11 + $0x1a0] sm:$0xff] %v4812_v28   ;;  %v3512_v34 = vadd.f32 %v6914_v38, %v3511_v41 }
 0x5ea   :  { %v5563_v63 = vpop.f32.mrf.mxu1 }
 0x5eb   :  { %v3523_v21 = vadd.f32 %v5563_v63, %v6914_v38 }
 0x5ec   :  { %v3514_v51 = vpop.f32.mrf.mxu1 }
 0x5ed   :  { %v4827_v19 = vpack.c.bf16 %v3523_v21, %v3520_v30  ;;  %v3515_v24 = vadd.f32 %v6914_v38, %v3514_v51 }
 0x5ee   :  { %v5566_v3 = vpop.f32.mrf.mxu1 }
 0x5ef   :  { %4923 = vst [vmem:[#allocation11 + $0x1b8] sm:$0xff] %v4827_v19   ;;  %v4822_v61 = vpack.c.bf16 %v3515_v24, %v3512_v34  ;;  %v3536_v36 = vadd.f32 %v5566_v3, %v6914_v38 }
 0x5f0   :  { %v3527_v44 = vpop.f32.mrf.mxu1 }
 0x5f1   :  { %4922 = vst [vmem:[#allocation11 + $0x1b0] sm:$0xff] %v4822_v61   ;;  %v3528_v49 = vadd.f32 %v6914_v38, %v3527_v44 }
 0x5f2   :  { %v5567_v17 = vpop.f32.mrf.mxu1 }
 0x5f3   :  { %v3539_v27 = vadd.f32 %v5567_v17, %v6914_v38 }
 0x5f4   :  { %v3530_v9 = vpop.f32.mrf.mxu1 }
 0x5f5   :  { %v4837_v18 = vpack.c.bf16 %v3539_v27, %v3536_v36  ;;  %v3531_v26 = vadd.f32 %v6914_v38, %v3530_v9 }
 0x5f6   :  { %v5570_v40 = vpop.f32.mrf.mxu1 }
 0x5f7   :  { %4925 = vst [vmem:[#allocation11 + $0x1c8] sm:$0xff] %v4837_v18   ;;  %v4832_v35 = vpack.c.bf16 %v3531_v26, %v3528_v49  ;;  %v3552_v32 = vadd.f32 %v5570_v40, %v6914_v38 }
 0x5f8   :  { %v3543_v45 = vpop.f32.mrf.mxu1 }
 0x5f9   :  { %4924 = vst [vmem:[#allocation11 + $0x1c0] sm:$0xff] %v4832_v35   ;;  %v3544_v56 = vadd.f32 %v6914_v38, %v3543_v45 }
 0x5fa   :  { %v5571_v55 = vpop.f32.mrf.mxu1 }
 0x5fb   :  { %v3555_v13 = vadd.f32 %v5571_v55, %v6914_v38 }
 0x5fc   :  { %v3546_v47 = vpop.f32.mrf.mxu1 }
 0x5fd   :  { %v4847_v58 = vpack.c.bf16 %v3555_v13, %v3552_v32  ;;  %v3547_v16 = vadd.f32 %v6914_v38, %v3546_v47 }
 0x5fe   :  { %v5574_v22 = vpop.f32.mrf.mxu1 }
 0x5ff   :  { %4927 = vst [vmem:[#allocation11 + $0x1d8] sm:$0xff] %v4847_v58   ;;  %v4842_v48 = vpack.c.bf16 %v3547_v16, %v3544_v56  ;;  %v3568_v8 = vadd.f32 %v5574_v22, %v6914_v38 }
 0x600   :  { %v3559_v0 = vpop.f32.mrf.mxu1 }
 0x601   :  { %4926 = vst [vmem:[#allocation11 + $0x1d0] sm:$0xff] %v4842_v48   ;;  %v3560_v62 = vadd.f32 %v6914_v38, %v3559_v0 }
 0x602   :  { %v5575_v52 = vpop.f32.mrf.mxu1 }
 0x603   :  { %v3571_v59 = vadd.f32 %v5575_v52, %v6914_v38 }
 0x604   :  { %v3562_v7 = vpop.f32.mrf.mxu1 }
 0x605   :  { %v4857_v60 = vpack.c.bf16 %v3571_v59, %v3568_v8  ;;  %v3563_v43 = vadd.f32 %v6914_v38, %v3562_v7 }
 0x606   :  { %v5578_v42 = vpop.f32.mrf.mxu1 }
 0x607   :  { %4929 = vst [vmem:[#allocation11 + $0x1e8] sm:$0xff] %v4857_v60   ;;  %v4852_v10 = vpack.c.bf16 %v3563_v43, %v3560_v62  ;;  %v3584_v15 = vadd.f32 %v5578_v42, %v6914_v38 }
 0x608   :  { %v3575_v50 = vpop.f32.mrf.mxu1 }
 0x609   :  { %4928 = vst [vmem:[#allocation11 + $0x1e0] sm:$0xff] %v4852_v10   ;;  %v3576_v54 = vadd.f32 %v6914_v38, %v3575_v50 }
 0x60a   :  { %v5579_v2 = vpop.f32.mrf.mxu1 }
 0x60b   :  { %v3587_v14 = vadd.f32 %v5579_v2, %v6914_v38 }
 0x60c   :  { %v3578_v20 = vpop.f32.mrf.mxu1 }
 0x60d   :  { %v4867_v29 = vpack.c.bf16 %v3587_v14, %v3584_v15  ;;  %v3579_v53 = vadd.f32 %v6914_v38, %v3578_v20 }
 0x60f   :  { %4931 = vst [vmem:[#allocation11 + $0x1f8] sm:$0xff] %v4867_v29   ;;  %v4862_v23 = vpack.c.bf16 %v3579_v53, %v3576_v54 }
 0x611   :  { %4930 = vst [vmem:[#allocation11 + $0x1f0] sm:$0xff] %v4862_v23  }
 0x612   :  { %4234 = vsyncadd [#allocation4], 192  ;;  %s5788_s6 = smov [#allocation11]  }
 0x613   :  { %s4235_s25 = sshll.u32 %s5788_s6, 4  ;;  %s4236_s25 = int_to_ptr.vmem [resolvable:$true] %s4235_s25 }
 0x614   :  { %s5750_s26 = scalar_lea.vmem %s4236_s25, 8000  ;;  %s5754_s27 = scalar_lea.vmem %s4236_s25, 8192 }
 0x615   :  { %p5751_p11 = scmp.ne.s32.totalorder %s4236_s25, %s5750_s26  ;;  %p5755_p12 = scmp.lt.s32.totalorder %s4236_s25, %s4236_s25 }
 0x616   :  { %p5756_p13 = scmp.lt.s32.totalorder %s5754_s27, %s5750_s26 }
 0x618   :  { %p5757_p0 = por %p5756_p13, %p5755_p12 }
 0x61a   :  { %p5758_p1 = pnand %p5757_p0, %p5751_p11 }
 0x61c   :  { %5761 = shalt.err (!%p5758_p1)
}
 0x61d   :  { %4241 = dma.vmem_to_hbm [thread:$0]  %s4236_s25, 8000, %s7098_s9, [#allocation4], %s5779_s12, %s5779_s12, %s5780_s13  }
 0x61e   :  { %5776 = dma.done.wait [#allocation4], 8192  }
 0x61f   :  { %5777 = vsyncadd [#allocation4], 4294959104 }
 0x620   :  { %4245 = vsyncpa [#allocation3], 1 }
 0x621   :  { %4246 = vsyncpa [#allocation6], 1 }
 0x622   :  { %4247 = vsyncpa [#allocation9], 1 }
 0x623   :  { %4248 = vsyncpa [#allocation4], 1 }

</bundles_post_ra>
